<compile_context>
chip_gen: v6e
topology: v6e:2x2x1
jax: 0.10.0
libtpu: 0.0.40
codegen_flags: <defaults>
</compile_context>

<pallas_src>
from collections import OrderedDict

import numpy as np
import jax
import jax.numpy as jnp
from jax.experimental import pallas as pl
from jax.experimental.pallas import tpu as pltpu


# ------------------------- host-side static helpers ------------------------ #

def _nearest_onehot(dst_hw, src_hw):
    """One-hot matrix M (Hd*Wd, Hs*Ws): M @ x_flat == nearest-upsample(x).
    Uses PyTorch F.interpolate(mode='nearest') indexing: src = floor(dst*in/out)."""
    (hd, wd), (hs, ws) = dst_hw, src_hw
    iy = (np.arange(hd) * hs) // hd
    ix = (np.arange(wd) * ws) // wd
    src = (iy[:, None] * ws + ix[None, :]).reshape(-1)
    m = np.zeros((hd * wd, hs * ws), np.float32)
    m[np.arange(hd * wd), src] = 1.0
    return m


def init_params(key, in_channels_list, out_channels):
    params = {"inner_w": [], "inner_b": [], "layer_w": [], "layer_b": []}
    for cin in in_channels_list:
        key, k1, k2, k3, k4 = jax.random.split(key, 5)
        params["inner_w"].append(0.1 * jax.random.normal(k1, (cin, out_channels), jnp.float32))
        params["inner_b"].append(0.1 * jax.random.normal(k2, (out_channels,), jnp.float32))
        params["layer_w"].append(0.1 * jax.random.normal(
            k3, (3, 3, out_channels, out_channels), jnp.float32))  # HWIO
        params["layer_b"].append(0.1 * jax.random.normal(k4, (out_channels,), jnp.float32))
    return params


# ------------------------------ fused kernel ------------------------------- #

def _make_fpn_kernel(spatial, cins, out_c):
    """spatial = [(H,W), ...] fine->coarse, cins = per-level input channels."""
    nl = len(spatial)
    bf16, f32 = jnp.bfloat16, jnp.float32

    def kernel(*refs):
        # ref layout: [x_0..x_{nl-1}] [iw,ib,lw,lb per level] [up_0..up_{nl-2}]
        #             [o_0..o_{nl-1}] [pad_0..pad_{nl-1}]
        x_refs = refs[0:nl]
        p_refs = refs[nl:nl + 4 * nl]
        up_refs = refs[nl + 4 * nl:nl + 5 * nl - 1]
        o_refs = refs[nl + 5 * nl - 1:nl + 6 * nl - 1]
        pad_refs = refs[nl + 6 * nl - 1:]

        def lateral(i, td):
            # 1x1 conv (per-pixel matmul over channels) + bias (+ top-down add).
            h, w = spatial[i]
            x = x_refs[i][...].reshape(h * w, cins[i])          # already bf16
            iw, ib = p_refs[4 * i], p_refs[4 * i + 1]
            y = jnp.dot(x, iw[...], preferred_element_type=f32) + ib[...]
            return y if td is None else y + td                      # (h*w, C) f32

        def conv3x3_t(i, inner):
            # 3x3 SAME conv as ONE matmul over the 9 lane-concatenated taps.
            # Zero-padding is done in VMEM scratch; returns (C, h*w) f32.
            h, w = spatial[i]
            lw, lb = p_refs[4 * i + 2], p_refs[4 * i + 3]
            pad = pad_refs[i]
            pad[...] = jnp.zeros_like(pad)                          # zero border
            pad[:, 1:h + 1, 1:w + 1, :] = inner.reshape(1, h, w, out_c)
            xp = pad[...]                                           # (1, h+2, w+2, C)
            taps = [xp[:, ky:ky + h, kx:kx + w, :]
                    for ky in range(3) for kx in range(3)]
            pat = jnp.concatenate(taps, axis=-1).reshape(h * w, 9 * out_c)
            y = jnp.dot(pat.astype(bf16), lw[...],
                        preferred_element_type=f32) + lb[...]       # (h*w, C)
            return y.T                                              # lane-dense out

        # coarsest level: no top-down term (no zero tensor needed).
        inner = lateral(nl - 1, None)
        h, w = spatial[nl - 1]
        o_refs[nl - 1][...] = conv3x3_t(nl - 1, inner).reshape(1, out_c, h * w)

        # top-down pass, coarse -> fine.
        for i in range(nl - 2, -1, -1):
            td = jnp.dot(up_refs[i][...], inner.astype(bf16),
                         preferred_element_type=f32)                # nearest upsample
            inner = lateral(i, td)
            h, w = spatial[i]
            o_refs[i][...] = conv3x3_t(i, inner).reshape(1, out_c, h * w)

    return kernel


# --------------------------------- wrapper --------------------------------- #

def fpn_wrapper_forward(params, feat0, feat1, feat2):
    """Inputs NCHW (PyTorch convention). Returns OrderedDict of NCHW f32 outputs."""
    feats = [feat0, feat1, feat2]
    n = int(feats[0].shape[0])
    nl = len(feats)
    out_c = int(params["inner_w"][0].shape[1])
    spatial = [(int(f.shape[2]), int(f.shape[3])) for f in feats]
    cins = [int(f.shape[1]) for f in feats]

    # activations: NCHW -> (N, H*W, Cin) so channels sit on the lane axis.
    # Shipped as bf16 (the matmuls consume bf16 anyway) -> half the input DMA.
    xs = [jnp.transpose(f, (0, 2, 3, 1)).reshape(n, h * w, c).astype(jnp.bfloat16)
          for f, (h, w), c in zip(feats, spatial, cins)]

    # per-level params: 1x1 weight (Cin,C) bf16, bias (1,C) f32,
    # 3x3 weight flattened to (9*C, C) bf16 with (ky,kx,cin) row order, bias (1,C).
    pw = []
    for i in range(nl):
        pw += [params["inner_w"][i].astype(jnp.bfloat16),
               params["inner_b"][i].reshape(1, out_c),
               params["layer_w"][i].reshape(9 * out_c, out_c).astype(jnp.bfloat16),
               params["layer_b"][i].reshape(1, out_c)]

    # one-hot nearest-upsample matrices: level i+1 -> level i (per batch element).
    ups = [jnp.asarray(_nearest_onehot(spatial[i], spatial[i + 1]), jnp.bfloat16)
           for i in range(nl - 1)]

    def batched_spec(shape):   # one batch element per grid step, full otherwise
        blk = (1,) + tuple(int(s) for s in shape[1:])
        return pl.BlockSpec(blk, lambda b, _r=len(shape): (b,) + (0,) * (_r - 1))

    def full_spec(shape):      # whole (tiny) array resident, fetched once
        return pl.BlockSpec(tuple(int(s) for s in shape),
                            lambda b, _r=len(shape): (0,) * _r)

    in_specs = ([batched_spec(x.shape) for x in xs]
                + [full_spec(p.shape) for p in pw]
                + [full_spec(u.shape) for u in ups])
    out_shapes = tuple(jax.ShapeDtypeStruct((n, out_c, h * w), jnp.float32)
                       for (h, w) in spatial)
    out_specs = tuple(batched_spec(s.shape) for s in out_shapes)
    scratch = [pltpu.VMEM((1, h + 2, w + 2, out_c), jnp.float32)
               for (h, w) in spatial]

    kernel = _make_fpn_kernel(spatial, cins, out_c)
    outs = pl.pallas_call(
        kernel,
        out_shape=out_shapes,
        grid=(n,),
        in_specs=in_specs,
        out_specs=out_specs,
        scratch_shapes=scratch,
        compiler_params=pltpu.CompilerParams(
            dimension_semantics=("parallel",)),  # v7x: batch elements -> 2 TCs
    )(*xs, *pw, *ups)

    names = [f"feat{i}" for i in range(nl)]
    return OrderedDict(
        (name, o.reshape(n, out_c, h, w))        # (N,C,H*W) -> NCHW, free reshape
        for name, o, (h, w) in zip(names, outs, spatial))


# --------------------------- pure-JAX reference ----------------------------- #

def _upsample_nearest_ref(x, out_h, out_w):
    nn, h, w, c = x.shape
    iy = (jnp.arange(out_h) * h) // out_h
    ix = (jnp.arange(out_w) * w) // out_w
    return x[:, iy][:, :, ix]


def _ref_conv(x, w, b, padding):
    y = jax.lax.conv_general_dilated(
        x, w, window_strides=(1, 1), padding=padding,
        dimension_numbers=("NHWC", "HWIO", "NHWC"),
        precision=jax.lax.Precision.HIGHEST)
    return y + b.reshape(1, 1, 1, -1)


def ref_forward(params, feat0, feat1, feat2):
    feats = [feat0, feat1, feat2]
    xs = [jnp.transpose(f, (0, 2, 3, 1)).astype(jnp.float32) for f in feats]
    nl = len(xs)

    def inner(i, x):
        return _ref_conv(x, params["inner_w"][i][None, None], params["inner_b"][i], "VALID")

    def layer(i, x):
        return _ref_conv(x, params["layer_w"][i], params["layer_b"][i], "SAME")

    last = inner(nl - 1, xs[-1])
    results = [layer(nl - 1, last)]
    for idx in range(nl - 2, -1, -1):
        h, w = xs[idx].shape[1], xs[idx].shape[2]
        td = _upsample_nearest_ref(last, h, w)
        last = inner(idx, xs[idx]) + td
        results.insert(0, layer(idx, last))
    return [jnp.transpose(r, (0, 3, 1, 2)) for r in results]


# ----------------------------------- main ----------------------------------- #

if __name__ == "__main__":
    in_channels_list = [4, 8, 16]
    out_channels = 8
    n = 2

    key = jax.random.PRNGKey(0)
    kp, k0, k1, k2 = jax.random.split(key, 4)
    params = init_params(kp, in_channels_list, out_channels)

    # NCHW inputs, like the PyTorch module (pyramid: shrinking spatial dims).
    feat0 = jax.random.normal(k0, (n, in_channels_list[0], 16, 16), jnp.float32)
    feat1 = jax.random.normal(k1, (n, in_channels_list[1], 8, 8), jnp.float32)
    feat2 = jax.random.normal(k2, (n, in_channels_list[2], 4, 4), jnp.float32)

    fwd = jax.jit(fpn_wrapper_forward)
    out = fwd(params, feat0, feat1, feat2)
    out = jax.block_until_ready(out)

    # sanity: shapes + numerics vs pure-JAX f32 reference (kernel is bf16/f32-acc,
    # hence the loose-ish but still bug-catching tolerance).
    assert out["feat0"].shape == (n, out_channels, 16, 16)
    assert out["feat1"].shape == (n, out_channels, 8, 8)
    assert out["feat2"].shape == (n, out_channels, 4, 4)
    refs = ref_forward(params, feat0, feat1, feat2)
    for name, ref in zip(["feat0", "feat1", "feat2"], refs):
        np.testing.assert_allclose(np.asarray(out[name]), np.asarray(ref),
                                   rtol=2e-2, atol=2e-2)

    print("KERNEL_OK")
</pallas_src>

<mosaic_0001>
module attributes {stable_mosaic.version = 11 : i64} {
  func.func @kernel(%arg0: i32, %arg1: memref<1x256x4xbf16, #tpu.memory_space<vmem>>, %arg2: memref<1x64x8xbf16, #tpu.memory_space<vmem>>, %arg3: memref<1x16x16xbf16, #tpu.memory_space<vmem>>, %arg4: memref<4x8xbf16, #tpu.memory_space<vmem>>, %arg5: memref<1x8xf32, #tpu.memory_space<vmem>>, %arg6: memref<72x8xbf16, #tpu.memory_space<vmem>>, %arg7: memref<1x8xf32, #tpu.memory_space<vmem>>, %arg8: memref<8x8xbf16, #tpu.memory_space<vmem>>, %arg9: memref<1x8xf32, #tpu.memory_space<vmem>>, %arg10: memref<72x8xbf16, #tpu.memory_space<vmem>>, %arg11: memref<1x8xf32, #tpu.memory_space<vmem>>, %arg12: memref<16x8xbf16, #tpu.memory_space<vmem>>, %arg13: memref<1x8xf32, #tpu.memory_space<vmem>>, %arg14: memref<72x8xbf16, #tpu.memory_space<vmem>>, %arg15: memref<1x8xf32, #tpu.memory_space<vmem>>, %arg16: memref<256x64xbf16, #tpu.memory_space<vmem>>, %arg17: memref<64x16xbf16, #tpu.memory_space<vmem>>, %arg18: memref<1x8x256xf32, #tpu.memory_space<vmem>>, %arg19: memref<1x8x64xf32, #tpu.memory_space<vmem>>, %arg20: memref<1x8x16xf32, #tpu.memory_space<vmem>>, %arg21: memref<1x18x18x8xf32, #tpu.memory_space<vmem>>, %arg22: memref<1x10x10x8xf32, #tpu.memory_space<vmem>>, %arg23: memref<1x6x6x8xf32, #tpu.memory_space<vmem>>) attributes {dimension_semantics = [#tpu.dimension_semantics<parallel>], iteration_bounds = array<i64: 2>, scalar_prefetch = 0 : i64, scratch_operands = 3 : i64, tpu.core_type = #tpu.core_type<tc>, window_params = [{transform_indices = @transform_0, window_bounds = array<i64: 1, 256, 4>}, {transform_indices = @transform_1, window_bounds = array<i64: 1, 64, 8>}, {transform_indices = @transform_2, window_bounds = array<i64: 1, 16, 16>}, {pipeline_mode = #tpu.pipeline_mode<synchronous>, transform_indices = @transform_3, window_bounds = array<i64: 4, 8>}, {pipeline_mode = #tpu.pipeline_mode<synchronous>, transform_indices = @transform_4, window_bounds = array<i64: 1, 8>}, {pipeline_mode = #tpu.pipeline_mode<synchronous>, transform_indices = @transform_5, window_bounds = array<i64: 72, 8>}, {pipeline_mode = #tpu.pipeline_mode<synchronous>, transform_indices = @transform_6, window_bounds = array<i64: 1, 8>}, {pipeline_mode = #tpu.pipeline_mode<synchronous>, transform_indices = @transform_7, window_bounds = array<i64: 8, 8>}, {pipeline_mode = #tpu.pipeline_mode<synchronous>, transform_indices = @transform_8, window_bounds = array<i64: 1, 8>}, {pipeline_mode = #tpu.pipeline_mode<synchronous>, transform_indices = @transform_9, window_bounds = array<i64: 72, 8>}, {pipeline_mode = #tpu.pipeline_mode<synchronous>, transform_indices = @transform_10, window_bounds = array<i64: 1, 8>}, {pipeline_mode = #tpu.pipeline_mode<synchronous>, transform_indices = @transform_11, window_bounds = array<i64: 16, 8>}, {pipeline_mode = #tpu.pipeline_mode<synchronous>, transform_indices = @transform_12, window_bounds = array<i64: 1, 8>}, {pipeline_mode = #tpu.pipeline_mode<synchronous>, transform_indices = @transform_13, window_bounds = array<i64: 72, 8>}, {pipeline_mode = #tpu.pipeline_mode<synchronous>, transform_indices = @transform_14, window_bounds = array<i64: 1, 8>}, {pipeline_mode = #tpu.pipeline_mode<synchronous>, transform_indices = @transform_15, window_bounds = array<i64: 256, 64>}, {pipeline_mode = #tpu.pipeline_mode<synchronous>, transform_indices = @transform_16, window_bounds = array<i64: 64, 16>}, {transform_indices = @transform_17, window_bounds = array<i64: 1, 8, 256>}, {transform_indices = @transform_18, window_bounds = array<i64: 1, 8, 64>}, {transform_indices = @transform_19, window_bounds = array<i64: 1, 8, 16>}]} {
    %c0 = arith.constant 0 : index
    %c0_0 = arith.constant 0 : index
    %c0_1 = arith.constant 0 : index
    %0 = vector.load %arg3[%c0, %c0_0, %c0_1] : memref<1x16x16xbf16, #tpu.memory_space<vmem>>, vector<1x16x16xbf16>
    %1 = vector.shape_cast %0 : vector<1x16x16xbf16> to vector<16x16xbf16>
    %c0_2 = arith.constant 0 : index
    %c0_3 = arith.constant 0 : index
    %2 = vector.load %arg12[%c0_2, %c0_3] : memref<16x8xbf16, #tpu.memory_space<vmem>>, vector<16x8xbf16>
    %cst = arith.constant dense<0.000000e+00> : vector<16x8xf32>
    %3 = tpu.matmul %1, %2, %cst {dimension_numbers = #tpu.dot_dimension_numbers<[1], [0], [0], [1], [0, 0, 1, 1], [], []>} : vector<16x16xbf16>, vector<16x8xbf16>, vector<16x8xf32> -> vector<16x8xf32>
    %c0_4 = arith.constant 0 : index
    %c0_5 = arith.constant 0 : index
    %4 = vector.load %arg13[%c0_4, %c0_5] : memref<1x8xf32, #tpu.memory_space<vmem>>, vector<1x8xf32>
    %5 = vector.broadcast %4 : vector<1x8xf32> to vector<16x8xf32>
    %6 = arith.addf %3, %5 : vector<16x8xf32>
    %cst_6 = arith.constant 0.000000e+00 : f32
    %7 = vector.broadcast %cst_6 : f32 to vector<1x6x6x8xf32>
    %c0_7 = arith.constant 0 : index
    %c0_8 = arith.constant 0 : index
    %c0_9 = arith.constant 0 : index
    %c0_10 = arith.constant 0 : index
    %8 = vector.load %arg23[%c0_7, %c0_8, %c0_9, %c0_10] : memref<1x6x6x8xf32, #tpu.memory_space<vmem>>, vector<1x6x6x8xf32>
    tpu.vector_store %arg23[%c0_7, %c0_8, %c0_9, %c0_10], %7 {strides = array<i32>} : memref<1x6x6x8xf32, #tpu.memory_space<vmem>>, vector<1x6x6x8xf32>,
    %9 = vector.shape_cast %6 : vector<16x8xf32> to vector<1x4x4x8xf32>
    %c0_11 = arith.constant 0 : index
    %c1 = arith.constant 1 : index
    %c1_12 = arith.constant 1 : index
    %c0_13 = arith.constant 0 : index
    %10 = vector.load %arg23[%c0_11, %c1, %c1_12, %c0_13] : memref<1x6x6x8xf32, #tpu.memory_space<vmem>>, vector<1x4x4x8xf32>
    tpu.vector_store %arg23[%c0_11, %c1, %c1_12, %c0_13], %9 {strides = array<i32>} : memref<1x6x6x8xf32, #tpu.memory_space<vmem>>, vector<1x4x4x8xf32>,
    %c0_14 = arith.constant 0 : index
    %c0_15 = arith.constant 0 : index
    %c0_16 = arith.constant 0 : index
    %c0_17 = arith.constant 0 : index
    %11 = vector.load %arg23[%c0_14, %c0_15, %c0_16, %c0_17] : memref<1x6x6x8xf32, #tpu.memory_space<vmem>>, vector<1x6x6x8xf32>
    %12 = vector.extract_strided_slice %11 {offsets = [0, 0, 0, 0], sizes = [1, 4, 4, 8], strides = [1, 1, 1, 1]} : vector<1x6x6x8xf32> to vector<1x4x4x8xf32>
    %13 = vector.extract_strided_slice %11 {offsets = [0, 0, 1, 0], sizes = [1, 4, 4, 8], strides = [1, 1, 1, 1]} : vector<1x6x6x8xf32> to vector<1x4x4x8xf32>
    %14 = vector.extract_strided_slice %11 {offsets = [0, 0, 2, 0], sizes = [1, 4, 4, 8], strides = [1, 1, 1, 1]} : vector<1x6x6x8xf32> to vector<1x4x4x8xf32>
    %15 = vector.extract_strided_slice %11 {offsets = [0, 1, 0, 0], sizes = [1, 4, 4, 8], strides = [1, 1, 1, 1]} : vector<1x6x6x8xf32> to vector<1x4x4x8xf32>
    %16 = vector.extract_strided_slice %11 {offsets = [0, 1, 1, 0], sizes = [1, 4, 4, 8], strides = [1, 1, 1, 1]} : vector<1x6x6x8xf32> to vector<1x4x4x8xf32>
    %17 = vector.extract_strided_slice %11 {offsets = [0, 1, 2, 0], sizes = [1, 4, 4, 8], strides = [1, 1, 1, 1]} : vector<1x6x6x8xf32> to vector<1x4x4x8xf32>
    %18 = vector.extract_strided_slice %11 {offsets = [0, 2, 0, 0], sizes = [1, 4, 4, 8], strides = [1, 1, 1, 1]} : vector<1x6x6x8xf32> to vector<1x4x4x8xf32>
    %19 = vector.extract_strided_slice %11 {offsets = [0, 2, 1, 0], sizes = [1, 4, 4, 8], strides = [1, 1, 1, 1]} : vector<1x6x6x8xf32> to vector<1x4x4x8xf32>
    %20 = vector.extract_strided_slice %11 {offsets = [0, 2, 2, 0], sizes = [1, 4, 4, 8], strides = [1, 1, 1, 1]} : vector<1x6x6x8xf32> to vector<1x4x4x8xf32>
    %21 = tpu.concatenate %12, %13, %14, %15, %16, %17, %18, %19, %20 in 3 : vector<1x4x4x8xf32>, vector<1x4x4x8xf32>, vector<1x4x4x8xf32>, vector<1x4x4x8xf32>, vector<1x4x4x8xf32>, vector<1x4x4x8xf32>, vector<1x4x4x8xf32>, vector<1x4x4x8xf32>, vector<1x4x4x8xf32> -> vector<1x4x4x72xf32>
    %22 = vector.shape_cast %21 : vector<1x4x4x72xf32> to vector<16x72xf32>
    %23 = arith.truncf %22 : vector<16x72xf32> to vector<16x72xbf16>
    %c0_18 = arith.constant 0 : index
    %c0_19 = arith.constant 0 : index
    %24 = vector.load %arg14[%c0_18, %c0_19] : memref<72x8xbf16, #tpu.memory_space<vmem>>, vector<72x8xbf16>
    %cst_20 = arith.constant dense<0.000000e+00> : vector<16x8xf32>
    %25 = tpu.matmul %23, %24, %cst_20 {dimension_numbers = #tpu.dot_dimension_numbers<[1], [0], [0], [1], [0, 0, 1, 1], [], []>} : vector<16x72xbf16>, vector<72x8xbf16>, vector<16x8xf32> -> vector<16x8xf32>
    %c0_21 = arith.constant 0 : index
    %c0_22 = arith.constant 0 : index
    %26 = vector.load %arg15[%c0_21, %c0_22] : memref<1x8xf32, #tpu.memory_space<vmem>>, vector<1x8xf32>
    %27 = vector.broadcast %26 : vector<1x8xf32> to vector<16x8xf32>
    %28 = arith.addf %25, %27 : vector<16x8xf32>
    %29 = tpu.transpose %28, [1, 0] : vector<16x8xf32> -> vector<8x16xf32>
    %30 = vector.shape_cast %29 : vector<8x16xf32> to vector<1x8x16xf32>
    %c0_23 = arith.constant 0 : index
    %c0_24 = arith.constant 0 : index
    %c0_25 = arith.constant 0 : index
    %31 = vector.load %arg20[%c0_23, %c0_24, %c0_25] : memref<1x8x16xf32, #tpu.memory_space<vmem>>, vector<1x8x16xf32>
    tpu.vector_store %arg20[%c0_23, %c0_24, %c0_25], %30 {strides = array<i32>} : memref<1x8x16xf32, #tpu.memory_space<vmem>>, vector<1x8x16xf32>,
    %c0_26 = arith.constant 0 : index
    %c0_27 = arith.constant 0 : index
    %32 = vector.load %arg17[%c0_26, %c0_27] : memref<64x16xbf16, #tpu.memory_space<vmem>>, vector<64x16xbf16>
    %33 = arith.truncf %6 : vector<16x8xf32> to vector<16x8xbf16>
    %cst_28 = arith.constant dense<0.000000e+00> : vector<64x8xf32>
    %34 = tpu.matmul %32, %33, %cst_28 {dimension_numbers = #tpu.dot_dimension_numbers<[1], [0], [0], [1], [0, 0, 1, 1], [], []>} : vector<64x16xbf16>, vector<16x8xbf16>, vector<64x8xf32> -> vector<64x8xf32>
    %c0_29 = arith.constant 0 : index
    %c0_30 = arith.constant 0 : index
    %c0_31 = arith.constant 0 : index
    %35 = vector.load %arg2[%c0_29, %c0_30, %c0_31] : memref<1x64x8xbf16, #tpu.memory_space<vmem>>, vector<1x64x8xbf16>
    %36 = vector.shape_cast %35 : vector<1x64x8xbf16> to vector<64x8xbf16>
    %c0_32 = arith.constant 0 : index
    %c0_33 = arith.constant 0 : index
    %37 = vector.load %arg8[%c0_32, %c0_33] : memref<8x8xbf16, #tpu.memory_space<vmem>>, vector<8x8xbf16>
    %cst_34 = arith.constant dense<0.000000e+00> : vector<64x8xf32>
    %38 = tpu.matmul %36, %37, %cst_34 {dimension_numbers = #tpu.dot_dimension_numbers<[1], [0], [0], [1], [0, 0, 1, 1], [], []>} : vector<64x8xbf16>, vector<8x8xbf16>, vector<64x8xf32> -> vector<64x8xf32>
    %c0_35 = arith.constant 0 : index
    %c0_36 = arith.constant 0 : index
    %39 = vector.load %arg9[%c0_35, %c0_36] : memref<1x8xf32, #tpu.memory_space<vmem>>, vector<1x8xf32>
    %40 = vector.broadcast %39 : vector<1x8xf32> to vector<64x8xf32>
    %41 = arith.addf %38, %40 : vector<64x8xf32>
    %42 = arith.addf %41, %34 : vector<64x8xf32>
    %cst_37 = arith.constant 0.000000e+00 : f32
    %43 = vector.broadcast %cst_37 : f32 to vector<1x10x10x8xf32>
    %c0_38 = arith.constant 0 : index
    %c0_39 = arith.constant 0 : index
    %c0_40 = arith.constant 0 : index
    %c0_41 = arith.constant 0 : index
    %44 = vector.load %arg22[%c0_38, %c0_39, %c0_40, %c0_41] : memref<1x10x10x8xf32, #tpu.memory_space<vmem>>, vector<1x10x10x8xf32>
    tpu.vector_store %arg22[%c0_38, %c0_39, %c0_40, %c0_41], %43 {strides = array<i32>} : memref<1x10x10x8xf32, #tpu.memory_space<vmem>>, vector<1x10x10x8xf32>,
    %45 = vector.shape_cast %42 : vector<64x8xf32> to vector<1x8x8x8xf32>
    %c0_42 = arith.constant 0 : index
    %c1_43 = arith.constant 1 : index
    %c1_44 = arith.constant 1 : index
    %c0_45 = arith.constant 0 : index
    %46 = vector.load %arg22[%c0_42, %c1_43, %c1_44, %c0_45] : memref<1x10x10x8xf32, #tpu.memory_space<vmem>>, vector<1x8x8x8xf32>
    tpu.vector_store %arg22[%c0_42, %c1_43, %c1_44, %c0_45], %45 {strides = array<i32>} : memref<1x10x10x8xf32, #tpu.memory_space<vmem>>, vector<1x8x8x8xf32>,
    %c0_46 = arith.constant 0 : index
    %c0_47 = arith.constant 0 : index
    %c0_48 = arith.constant 0 : index
    %c0_49 = arith.constant 0 : index
    %47 = vector.load %arg22[%c0_46, %c0_47, %c0_48, %c0_49] : memref<1x10x10x8xf32, #tpu.memory_space<vmem>>, vector<1x10x10x8xf32>
    %48 = vector.extract_strided_slice %47 {offsets = [0, 0, 0, 0], sizes = [1, 8, 8, 8], strides = [1, 1, 1, 1]} : vector<1x10x10x8xf32> to vector<1x8x8x8xf32>
    %49 = vector.extract_strided_slice %47 {offsets = [0, 0, 1, 0], sizes = [1, 8, 8, 8], strides = [1, 1, 1, 1]} : vector<1x10x10x8xf32> to vector<1x8x8x8xf32>
    %50 = vector.extract_strided_slice %47 {offsets = [0, 0, 2, 0], sizes = [1, 8, 8, 8], strides = [1, 1, 1, 1]} : vector<1x10x10x8xf32> to vector<1x8x8x8xf32>
    %51 = vector.extract_strided_slice %47 {offsets = [0, 1, 0, 0], sizes = [1, 8, 8, 8], strides = [1, 1, 1, 1]} : vector<1x10x10x8xf32> to vector<1x8x8x8xf32>
    %52 = vector.extract_strided_slice %47 {offsets = [0, 1, 1, 0], sizes = [1, 8, 8, 8], strides = [1, 1, 1, 1]} : vector<1x10x10x8xf32> to vector<1x8x8x8xf32>
    %53 = vector.extract_strided_slice %47 {offsets = [0, 1, 2, 0], sizes = [1, 8, 8, 8], strides = [1, 1, 1, 1]} : vector<1x10x10x8xf32> to vector<1x8x8x8xf32>
    %54 = vector.extract_strided_slice %47 {offsets = [0, 2, 0, 0], sizes = [1, 8, 8, 8], strides = [1, 1, 1, 1]} : vector<1x10x10x8xf32> to vector<1x8x8x8xf32>
    %55 = vector.extract_strided_slice %47 {offsets = [0, 2, 1, 0], sizes = [1, 8, 8, 8], strides = [1, 1, 1, 1]} : vector<1x10x10x8xf32> to vector<1x8x8x8xf32>
    %56 = vector.extract_strided_slice %47 {offsets = [0, 2, 2, 0], sizes = [1, 8, 8, 8], strides = [1, 1, 1, 1]} : vector<1x10x10x8xf32> to vector<1x8x8x8xf32>
    %57 = tpu.concatenate %48, %49, %50, %51, %52, %53, %54, %55, %56 in 3 : vector<1x8x8x8xf32>, vector<1x8x8x8xf32>, vector<1x8x8x8xf32>, vector<1x8x8x8xf32>, vector<1x8x8x8xf32>, vector<1x8x8x8xf32>, vector<1x8x8x8xf32>, vector<1x8x8x8xf32>, vector<1x8x8x8xf32> -> vector<1x8x8x72xf32>
    %58 = vector.shape_cast %57 : vector<1x8x8x72xf32> to vector<64x72xf32>
    %59 = arith.truncf %58 : vector<64x72xf32> to vector<64x72xbf16>
    %c0_50 = arith.constant 0 : index
    %c0_51 = arith.constant 0 : index
    %60 = vector.load %arg10[%c0_50, %c0_51] : memref<72x8xbf16, #tpu.memory_space<vmem>>, vector<72x8xbf16>
    %cst_52 = arith.constant dense<0.000000e+00> : vector<64x8xf32>
    %61 = tpu.matmul %59, %60, %cst_52 {dimension_numbers = #tpu.dot_dimension_numbers<[1], [0], [0], [1], [0, 0, 1, 1], [], []>} : vector<64x72xbf16>, vector<72x8xbf16>, vector<64x8xf32> -> vector<64x8xf32>
    %c0_53 = arith.constant 0 : index
    %c0_54 = arith.constant 0 : index
    %62 = vector.load %arg11[%c0_53, %c0_54] : memref<1x8xf32, #tpu.memory_space<vmem>>, vector<1x8xf32>
    %63 = vector.broadcast %62 : vector<1x8xf32> to vector<64x8xf32>
    %64 = arith.addf %61, %63 : vector<64x8xf32>
    %65 = tpu.transpose %64, [1, 0] : vector<64x8xf32> -> vector<8x64xf32>
    %66 = vector.shape_cast %65 : vector<8x64xf32> to vector<1x8x64xf32>
    %c0_55 = arith.constant 0 : index
    %c0_56 = arith.constant 0 : index
    %c0_57 = arith.constant 0 : index
    %67 = vector.load %arg19[%c0_55, %c0_56, %c0_57] : memref<1x8x64xf32, #tpu.memory_space<vmem>>, vector<1x8x64xf32>
    tpu.vector_store %arg19[%c0_55, %c0_56, %c0_57], %66 {strides = array<i32>} : memref<1x8x64xf32, #tpu.memory_space<vmem>>, vector<1x8x64xf32>,
    %c0_58 = arith.constant 0 : index
    %c0_59 = arith.constant 0 : index
    %68 = vector.load %arg16[%c0_58, %c0_59] : memref<256x64xbf16, #tpu.memory_space<vmem>>, vector<256x64xbf16>
    %69 = arith.truncf %42 : vector<64x8xf32> to vector<64x8xbf16>
    %cst_60 = arith.constant dense<0.000000e+00> : vector<256x8xf32>
    %70 = tpu.matmul %68, %69, %cst_60 {dimension_numbers = #tpu.dot_dimension_numbers<[1], [0], [0], [1], [0, 0, 1, 1], [], []>} : vector<256x64xbf16>, vector<64x8xbf16>, vector<256x8xf32> -> vector<256x8xf32>
    %c0_61 = arith.constant 0 : index
    %c0_62 = arith.constant 0 : index
    %c0_63 = arith.constant 0 : index
    %71 = vector.load %arg1[%c0_61, %c0_62, %c0_63] : memref<1x256x4xbf16, #tpu.memory_space<vmem>>, vector<1x256x4xbf16>
    %72 = vector.shape_cast %71 : vector<1x256x4xbf16> to vector<256x4xbf16>
    %c0_64 = arith.constant 0 : index
    %c0_65 = arith.constant 0 : index
    %73 = vector.load %arg4[%c0_64, %c0_65] : memref<4x8xbf16, #tpu.memory_space<vmem>>, vector<4x8xbf16>
    %cst_66 = arith.constant dense<0.000000e+00> : vector<256x8xf32>
    %74 = tpu.matmul %72, %73, %cst_66 {dimension_numbers = #tpu.dot_dimension_numbers<[1], [0], [0], [1], [0, 0, 1, 1], [], []>} : vector<256x4xbf16>, vector<4x8xbf16>, vector<256x8xf32> -> vector<256x8xf32>
    %c0_67 = arith.constant 0 : index
    %c0_68 = arith.constant 0 : index
    %75 = vector.load %arg5[%c0_67, %c0_68] : memref<1x8xf32, #tpu.memory_space<vmem>>, vector<1x8xf32>
    %76 = vector.broadcast %75 : vector<1x8xf32> to vector<256x8xf32>
    %77 = arith.addf %74, %76 : vector<256x8xf32>
    %78 = arith.addf %77, %70 : vector<256x8xf32>
    %cst_69 = arith.constant 0.000000e+00 : f32
    %79 = vector.broadcast %cst_69 : f32 to vector<1x18x18x8xf32>
    %c0_70 = arith.constant 0 : index
    %c0_71 = arith.constant 0 : index
    %c0_72 = arith.constant 0 : index
    %c0_73 = arith.constant 0 : index
    %80 = vector.load %arg21[%c0_70, %c0_71, %c0_72, %c0_73] : memref<1x18x18x8xf32, #tpu.memory_space<vmem>>, vector<1x18x18x8xf32>
    tpu.vector_store %arg21[%c0_70, %c0_71, %c0_72, %c0_73], %79 {strides = array<i32>} : memref<1x18x18x8xf32, #tpu.memory_space<vmem>>, vector<1x18x18x8xf32>,
    %81 = vector.shape_cast %78 : vector<256x8xf32> to vector<1x16x16x8xf32>
    %c0_74 = arith.constant 0 : index
    %c1_75 = arith.constant 1 : index
    %c1_76 = arith.constant 1 : index
    %c0_77 = arith.constant 0 : index
    %82 = vector.load %arg21[%c0_74, %c1_75, %c1_76, %c0_77] : memref<1x18x18x8xf32, #tpu.memory_space<vmem>>, vector<1x16x16x8xf32>
    tpu.vector_store %arg21[%c0_74, %c1_75, %c1_76, %c0_77], %81 {strides = array<i32>} : memref<1x18x18x8xf32, #tpu.memory_space<vmem>>, vector<1x16x16x8xf32>,
    %c0_78 = arith.constant 0 : index
    %c0_79 = arith.constant 0 : index
    %c0_80 = arith.constant 0 : index
    %c0_81 = arith.constant 0 : index
    %83 = vector.load %arg21[%c0_78, %c0_79, %c0_80, %c0_81] : memref<1x18x18x8xf32, #tpu.memory_space<vmem>>, vector<1x18x18x8xf32>
    %84 = vector.extract_strided_slice %83 {offsets = [0, 0, 0, 0], sizes = [1, 16, 16, 8], strides = [1, 1, 1, 1]} : vector<1x18x18x8xf32> to vector<1x16x16x8xf32>
    %85 = vector.extract_strided_slice %83 {offsets = [0, 0, 1, 0], sizes = [1, 16, 16, 8], strides = [1, 1, 1, 1]} : vector<1x18x18x8xf32> to vector<1x16x16x8xf32>
    %86 = vector.extract_strided_slice %83 {offsets = [0, 0, 2, 0], sizes = [1, 16, 16, 8], strides = [1, 1, 1, 1]} : vector<1x18x18x8xf32> to vector<1x16x16x8xf32>
    %87 = vector.extract_strided_slice %83 {offsets = [0, 1, 0, 0], sizes = [1, 16, 16, 8], strides = [1, 1, 1, 1]} : vector<1x18x18x8xf32> to vector<1x16x16x8xf32>
    %88 = vector.extract_strided_slice %83 {offsets = [0, 1, 1, 0], sizes = [1, 16, 16, 8], strides = [1, 1, 1, 1]} : vector<1x18x18x8xf32> to vector<1x16x16x8xf32>
    %89 = vector.extract_strided_slice %83 {offsets = [0, 1, 2, 0], sizes = [1, 16, 16, 8], strides = [1, 1, 1, 1]} : vector<1x18x18x8xf32> to vector<1x16x16x8xf32>
    %90 = vector.extract_strided_slice %83 {offsets = [0, 2, 0, 0], sizes = [1, 16, 16, 8], strides = [1, 1, 1, 1]} : vector<1x18x18x8xf32> to vector<1x16x16x8xf32>
    %91 = vector.extract_strided_slice %83 {offsets = [0, 2, 1, 0], sizes = [1, 16, 16, 8], strides = [1, 1, 1, 1]} : vector<1x18x18x8xf32> to vector<1x16x16x8xf32>
    %92 = vector.extract_strided_slice %83 {offsets = [0, 2, 2, 0], sizes = [1, 16, 16, 8], strides = [1, 1, 1, 1]} : vector<1x18x18x8xf32> to vector<1x16x16x8xf32>
    %93 = tpu.concatenate %84, %85, %86, %87, %88, %89, %90, %91, %92 in 3 : vector<1x16x16x8xf32>, vector<1x16x16x8xf32>, vector<1x16x16x8xf32>, vector<1x16x16x8xf32>, vector<1x16x16x8xf32>, vector<1x16x16x8xf32>, vector<1x16x16x8xf32>, vector<1x16x16x8xf32>, vector<1x16x16x8xf32> -> vector<1x16x16x72xf32>
    %94 = vector.shape_cast %93 : vector<1x16x16x72xf32> to vector<256x72xf32>
    %95 = arith.truncf %94 : vector<256x72xf32> to vector<256x72xbf16>
    %c0_82 = arith.constant 0 : index
    %c0_83 = arith.constant 0 : index
    %96 = vector.load %arg6[%c0_82, %c0_83] : memref<72x8xbf16, #tpu.memory_space<vmem>>, vector<72x8xbf16>
    %cst_84 = arith.constant dense<0.000000e+00> : vector<256x8xf32>
    %97 = tpu.matmul %95, %96, %cst_84 {dimension_numbers = #tpu.dot_dimension_numbers<[1], [0], [0], [1], [0, 0, 1, 1], [], []>} : vector<256x72xbf16>, vector<72x8xbf16>, vector<256x8xf32> -> vector<256x8xf32>
    %c0_85 = arith.constant 0 : index
    %c0_86 = arith.constant 0 : index
    %98 = vector.load %arg7[%c0_85, %c0_86] : memref<1x8xf32, #tpu.memory_space<vmem>>, vector<1x8xf32>
    %99 = vector.broadcast %98 : vector<1x8xf32> to vector<256x8xf32>
    %100 = arith.addf %97, %99 : vector<256x8xf32>
    %101 = tpu.transpose %100, [1, 0] : vector<256x8xf32> -> vector<8x256xf32>
    %102 = vector.shape_cast %101 : vector<8x256xf32> to vector<1x8x256xf32>
    %c0_87 = arith.constant 0 : index
    %c0_88 = arith.constant 0 : index
    %c0_89 = arith.constant 0 : index
    %103 = vector.load %arg18[%c0_87, %c0_88, %c0_89] : memref<1x8x256xf32, #tpu.memory_space<vmem>>, vector<1x8x256xf32>
    tpu.vector_store %arg18[%c0_87, %c0_88, %c0_89], %102 {strides = array<i32>} : memref<1x8x256xf32, #tpu.memory_space<vmem>>, vector<1x8x256xf32>,
    return
  }
  func.func @transform_0(%arg0: i32) -> (i32, i32, i32) {
    %c0_i32 = arith.constant 0 : i32
    %c0_i32_0 = arith.constant 0 : i32
    %c0_i32_1 = arith.constant 0 : i32
    return %arg0, %c0_i32, %c0_i32_0 : i32, i32, i32
  }
  func.func @transform_1(%arg0: i32) -> (i32, i32, i32) {
    %c0_i32 = arith.constant 0 : i32
    %c0_i32_0 = arith.constant 0 : i32
    %c0_i32_1 = arith.constant 0 : i32
    return %arg0, %c0_i32, %c0_i32_0 : i32, i32, i32
  }
  func.func @transform_2(%arg0: i32) -> (i32, i32, i32) {
    %c0_i32 = arith.constant 0 : i32
    %c0_i32_0 = arith.constant 0 : i32
    %c0_i32_1 = arith.constant 0 : i32
    return %arg0, %c0_i32, %c0_i32_0 : i32, i32, i32
  }
  func.func @transform_3(%arg0: i32) -> (i32, i32) {
    %c0_i32 = arith.constant 0 : i32
    %c0_i32_0 = arith.constant 0 : i32
    %c0_i32_1 = arith.constant 0 : i32
    return %c0_i32, %c0_i32_0 : i32, i32
  }
  func.func @transform_4(%arg0: i32) -> (i32, i32) {
    %c0_i32 = arith.constant 0 : i32
    %c0_i32_0 = arith.constant 0 : i32
    %c0_i32_1 = arith.constant 0 : i32
    return %c0_i32, %c0_i32_0 : i32, i32
  }
  func.func @transform_5(%arg0: i32) -> (i32, i32) {
    %c0_i32 = arith.constant 0 : i32
    %c0_i32_0 = arith.constant 0 : i32
    %c0_i32_1 = arith.constant 0 : i32
    return %c0_i32, %c0_i32_0 : i32, i32
  }
  func.func @transform_6(%arg0: i32) -> (i32, i32) {
    %c0_i32 = arith.constant 0 : i32
    %c0_i32_0 = arith.constant 0 : i32
    %c0_i32_1 = arith.constant 0 : i32
    return %c0_i32, %c0_i32_0 : i32, i32
  }
  func.func @transform_7(%arg0: i32) -> (i32, i32) {
    %c0_i32 = arith.constant 0 : i32
    %c0_i32_0 = arith.constant 0 : i32
    %c0_i32_1 = arith.constant 0 : i32
    return %c0_i32, %c0_i32_0 : i32, i32
  }
  func.func @transform_8(%arg0: i32) -> (i32, i32) {
    %c0_i32 = arith.constant 0 : i32
    %c0_i32_0 = arith.constant 0 : i32
    %c0_i32_1 = arith.constant 0 : i32
    return %c0_i32, %c0_i32_0 : i32, i32
  }
  func.func @transform_9(%arg0: i32) -> (i32, i32) {
    %c0_i32 = arith.constant 0 : i32
    %c0_i32_0 = arith.constant 0 : i32
    %c0_i32_1 = arith.constant 0 : i32
    return %c0_i32, %c0_i32_0 : i32, i32
  }
  func.func @transform_10(%arg0: i32) -> (i32, i32) {
    %c0_i32 = arith.constant 0 : i32
    %c0_i32_0 = arith.constant 0 : i32
    %c0_i32_1 = arith.constant 0 : i32
    return %c0_i32, %c0_i32_0 : i32, i32
  }
  func.func @transform_11(%arg0: i32) -> (i32, i32) {
    %c0_i32 = arith.constant 0 : i32
    %c0_i32_0 = arith.constant 0 : i32
    %c0_i32_1 = arith.constant 0 : i32
    return %c0_i32, %c0_i32_0 : i32, i32
  }
  func.func @transform_12(%arg0: i32) -> (i32, i32) {
    %c0_i32 = arith.constant 0 : i32
    %c0_i32_0 = arith.constant 0 : i32
    %c0_i32_1 = arith.constant 0 : i32
    return %c0_i32, %c0_i32_0 : i32, i32
  }
  func.func @transform_13(%arg0: i32) -> (i32, i32) {
    %c0_i32 = arith.constant 0 : i32
    %c0_i32_0 = arith.constant 0 : i32
    %c0_i32_1 = arith.constant 0 : i32
    return %c0_i32, %c0_i32_0 : i32, i32
  }
  func.func @transform_14(%arg0: i32) -> (i32, i32) {
    %c0_i32 = arith.constant 0 : i32
    %c0_i32_0 = arith.constant 0 : i32
    %c0_i32_1 = arith.constant 0 : i32
    return %c0_i32, %c0_i32_0 : i32, i32
  }
  func.func @transform_15(%arg0: i32) -> (i32, i32) {
    %c0_i32 = arith.constant 0 : i32
    %c0_i32_0 = arith.constant 0 : i32
    %c0_i32_1 = arith.constant 0 : i32
    return %c0_i32, %c0_i32_0 : i32, i32
  }
  func.func @transform_16(%arg0: i32) -> (i32, i32) {
    %c0_i32 = arith.constant 0 : i32
    %c0_i32_0 = arith.constant 0 : i32
    %c0_i32_1 = arith.constant 0 : i32
    return %c0_i32, %c0_i32_0 : i32, i32
  }
  func.func @transform_17(%arg0: i32) -> (i32, i32, i32) {
    %c0_i32 = arith.constant 0 : i32
    %c0_i32_0 = arith.constant 0 : i32
    %c0_i32_1 = arith.constant 0 : i32
    return %arg0, %c0_i32, %c0_i32_0 : i32, i32, i32
  }
  func.func @transform_18(%arg0: i32) -> (i32, i32, i32) {
    %c0_i32 = arith.constant 0 : i32
    %c0_i32_0 = arith.constant 0 : i32
    %c0_i32_1 = arith.constant 0 : i32
    return %arg0, %c0_i32, %c0_i32_0 : i32, i32, i32
  }
  func.func @transform_19(%arg0: i32) -> (i32, i32, i32) {
    %c0_i32 = arith.constant 0 : i32
    %c0_i32_0 = arith.constant 0 : i32
    %c0_i32_1 = arith.constant 0 : i32
    return %arg0, %c0_i32, %c0_i32_0 : i32, i32, i32
  }
}

</mosaic_0001>

<bundles_post_ra>
// kernel: fpn_wrapper_forward.1
= control target key start
LH: loop header
LB: loop body
LE: loop exit
PB: predicated region body
PF: predicated region fallthrough
CT: control target
= control target key end

     0   :  { %s7964_s0 = inlined_call_operand.vmem [shape: bf16[2,256,4], index: 0, kind: input, shape index: {}]   ;;  %s7965_s1 = inlined_call_operand.vmem [shape: bf16[2,64,8], index: 1, kind: input, shape index: {}]   ;;  %s7966_s2 = inlined_call_operand.vmem [shape: bf16[2,16,16], index: 2, kind: input, shape index: {}]   ;;  %s7967_s3 = inlined_call_operand.vmem [shape: bf16[4,8], index: 3, kind: input, shape index: {}]   ;;  %s7968_s4 = inlined_call_operand.vmem [shape: f32[1,8], index: 4, kind: input, shape index: {}]   ;;  %s7969_s5 = inlined_call_operand.vmem [shape: bf16[72,8], index: 5, kind: input, shape index: {}]   ;;  %s7970_s6 = inlined_call_operand.vmem [shape: f32[1,8], index: 6, kind: input, shape index: {}]   ;;  %s7971_s7 = inlined_call_operand.vmem [shape: bf16[8,8], index: 7, kind: input, shape index: {}]   ;;  %s7972_s8 = inlined_call_operand.vmem [shape: f32[1,8], index: 8, kind: input, shape index: {}]   ;;  %s7973_s9 = inlined_call_operand.vmem [shape: bf16[72,8], index: 9, kind: input, shape index: {}]   ;;  %s7974_s10 = inlined_call_operand.vmem [shape: f32[1,8], index: 10, kind: input, shape index: {}]   ;;  %s7975_s11 = inlined_call_operand.vmem [shape: bf16[16,8], index: 11, kind: input, shape index: {}]   ;;  %s7976_s12 = inlined_call_operand.vmem [shape: f32[1,8], index: 12, kind: input, shape index: {}]   ;;  %s7977_s13 = inlined_call_operand.vmem [shape: bf16[72,8], index: 13, kind: input, shape index: {}]   ;;  %s7978_s14 = inlined_call_operand.vmem [shape: f32[1,8], index: 14, kind: input, shape index: {}]   ;;  %s7979_s15 = inlined_call_operand.vmem [shape: bf16[256,64], index: 15, kind: input, shape index: {}]   ;;  %s7980_s16 = inlined_call_operand.vmem [shape: bf16[64,16], index: 16, kind: input, shape index: {}]   ;;  %s7981_s17 = inlined_call_operand.vmem [shape: f32[2,8,256], index: 17, kind: output, shape index: {0}]   ;;  %s7982_s18 = inlined_call_operand.vmem [shape: f32[2,8,64], index: 18, kind: output, shape index: {1}]   ;;  %s7983_s19 = inlined_call_operand.vmem [shape: f32[2,8,16], index: 19, kind: output, shape index: {2}]  }
   0x1   :  { %8003 = sst [smem:[#allocation17_spill]] %s7964_s0  ;;  %s5834_s0 = smov 0  }
   0x2   :  { %8004 = sst [smem:[#allocation18_spill]] %s7965_s1 }
   0x3   :  { %8005 = sst [smem:[#allocation19_spill]] %s7966_s2 }
   0x4   :  { %8006 = sst [smem:[#allocation20_spill]] %s7967_s3 }
   0x5   :  { %8007 = sst [smem:[#allocation21_spill]] %s7971_s7 }
   0x6   :  { %8008 = sst [smem:[#allocation22_spill]] %s7972_s8 }
   0x7 LB: > { %s4390_s30 = sadd.s32 4294967295, %s5722_s0   ;;  %p4394_p0 = scmp.ge.s32.totalorder %s5722_s0, 1  ;;  %s5722_s0 = sphi %s5834_s0, %s30_s0  }
   0x8   : > { %p562_p1 = scmp.lt.s32.totalorder %s5722_s0, 3 }
   0xa   : > { %p563_p2 = pnand %p4394_p0, %p562_p1 }
   0xc   : > { %566 = sbr.rel (%p563_p2) target bundleno = 1610 (0x64a), region = 88 }
  0x11   : > { %v5625_v0 = vld [vmem:[%s7975_s11] sm:$0xff]   ;;  %v5724_v1 = vmov 0.0   ;;  %p636_p3 = scmp.lt.s32.totalorder %s4390_s30, 1  ;;  %vm5725_vm0 = vmmov 0   ;;  %vm687_vm1 = vcmask 130048   ;;  %s8009_s23 = sld [smem:[#allocation19_spill]] }
  0x12   : > { %4621 = vmatprep.subr.bf16.mxu0 %v5724_v1  ;;  %4627 = vmatprep.subr.bf16.mxu1 %v5724_v1  ;;  %s8010_s27 = sld [smem:[#allocation17_spill]]  ;;  %vm732_vm2 = vcmask 62464   ;;  %s7996_s29 = smov 48   ;;  %v5627_v9 = vld [vmem:[%s7980_s16] sm:$0xff]   ;;  %vm871_vm3 = vcmask 64512   ;;  %vm746_vm4 = vcmask 60416  }
  0x13   : > { %4622 = vmatpush3.bf16.msra.mxu0 %v5625_v0  ;;  %4623 = vmatprep.mubr.msk.bf16.mxu0 %vm5725_vm0, %v5724_v1  ;;  %s8052_s30 = smov (!%p636_p3, %s4390_s30), 1  ;;  %733 = vst.msk [vmem:[#allocation4] sm:$0x3f] %vm732_vm2, %v5724_v1  ;;  %734 = vst.msk [vmem:[#allocation4 + $0x8] sm:$0x3f] %vm732_vm2, %v5724_v1  ;;  %s7988_s20 = smov 8  }
  0x14   : > { %4637 = vmatprep.mubr.msk.bf16.mxu1 %vm5725_vm0, %v5724_v1  ;;  %s5852_s1 = sshll.u32 %s8052_s30, 3  ;;  %s4532_s25 = sshll.u32 %s8052_s30, 7  ;;  %735 = vst.msk [vmem:[#allocation4 + $0x10] sm:$0x3f] %vm732_vm2, %v5724_v1  ;;  %738 = vst.msk [vmem:[#allocation4 + $0x28] sm:$0x3f] %vm732_vm2, %v5724_v1 }
  0x15   : > { %736 = vst.msk [vmem:[#allocation4 + $0x18] sm:$0x3f] %vm732_vm2, %v5724_v1  ;;  %737 = vst.msk [vmem:[#allocation4 + $0x20] sm:$0x3f] %vm732_vm2, %v5724_v1  ;;  %s7984_s21 = smov 56   ;;  %s7994_s22 = smov 16  }
  0x16   : > { %s7986_s2 = smov 64   ;;  %1274 = vst.msk [vmem:[#allocation3] sm:$0xff] %vm871_vm3, %v5724_v1  ;;  %1277 = vst.msk [vmem:[#allocation3 + $0x10] sm:$0xff] %vm871_vm3, %v5724_v1  ;;  %v4405_v10 = vld [vmem:[%s7976_s12] ss:$0 sm:$0xff]  ;;  %vm966_vm5 = vcmask 1043456  }
  0x17   : > { %s650_s24 = scalar_lea.vmem %s8009_s23, %s5852_s1  ;;  %1279 = vst.msk [vmem:[#allocation3 + $0x20] sm:$0xff] %vm871_vm3, %v5724_v1  ;;  %1281 = vst.msk [vmem:[#allocation3 + $0x30] sm:$0xff] %vm871_vm3, %v5724_v1  ;;  %s8012_s7 = sld [smem:[#allocation21_spill]]  ;;  %v5628_v21 = vld [vmem:[%s7980_s16 + $0x8] sm:$0xff]   ;;  %v5629_v23 = vld [vmem:[%s7980_s16 + $0x10] sm:$0xff]   ;;  %vm1275_vm6 = vcmask 58368  }
  0x18   : > { %v5626_v2 = vld [vmem:[%s650_s24] sm:$0xff]   ;;  %s5863_s28 = scalar_lea.vmem %s8010_s27, %s4532_s25  ;;  %s4533_s25 = sshll.u32 %s8052_s30, 5  ;;  %1283 = vst.msk [vmem:[#allocation3 + $0x40] sm:$0xff] %vm871_vm3, %v5724_v1  ;;  %1285 = vst.msk [vmem:[#allocation3 + $0x50] sm:$0xff] %vm871_vm3, %v5724_v1  ;;  %v5630_v28 = vld [vmem:[%s7980_s16 + $0x18] sm:$0xff]   ;;  %vm880_vm7 = vcmask 195584  }
  0x19   : > { %4624 = vmatmul.mubr.msk.bf16.vlgmr.msra.gmra.mxu0 %vm687_vm1, %v5626_v2  ;;  %s8011_s27 = sld [smem:[#allocation18_spill]]  ;;  %1287 = vst.msk [vmem:[#allocation3 + $0x60] sm:$0xff] %vm871_vm3, %v5724_v1  ;;  %1289 = vst.msk [vmem:[#allocation3 + $0x70] sm:$0xff] %vm871_vm3, %v5724_v1  ;;  %s7992_s26 = smov 32   ;;  %v5635_v36 = vld [vmem:[%s7977_s13 + $0x20] ss:$0 sps:$4 sm:$0xff]  }
  0x1a   : > { %v5871_v4 = vld [vmem:[#allocation4] sm:$0x3f]  ;;  %4643 = vmatprep.mubr.msk.bf16.mxu0 %vm687_vm1, %v5627_v9  ;;  %1291 = vst.msk [vmem:[#allocation3 + $0x80] sm:$0xff] %vm871_vm3, %v5724_v1  ;;  %1293 = vst.msk [vmem:[#allocation3 + $0x90] sm:$0xff] %vm871_vm3, %v5724_v1  ;;  %v968_v38 = vsel %vm966_vm5, %v5635_v36, 0  ;;  %v5636_v40 = vld [vmem:[%s7977_s13 + $0x18] sm:$0xff]  }
  0x1b   : > { %v756_v3 = vld [vmem:[#allocation4 + $0x28] sm:$0x3f]  ;;  %v761_v5 = vrot.slane %v5871_v4, 1  ;;  %v777_v7 = vrot.slane %v5871_v4, 2  ;;  %2513 = vst.msk [vmem:[#allocation2] sm:$0xff] %vm871_vm3, %v5724_v1  ;;  %2514 = vst.msk [vmem:[#allocation2 + $0x8] sm:$0xff] %vm871_vm3, %v5724_v1  ;;  %4628 = vmatpush3.bf16.msra.mxu1 %v968_v38 }
  0x1c   : > { %839 = vrot.lane.b32.xlu1 %v756_v3, %s7996_s29  ;;  %v845_v6 = vrot.slane %v756_v3, 1  ;;  %v858_v8 = vrot.slane %v756_v3, 2  ;;  %2516 = vst.msk [vmem:[#allocation2 + $0x18] sm:$0xff] %vm871_vm3, %v5724_v1  ;;  %2517 = vst.msk [vmem:[#allocation2 + $0x20] sm:$0xff] %vm871_vm3, %v5724_v1  ;;  %4629 = vmatprep.subr.bf16.mxu1 %v5724_v1  ;;  %s8014_s23 = smov 64   ;;  %v5637_v41 = vld [vmem:[%s7977_s13 + $0x10] sm:$0xff]  }
  0x1d   : > { %765 = vrot.lane.b32.xlu0 %v761_v5, %s7988_s20  ;;  %2519 = vst.msk [vmem:[#allocation2 + $0x30] sm:$0xff] %vm871_vm3, %v5724_v1  ;;  %2520 = vst.msk [vmem:[#allocation2 + $0x38] sm:$0xff] %vm871_vm3, %v5724_v1  ;;  %v1158_v20 = vld [vmem:[%s8012_s7] sm:$0xf]  ;;  %v5638_v43 = vld [vmem:[%s7977_s13 + $0x8] sm:$0xff]   ;;  %vm885_vm8 = vcmask 261120  }
  0x1e   : > { %2522 = vst.msk [vmem:[#allocation2 + $0x48] sm:$0xff] %vm871_vm3, %v5724_v1  ;;  %2523 = vst.msk [vmem:[#allocation2 + $0x50] sm:$0xff] %vm871_vm3, %v5724_v1  ;;  %v1199_v25 = vsel %vm966_vm5, %v1158_v20, 0  ;;  %v5639_v44 = vld [vmem:[%s7977_s13] sm:$0xff]   ;;  %vm890_vm9 = vcmask 326656   ;;  %vm895_vm10 = vcmask 392192  }
  0x1f   : > { %2525 = vst.msk [vmem:[#allocation2 + $0x60] sm:$0xff] %vm871_vm3, %v5724_v1  ;;  %2526 = vst.msk [vmem:[#allocation2 + $0x68] sm:$0xff] %vm871_vm3, %v5724_v1  ;;  %4630 = vmatpush3.bf16.msra.mxu1 %v5636_v40  ;;  %v6077_v47 = vld [vmem:[%s7973_s9 + $0x20] ss:$0 sps:$4 sm:$0xff]   ;;  %vm900_vm11 = vcmask 457728   ;;  %vm905_vm12 = vcmask 523264  }
  0x20   : > { %852 = vrot.lane.b32.xlu1 %v845_v6, %s7984_s21  ;;  %s5888_s21 = scalar_lea.vmem %s8011_s27, %s4533_s25  ;;  %2528 = vst.msk [vmem:[#allocation2 + $0x78] sm:$0xff] %vm871_vm3, %v5724_v1  ;;  %2529 = vst.msk [vmem:[#allocation2 + $0x80] sm:$0xff] %vm871_vm3, %v5724_v1  ;;  %s7990_s27 = smov 40   ;;  %4631 = vmatprep.subr.bf16.mxu1 %v5724_v1  ;;  %vm962_vm13 = vcmask 588800   ;;  %vm1340_vm14 = vcmask 1046528   ;;  %vm1389_vm15 = vcmask 1045504  }
  0x21   : > { %781 = vrot.lane.b32.xlu0 %v777_v7, %s7994_s22  ;;  %2531 = vst.msk [vmem:[#allocation2 + $0x90] sm:$0xff] %vm871_vm3, %v5724_v1  ;;  %2532 = vst.msk [vmem:[#allocation2 + $0x98] sm:$0xff] %vm871_vm3, %v5724_v1  ;;  %v5631_v29 = vld [vmem:[%s5888_s21] sm:$0xff]   ;;  %v5632_v31 = vld [vmem:[%s5888_s21 + $0x8] sm:$0xff]   ;;  %s8013_s25 = smov 56   ;;  %s8015_s8 = sld [smem:[#allocation22_spill]] }
  0x22   : > { %2534 = vst.msk [vmem:[#allocation2 + $0xa8] sm:$0xff] %vm871_vm3, %v5724_v1  ;;  %2535 = vst.msk [vmem:[#allocation2 + $0xb0] sm:$0xff] %vm871_vm3, %v5724_v1  ;;  %v5633_v32 = vld [vmem:[%s5888_s21 + $0x10] sm:$0xff]   ;;  %v5634_v35 = vld [vmem:[%s5888_s21 + $0x18] sm:$0xff]   ;;  %s8019_s24 = smov 32   ;;  %s8020_s21 = smov 40  }
  0x23   : > { %2537 = vst.msk [vmem:[#allocation2 + $0xc0] sm:$0xff] %vm871_vm3, %v5724_v1  ;;  %2538 = vst.msk [vmem:[#allocation2 + $0xc8] sm:$0xff] %vm871_vm3, %v5724_v1  ;;  %4632 = vmatpush3.bf16.msra.mxu1 %v5637_v41  ;;  %vm2316_vm0 = vcmask 1041408   ;;  %vm2267_vm2 = vcmask 31744   ;;  %s8031_s7 = smov 24  }
  0x24   : > { %865 = vrot.lane.b32.xlu1 %v858_v8, %s7986_s2  ;;  %2540 = vst.msk [vmem:[#allocation2 + $0xd8] sm:$0xff] %vm871_vm3, %v5724_v1  ;;  %2541 = vst.msk [vmem:[#allocation2 + $0xe0] sm:$0xff] %vm871_vm3, %v5724_v1  ;;  %s7998_s2 = smov 24   ;;  %4633 = vmatprep.subr.bf16.mxu1 %v5724_v1 }
  0x25   : > { %2543 = vst.msk [vmem:[#allocation2 + $0xf0] sm:$0xff] %vm871_vm3, %v5724_v1  ;;  %2544 = vst.msk [vmem:[#allocation2 + $0xf8] sm:$0xff] %vm871_vm3, %v5724_v1 }
  0x26   : > { %2546 = vst.msk [vmem:[#allocation2 + $0x108] sm:$0xff] %vm871_vm3, %v5724_v1  ;;  %2547 = vst.msk [vmem:[#allocation2 + $0x110] sm:$0xff] %vm871_vm3, %v5724_v1 }
  0x27   : > { %2549 = vst.msk [vmem:[#allocation2 + $0x120] sm:$0xff] %vm871_vm3, %v5724_v1  ;;  %2550 = vst.msk [vmem:[#allocation2 + $0x128] sm:$0xff] %vm871_vm3, %v5724_v1  ;;  %4634 = vmatpush3.bf16.msra.mxu1 %v5638_v43 }
  0x28   : > { %2552 = vst.msk [vmem:[#allocation2 + $0x138] sm:$0xff] %vm871_vm3, %v5724_v1  ;;  %2553 = vst.msk [vmem:[#allocation2 + $0x140] sm:$0xff] %vm871_vm3, %v5724_v1  ;;  %4635 = vmatprep.subr.bf16.mxu1 %v5724_v1 }
  0x29   : > { %2555 = vst.msk [vmem:[#allocation2 + $0x150] sm:$0xff] %vm871_vm3, %v5724_v1  ;;  %2556 = vst.msk [vmem:[#allocation2 + $0x158] sm:$0xff] %vm871_vm3, %v5724_v1 }
  0x2a   : > { %2558 = vst.msk [vmem:[#allocation2 + $0x168] sm:$0xff] %vm871_vm3, %v5724_v1  ;;  %2559 = vst.msk [vmem:[#allocation2 + $0x170] sm:$0xff] %vm871_vm3, %v5724_v1 }
  0x2b   : > { %2561 = vst.msk [vmem:[#allocation2 + $0x180] sm:$0xff] %vm871_vm3, %v5724_v1  ;;  %2562 = vst.msk [vmem:[#allocation2 + $0x188] sm:$0xff] %vm871_vm3, %v5724_v1  ;;  %4636 = vmatpush3.bf16.msra.mxu1 %v5639_v44 }
  0x2c   : > { %2564 = vst.msk [vmem:[#allocation2 + $0x198] sm:$0xff] %vm871_vm3, %v5724_v1  ;;  %2565 = vst.msk [vmem:[#allocation2 + $0x1a0] sm:$0xff] %vm871_vm3, %v5724_v1  ;;  %4804 = vmatprep.subr.msk.bf16.mxu1 %vm966_vm5, %v6077_v47 }
  0x2d   : > { %1282 = vst.msk [vmem:[#allocation3 + $0x38] sm:$0x3] %vm1275_vm6, %v5724_v1  ;;  %1276 = vst.msk [vmem:[#allocation3 + $0x8] sm:$0x3] %vm1275_vm6, %v5724_v1 }
  0x2e   : > { %1278 = vst.msk [vmem:[#allocation3 + $0x18] sm:$0x3] %vm1275_vm6, %v5724_v1  ;;  %1280 = vst.msk [vmem:[#allocation3 + $0x28] sm:$0x3] %vm1275_vm6, %v5724_v1 }
  0x2f   : > { %1284 = vst.msk [vmem:[#allocation3 + $0x48] sm:$0x3] %vm1275_vm6, %v5724_v1  ;;  %1286 = vst.msk [vmem:[#allocation3 + $0x58] sm:$0x3] %vm1275_vm6, %v5724_v1 }
  0x30   : > { %1288 = vst.msk [vmem:[#allocation3 + $0x68] sm:$0x3] %vm1275_vm6, %v5724_v1  ;;  %1290 = vst.msk [vmem:[#allocation3 + $0x78] sm:$0x3] %vm1275_vm6, %v5724_v1 }
  0x31   : > { %1292 = vst.msk [vmem:[#allocation3 + $0x88] sm:$0x3] %vm1275_vm6, %v5724_v1  ;;  %1294 = vst.msk [vmem:[#allocation3 + $0x98] sm:$0x3] %vm1275_vm6, %v5724_v1 }
  0x32   : > { %2515 = vst.msk [vmem:[#allocation2 + $0x10] sm:$0x3] %vm1275_vm6, %v5724_v1  ;;  %2518 = vst.msk [vmem:[#allocation2 + $0x28] sm:$0x3] %vm1275_vm6, %v5724_v1 }
  0x33   : > { %2521 = vst.msk [vmem:[#allocation2 + $0x40] sm:$0x3] %vm1275_vm6, %v5724_v1  ;;  %2524 = vst.msk [vmem:[#allocation2 + $0x58] sm:$0x3] %vm1275_vm6, %v5724_v1 }
  0x34   : > { %2527 = vst.msk [vmem:[#allocation2 + $0x70] sm:$0x3] %vm1275_vm6, %v5724_v1  ;;  %2530 = vst.msk [vmem:[#allocation2 + $0x88] sm:$0x3] %vm1275_vm6, %v5724_v1 }
  0x35   : > { %2533 = vst.msk [vmem:[#allocation2 + $0xa0] sm:$0x3] %vm1275_vm6, %v5724_v1  ;;  %2536 = vst.msk [vmem:[#allocation2 + $0xb8] sm:$0x3] %vm1275_vm6, %v5724_v1 }
  0x36   : > { %2539 = vst.msk [vmem:[#allocation2 + $0xd0] sm:$0x3] %vm1275_vm6, %v5724_v1  ;;  %2542 = vst.msk [vmem:[#allocation2 + $0xe8] sm:$0x3] %vm1275_vm6, %v5724_v1 }
  0x37   : > { %2545 = vst.msk [vmem:[#allocation2 + $0x100] sm:$0x3] %vm1275_vm6, %v5724_v1  ;;  %2548 = vst.msk [vmem:[#allocation2 + $0x118] sm:$0x3] %vm1275_vm6, %v5724_v1 }
  0x38   : > { %2551 = vst.msk [vmem:[#allocation2 + $0x130] sm:$0x3] %vm1275_vm6, %v5724_v1  ;;  %2554 = vst.msk [vmem:[#allocation2 + $0x148] sm:$0x3] %vm1275_vm6, %v5724_v1 }
  0x39   : > { %2557 = vst.msk [vmem:[#allocation2 + $0x160] sm:$0x3] %vm1275_vm6, %v5724_v1  ;;  %2560 = vst.msk [vmem:[#allocation2 + $0x178] sm:$0x3] %vm1275_vm6, %v5724_v1 }
  0x3a   : > { %2563 = vst.msk [vmem:[#allocation2 + $0x190] sm:$0x3] %vm1275_vm6, %v5724_v1  ;;  %2566 = vst.msk [vmem:[#allocation2 + $0x1a8] sm:$0x3] %vm1275_vm6, %v5724_v1 }
  0x8e   : > { %v6137_v48 = vpop.permute.xlu1 %839 }
  0x8f   : > { %v766_v49 = vpop.permute.xlu0 %765 }
  0x92   : > { %v6139_v50 = vpop.permute.xlu1 %852 }
  0x93   : > { %v782_v51 = vpop.permute.xlu0 %781 }
  0x96   : > { %v6141_v52 = vpop.permute.xlu1 %865 }
  0xd9   : > { %v725_v11 = vpop.f32.mrf.mxu0 }
  0xda   : > { %v726_v12 = vadd.f32 %v4405_v10, %v725_v11 }
  0xdb   : > { %v4625_v13 = vpop.f32.mrf.mxu0 }
  0xdc   : > { %v741_v14 = vcombine.high %v726_v12, %v726_v12  ;;  %747 = vst.msk [vmem:[#allocation4 + $0x9] sm:$0xf] %vm746_vm4, %v726_v12 }
  0xdd   : > { %v728_v15 = vpop.f32.mrf.mxu0 }
  0xde   : > { %748 = vst.msk [vmem:[#allocation4 + $0x11] sm:$0xf] %vm746_vm4, %v741_v14  ;;  %v729_v16 = vadd.f32 %v4405_v10, %v728_v15 }
  0xdf   : > { %v4626_v17 = vpop.f32.mrf.mxu0 }
  0xe0   : > { %v742_v18 = vcombine.high %v729_v16, %v729_v16  ;;  %749 = vst.msk [vmem:[#allocation4 + $0x19] sm:$0xf] %vm746_vm4, %v729_v16  ;;  %v1052_v19 = vpack.c.bf16 %v729_v16, %v726_v12  ;;  %v872_v12 = vsel %vm871_vm3, %v5871_v4, %v766_v49 }
  0xe1   : > { %v876_v16 = vsel %vm687_vm1, %v872_v12, %v782_v51 }
  0xe2   : > { %750 = vst.msk [vmem:[#allocation4 + $0x21] sm:$0xf] %vm746_vm4, %v742_v18  ;;  %4641 = vmatprep.subr.bf16.mxu0 %v1052_v19 }
  0xe3   : > { %4642 = vmatpush3.bf16.msra.mxu0 %v1052_v19  ;;  %v5991_v22 = vld [vmem:[#allocation4 + $0x8] sm:$0x3f] }
  0xe4   : > { %794 = vrot.lane.b32.xlu0 %v5991_v22, %s7998_s2  ;;  %v778_v24 = vrot.slane %v5991_v22, 2  ;;  %4803 = vmatprep.subr.msk.bf16.mxu0 %vm966_vm5, %v1158_v20  ;;  %v762_v26 = vrot.slane %v5991_v22, 1 }
  0xe5   : > { %v6006_v27 = vld [vmem:[#allocation4 + $0x10] sm:$0x3f] }
  0xe6   : > { %783 = vrot.lane.b32.xlu1 %v778_v24, %s7994_s22  ;;  %4644 = vmatmul.mubr.msk.bf16.vlgmr.msra.gmra.mxu0 %vm687_vm1, %v5628_v21  ;;  %v763_v30 = vrot.slane %v6006_v27, 1  ;;  %v779_v33 = vrot.slane %v6006_v27, 2 }
  0xe7   : > { %4652 = vmatpush3.bf16.msra.mxu0 %v1199_v25  ;;  %4647 = vmatprep.mubr.msk.bf16.mxu0 %vm687_vm1, %v5629_v23  ;;  %v6030_v34 = vld [vmem:[#allocation4 + $0x18] sm:$0x3f] }
  0xe8   : > { %767 = vrot.lane.b32.xlu0 %v762_v26, %s7988_s20  ;;  %v764_v37 = vrot.slane %v6030_v34, 1  ;;  %v780_v39 = vrot.slane %v6030_v34, 2 }
  0xe9   : > { %v755_v42 = vld [vmem:[#allocation4 + $0x20] sm:$0x3f] }
  0xea   : > { %796 = vrot.lane.b32.xlu1 %v6006_v27, %s7998_s2  ;;  %v806_v45 = vrot.slane %v755_v42, 1  ;;  %v819_v46 = vrot.slane %v755_v42, 2 }
  0xec   : > { %807 = vrot.lane.b32.xlu0 %v762_v26, %s7992_s26 }
  0xee   : > { %769 = vrot.lane.b32.xlu1 %v763_v30, %s7988_s20  ;;  %4648 = vmatmul.mubr.msk.bf16.gmra.mxu0 %vm687_vm1, %v5630_v28 }
  0xef   : > { %4653 = vmatprep.mubr.msk.bf16.mxu0 %vm871_vm3, %v5631_v29 }
  0xf0   : > { %820 = vrot.lane.b32.xlu0 %v778_v24, %s7990_s27 }
  0xf2   : > { %809 = vrot.lane.b32.xlu1 %v763_v30, %s7992_s26 }
  0xf4   : > { %833 = vrot.lane.b32.xlu0 %v6006_v27, %s7996_s29 }
  0xf6   : > { %822 = vrot.lane.b32.xlu1 %v779_v33, %s7990_s27  ;;  %4654 = vmatmul.mubr.msk.bf16.vlgmr.msra.gmra.mxu0 %vm871_vm3, %v5632_v31 }
  0xf7   : > { %4657 = vmatprep.mubr.msk.bf16.mxu0 %vm871_vm3, %v5633_v32 }
  0xf8   : > { %785 = vrot.lane.b32.xlu0 %v779_v33, %s7994_s22 }
  0xfa   : > { %835 = vrot.lane.b32.xlu1 %v6030_v34, %s7996_s29 }
  0xfc   : > { %798 = vrot.lane.b32.xlu0 %v6030_v34, %s7998_s2 }
  0xfe   : > { %771 = vrot.lane.b32.xlu1 %v764_v37, %s7988_s20  ;;  %4658 = vmatmul.mubr.msk.bf16.gmra.mxu0 %vm871_vm3, %v5634_v35  ;;  %s8022_s20 = sld [smem:[#allocation20_spill]] }
 0x100   : > { %846 = vrot.lane.b32.xlu0 %v763_v30, %s8013_s25 }
 0x102   : > { %787 = vrot.lane.b32.xlu1 %v780_v39, %s7994_s22  ;;  %s8017_s22 = smov 48  }
 0x104   : > { %859 = vrot.lane.b32.xlu0 %v779_v33, %s8014_s23 }
 0x106   : > { %800 = vrot.lane.b32.xlu1 %v755_v42, %s7998_s2 }
 0x108   : > { %811 = vrot.lane.b32.xlu0 %v764_v37, %s7992_s26 }
 0x10a   : > { %848 = vrot.lane.b32.xlu1 %v764_v37, %s8013_s25 }
 0x10c   : > { %824 = vrot.lane.b32.xlu0 %v780_v39, %s7990_s27 }
 0x10e   : > { %861 = vrot.lane.b32.xlu1 %v780_v39, %s8014_s23 }
 0x110   : > { %837 = vrot.lane.b32.xlu0 %v755_v42, %s7996_s29  ;;  %s8016_s29 = smov 8  }
 0x112   : > { %813 = vrot.lane.b32.xlu1 %v806_v45, %s7992_s26 }
 0x114   : > { %850 = vrot.lane.b32.xlu0 %v806_v45, %s8013_s25 }
 0x116   : > { %826 = vrot.lane.b32.xlu1 %v819_v46, %s7990_s27  ;;  %s8018_s27 = smov 16  }
 0x118   : > { %863 = vrot.lane.b32.xlu0 %v819_v46, %s8014_s23 }
 0x156   : > { %v795_v53 = vpop.permute.xlu0 %794 }
 0x157   : > { %v881_v25 = vsel %vm880_vm7, %v876_v16, %v795_v53 }
 0x158   : > { %v784_v54 = vpop.permute.xlu1 %783 }
 0x15a   : > { %v768_v55 = vpop.permute.xlu0 %767 }
 0x15b   : > { %v873_v11 = vsel %vm871_vm3, %v5991_v22, %v768_v55  ;;  %v5641_v55 = vld [vmem:[%s7973_s9 + $0x18] sm:$0xff]  }
 0x15c   : > { %v797_v56 = vpop.permute.xlu1 %796  ;;  %v877_v14 = vsel %vm687_vm1, %v873_v11, %v784_v54 }
 0x15d   : > { %v882_v19 = vsel %vm880_vm7, %v877_v14, %v797_v56  ;;  %v1305_v14 = vld [vmem:[#allocation3 + $0x8] sm:$0x3] }
 0x15e   : > { %v808_v57 = vpop.permute.xlu0 %807 }
 0x15f   : > { %v886_v29 = vsel %vm885_vm8, %v881_v25, %v808_v57 }
 0x160   : > { %v770_v58 = vpop.permute.xlu1 %769 }
 0x161   : > { %v874_v17 = vsel %vm871_vm3, %v6006_v27, %v770_v58 }
 0x162   : > { %v821_v59 = vpop.permute.xlu0 %820 }
 0x164   : > { %v810_v60 = vpop.permute.xlu1 %809 }
 0x165   : > { %v887_v21 = vsel %vm885_vm8, %v882_v19, %v810_v60 }
 0x166   : > { %v834_v61 = vpop.permute.xlu0 %833 }
 0x168   : > { %v823_v62 = vpop.permute.xlu1 %822 }
 0x169   : > { %v892_v26 = vsel %vm890_vm9, %v887_v21, %v823_v62 }
 0x16a   : > { %v786_v63 = vpop.permute.xlu0 %785 }
 0x16b   : > { %v878_v20 = vsel %vm687_vm1, %v874_v17, %v786_v63 }
 0x16c   : > { %v836_v0 = vpop.permute.xlu1 %835 }
 0x16d   : > { %v897_v30 = vsel %vm895_vm10, %v892_v26, %v836_v0  ;;  %v4424_v0 = vld [vmem:[%s8015_s8] ss:$0 sm:$0xff] }
 0x16e   : > { %v799_v1 = vpop.permute.xlu0 %798 }
 0x16f   : > { %v883_v22 = vsel %vm880_vm7, %v878_v20, %v799_v1  ;;  %v1342_v20 = vrot.slane %v1305_v14, 1 }
 0x170   : > { %v772_v2 = vpop.permute.xlu1 %771 }
 0x171   : > { %v875_v4 = vsel %vm871_vm3, %v6030_v34, %v772_v2  ;;  %v891_v34 = vsel %vm890_vm9, %v886_v29, %v821_v59 }
 0x172   : > { %v847_v3 = vpop.permute.xlu0 %846  ;;  %v896_v38 = vsel %vm895_vm10, %v891_v34, %v834_v61 }
 0x173   : > { %v901_v43 = vsel %vm900_vm11, %v896_v38, %v847_v3 }
 0x174   : > { %v788_v5 = vpop.permute.xlu1 %787 }
 0x175   : > { %v879_v23 = vsel %vm687_vm1, %v875_v4, %v788_v5 }
 0x176   : > { %v860_v6 = vpop.permute.xlu0 %859 }
 0x177   : > { %v906_v46 = vsel %vm905_vm12, %v901_v43, %v860_v6 }
 0x178   : > { %v801_v7 = vpop.permute.xlu1 %800 }
 0x179   : > { %v884_v27 = vsel %vm880_vm7, %v879_v23, %v801_v7 }
 0x17a   : > { %v812_v8 = vpop.permute.xlu0 %811 }
 0x17b   : > { %v888_v28 = vsel %vm885_vm8, %v883_v22, %v812_v8 }
 0x17c   : > { %v849_v9 = vpop.permute.xlu1 %848 }
 0x17d   : > { %v902_v35 = vsel %vm900_vm11, %v897_v30, %v849_v9  ;;  %v1391_v30 = vrot.slane %v1305_v14, 2 }
 0x17e   : > { %v825_v10 = vpop.permute.xlu0 %824 }
 0x17f   : > { %v893_v31 = vsel %vm890_vm9, %v888_v28, %v825_v10 }
 0x180   : > { %v862_v13 = vpop.permute.xlu1 %861 }
 0x181   : > { %v907_v39 = vsel %vm905_vm12, %v902_v35, %v862_v13  ;;  %v6210_v13 = vld [vmem:[#allocation3] sm:$0xff] }
 0x182   : > { %v838_v15 = vpop.permute.xlu0 %837  ;;  %v914_v51 = vcombine.low %v906_v46, %v907_v39  ;;  %v1341_v19 = vrot.slane %v6210_v13, 1  ;;  %v1390_v29 = vrot.slane %v6210_v13, 2 }
 0x183   : > { %v898_v36 = vsel %vm895_vm10, %v893_v31, %v838_v15 }
 0x184   : > { %v814_v18 = vpop.permute.xlu1 %813  ;;  %v1343_v28 = vsel %vm1340_vm14, %v1341_v19, %v1342_v20 }
 0x185   : > { %v889_v32 = vsel %vm885_vm8, %v884_v27, %v814_v18 }
 0x186   : > { %v851_v24 = vpop.permute.xlu0 %850 }
 0x187   : > { %v903_v40 = vsel %vm900_vm11, %v898_v36, %v851_v24 }
 0x188   : > { %v827_v33 = vpop.permute.xlu1 %826 }
 0x189   : > { %v894_v37 = vsel %vm890_vm9, %v889_v32, %v827_v33 }
 0x18a   : > { %v899_v41 = vsel %vm895_vm10, %v894_v37, %v6137_v48  ;;  %v864_v42 = vpop.permute.xlu0 %863  ;;  %v1722_v48 = vsel %vm966_vm5, %v6077_v47, 0  ;;  %v5644_v47 = vld [vmem:[%s7973_s9] sm:$0xff]  }
 0x18b   : > { %v904_v44 = vsel %vm900_vm11, %v899_v41, %v6139_v50  ;;  %v908_v45 = vsel %vm905_vm12, %v903_v40, %v864_v42  ;;  %v5642_v50 = vld [vmem:[%s7973_s9 + $0x10] sm:$0xff]  }
 0x18c   : > { %v909_v49 = vsel %vm905_vm12, %v904_v44, %v6141_v52  ;;  %v5643_v52 = vld [vmem:[%s7973_s9 + $0x8] sm:$0xff]  }
 0x18d   : > { %v915_v53 = vcombine.low %v908_v45, %v909_v49 }
 0x18f   : > { %v918_v54 = vpack.c.bf16 %v915_v53, %v914_v51  ;;  %v1392_v51 = vsel %vm1389_vm15, %v1390_v29, %v1391_v30 }
 0x191   : > { %4638 = vmatmul.mubr.msk.bf16.vlgmr.msra.gmra.mxu1 %vm962_vm13, %v918_v54 }
 0x192   : > { %4662 = vmatpush3.bf16.msra.mxu1 %v1722_v48 }
 0x193   : > { %4663 = vmatprep.subr.bf16.mxu1 %v5641_v55 }
 0x196   : > { %4664 = vmatpush3.bf16.msra.mxu1 %v5641_v55 }
 0x197   : > { %4665 = vmatprep.subr.bf16.mxu1 %v5642_v50 }
 0x19a   : > { %4666 = vmatpush3.bf16.msra.mxu1 %v5642_v50 }
 0x19b   : > { %4667 = vmatprep.subr.bf16.mxu1 %v5643_v52 }
 0x19e   : > { %4668 = vmatpush3.bf16.msra.mxu1 %v5643_v52 }
 0x19f   : > { %4669 = vmatprep.subr.bf16.mxu1 %v5644_v47 }
 0x1a2   : > { %4670 = vmatpush3.bf16.msra.mxu1 %v5644_v47 }
 0x1a6   : > { %v4645_v56 = vpop.f32.mrf.mxu0 }
 0x1a8   : > { %v1119_v57 = vpop.f32.mrf.mxu0 }
 0x1aa   : > { %v4646_v58 = vpop.f32.mrf.mxu0 }
 0x1ac   : > { %v1122_v59 = vpop.f32.mrf.mxu0 }
 0x1ae   : > { %v4649_v60 = vpop.f32.mrf.mxu0 }
 0x1b0   : > { %v1135_v61 = vpop.f32.mrf.mxu0 }
 0x1b2   : > { %v4650_v62 = vpop.f32.mrf.mxu0 }
 0x1b4   : > { %v1138_v63 = vpop.f32.mrf.mxu0 }
 0x1b6   : > { %v4655_v1 = vpop.f32.mrf.mxu0 }
 0x1b7   : > { %v1244_v2 = vadd.f32 %v4655_v1, %v4424_v0 }
 0x1b8   : > { %v1235_v3 = vpop.f32.mrf.mxu0 }
 0x1b9   : > { %v6200_v5 = vadd.f32 %v4645_v56, %v1244_v2  ;;  %v1236_v6 = vadd.f32 %v4424_v0, %v1235_v3 }
 0x1ba   : > { %v4656_v7 = vpop.f32.mrf.mxu0 }
 0x1bb   : > { %1298 = vst.msk [vmem:[#allocation3 + $0x31] sm:$0xff] %vm871_vm3, %v6200_v5  ;;  %v6204_v8 = vadd.f32 %v1236_v6, %v1119_v57  ;;  %v1247_v9 = vadd.f32 %v4656_v7, %v4424_v0 }
 0x1bc   : > { %v1238_v10 = vpop.f32.mrf.mxu0 }
 0x1bd   : > { %1296 = vst.msk [vmem:[#allocation3 + $0x11] sm:$0xff] %vm871_vm3, %v6204_v8  ;;  %v6208_v11 = vadd.f32 %v4646_v58, %v1247_v9  ;;  %v1239_v12 = vadd.f32 %v4424_v0, %v1238_v10 }
 0x1be   : > { %v4659_v15 = vpop.f32.mrf.mxu0 }
 0x1bf   : > { %1299 = vst.msk [vmem:[#allocation3 + $0x41] sm:$0xff] %vm871_vm3, %v6208_v11  ;;  %v6214_v16 = vadd.f32 %v1239_v12, %v1122_v59  ;;  %v1260_v17 = vadd.f32 %v4659_v15, %v4424_v0  ;;  %v6263_v59 = vpack.c.bf16 %v6208_v11, %v6200_v5 }
 0x1c0   : > { %v1251_v18 = vpop.f32.mrf.mxu0 }
 0x1c1   : > { %1297 = vst.msk [vmem:[#allocation3 + $0x21] sm:$0xff] %vm871_vm3, %v6214_v16  ;;  %v1272_v4 = vadd.f32 %v4649_v60, %v1260_v17  ;;  %v1252_v21 = vadd.f32 %v4424_v0, %v1251_v18  ;;  %v6276_v5 = vpack.c.bf16 %v6214_v16, %v6204_v8 }
 0x1c2   : > { %v4660_v22 = vpop.f32.mrf.mxu0  ;;  %v6226_v35 = vld [vmem:[#allocation3 + $0x30] sm:$0xff]  ;;  %v1311_v43 = vld [vmem:[#allocation3 + $0x38] sm:$0x3] }
 0x1c3   : > { %1302 = vst.msk [vmem:[#allocation3 + $0x71] sm:$0xff] %vm871_vm3, %v1272_v4  ;;  %v1270_v23 = vadd.f32 %v1252_v21, %v1135_v61  ;;  %v1263_v24 = vadd.f32 %v4660_v22, %v4424_v0  ;;  %v1350_v55 = vrot.slane %v6226_v35, 1  ;;  %v1351_v50 = vrot.slane %v1311_v43, 1 }
 0x1c4   : > { %v1254_v25 = vpop.f32.mrf.mxu0  ;;  %v6220_v26 = vld [vmem:[#allocation3 + $0x10] sm:$0xff]  ;;  %v1307_v27 = vld [vmem:[#allocation3 + $0x18] sm:$0x3]  ;;  %v1399_v61 = vrot.slane %v6226_v35, 2 }
 0x1c5   : > { %1300 = vst.msk [vmem:[#allocation3 + $0x51] sm:$0xff] %vm871_vm3, %v1270_v23  ;;  %v1273_v31 = vadd.f32 %v4650_v62, %v1263_v24  ;;  %v1255_v32 = vadd.f32 %v4424_v0, %v1254_v25  ;;  %v1344_v33 = vrot.slane %v6220_v26, 1  ;;  %v1345_v34 = vrot.slane %v1307_v27, 1 }
 0x1c6   : > { %v6228_v36 = vld [vmem:[#allocation3 + $0x40] sm:$0xff]  ;;  %v1393_v37 = vrot.slane %v6220_v26, 2  ;;  %v1394_v38 = vrot.slane %v1307_v27, 2  ;;  %v1313_v47 = vld [vmem:[#allocation3 + $0x48] sm:$0x3]  ;;  %v1352_v62 = vsel %vm1340_vm14, %v1350_v55, %v1351_v50 }
 0x1c7   : > { %1303 = vst.msk [vmem:[#allocation3 + $0x81] sm:$0xff] %vm871_vm3, %v1273_v31  ;;  %v6232_v39 = vpack.c.bf16 %v1273_v31, %v1272_v4  ;;  %v1271_v40 = vadd.f32 %v1255_v32, %v1138_v63  ;;  %v4825_v41 = vpack.i.bf16 %v6228_v36, %v6226_v35  ;;  %v6237_v42 = vsel %vm1340_vm14, %v1344_v33, %v1345_v34 }
 0x1c8   : > { %v4830_v44 = vpack.i.bf16 %v6237_v42, %v1343_v28  ;;  %v6240_v45 = vld [vmem:[#allocation3 + $0x20] sm:$0xff]  ;;  %v1309_v46 = vld [vmem:[#allocation3 + $0x28] sm:$0x3]  ;;  %v6252_v54 = vsel %vm1389_vm15, %v1393_v37, %v1394_v38  ;;  %v1400_v63 = vrot.slane %v1311_v43, 2  ;;  %v1353_v0 = vrot.slane %v6228_v36, 1 }
 0x1c9   : > { %1301 = vst.msk [vmem:[#allocation3 + $0x61] sm:$0xff] %vm871_vm3, %v1271_v40  ;;  %v6243_v49 = vpack.c.bf16 %v1271_v40, %v1270_v23  ;;  %4826 = vrot.lane.b32.xlu0 %v4825_v41, %s7998_s2  ;;  %4679 = vmatprep.subr.bf16.mxu0 %v6232_v39  ;;  %v1347_v53 = vrot.slane %v6240_v45, 1  ;;  %v1348_v48 = vrot.slane %v1309_v46, 1  ;;  %v4845_v52 = vpack.i.bf16 %v6226_v35, %v6240_v45 }
 0x1ca   : > { %4795 = vmatprep.subr.bf16.mxu1 %v6232_v39  ;;  %4680 = vmatpush3.bf16.msra.mxu0 %v6232_v39  ;;  %v1396_v57 = vrot.slane %v6240_v45, 2  ;;  %v1397_v58 = vrot.slane %v1309_v46, 2  ;;  %v4835_v60 = vpack.i.bf16 %v6252_v54, %v1392_v51  ;;  %v1354_v1 = vrot.slane %v1313_v47, 1  ;;  %v6289_v15 = vld [vmem:[#allocation3 + $0x70] sm:$0xff]  ;;  %v1319_v16 = vld [vmem:[#allocation3 + $0x78] sm:$0x3] }
 0x1cb   : > { %4831 = vrot.lane.b32.xlu1 %v4830_v44, %s8016_s29  ;;  %4681 = vmatprep.subr.bf16.mxu0 %v6243_v49  ;;  %v1349_v56 = vsel %vm1340_vm14, %v1347_v53, %v1348_v48  ;;  %v4840_v6 = vpack.i.bf16 %v6240_v45, %v6220_v26  ;;  %v1401_v10 = vsel %vm1389_vm15, %v1399_v61, %v1400_v63  ;;  %v1402_v12 = vrot.slane %v6228_v36, 2  ;;  %v1322_v51 = vld [vmem:[#allocation3 + $0x90] sm:$0xff] }
 0x1cc   : > { %v4880_v2 = vpack.i.bf16 %v1352_v62, %v1349_v56  ;;  %v1398_v3 = vsel %vm1389_vm15, %v1396_v57, %v1397_v58  ;;  %v1355_v11 = vsel %vm1340_vm14, %v1353_v0, %v1354_v1  ;;  %v1403_v14 = vrot.slane %v1313_v47, 2  ;;  %v6317_v40 = vld [vmem:[#allocation3 + $0x50] sm:$0xff]  ;;  %v1315_v44 = vld [vmem:[#allocation3 + $0x58] sm:$0x3] }
 0x1cd   : > { %4846 = vrot.lane.b32.xlu0 %v4845_v52, %s8017_s22  ;;  %v4885_v8 = vpack.i.bf16 %v1401_v10, %v1398_v3  ;;  %v4850_v19 = vpack.i.bf16 %v1355_v11, %v1352_v62  ;;  %v1362_v4 = vrot.slane %v6289_v15, 1  ;;  %v1363_v21 = vrot.slane %v1319_v16, 1  ;;  %v1323_v1 = vld [vmem:[#allocation3 + $0x98] sm:$0x3] }
 0x1ce   : > { %4682 = vmatpush3.bf16.msra.mxu0 %v6243_v49  ;;  %v1404_v20 = vsel %vm1389_vm15, %v1402_v12, %v1403_v14  ;;  %v1411_v29 = vrot.slane %v6289_v15, 2  ;;  %v1412_v30 = vrot.slane %v1319_v16, 2  ;;  %v4870_v37 = vpack.i.bf16 %v1349_v56, %v6237_v42  ;;  %v1320_v43 = vld [vmem:[#allocation3 + $0x80] sm:$0xff]  ;;  %v1321_v57 = vld [vmem:[#allocation3 + $0x88] sm:$0x3] }
 0x1cf   : > { %4836 = vrot.lane.b32.xlu1 %v4835_v60, %s8018_s27  ;;  %4683 = vmatprep.subr.bf16.mxu0 %v6263_v59  ;;  %v4855_v27 = vpack.i.bf16 %v1404_v20, %v1401_v10  ;;  %v1364_v28 = vsel %vm1340_vm14, %v1362_v4, %v1363_v21  ;;  %v4875_v38 = vpack.i.bf16 %v1398_v3, %v6252_v54  ;;  %v1356_v42 = vrot.slane %v6317_v40, 1 }
 0x1d0   : > { %v6281_v7 = vld [vmem:[#allocation3 + $0x60] sm:$0xff]  ;;  %v1317_v9 = vld [vmem:[#allocation3 + $0x68] sm:$0x3]  ;;  %v1413_v33 = vsel %vm1389_vm15, %v1411_v29, %v1412_v30  ;;  %v4890_v41 = vpack.i.bf16 %v6317_v40, %v6228_v36  ;;  %v4895_v46 = vpack.i.bf16 %v1320_v43, %v6289_v15  ;;  %v1357_v53 = vrot.slane %v1315_v44, 1 }
 0x1d1   : > { %4881 = vrot.lane.b32.xlu0 %v4880_v2, %s8013_s25  ;;  %v1359_v17 = vrot.slane %v6281_v7, 1  ;;  %v1360_v18 = vrot.slane %v1317_v9, 1  ;;  %v4930_v22 = vpack.i.bf16 %v6289_v15, %v6281_v7  ;;  %v1408_v24 = vrot.slane %v6281_v7, 2 }
 0x1d2   : > { %4684 = vmatpush3.bf16.msra.mxu0 %v6263_v59  ;;  %v1409_v25 = vrot.slane %v1317_v9, 2  ;;  %v4900_v54 = vpack.i.bf16 %v1322_v51, %v1320_v43  ;;  %v1358_v48 = vsel %vm1340_vm14, %v1356_v42, %v1357_v53  ;;  %v1405_v55 = vrot.slane %v6317_v40, 2 }
 0x1d3   : > { %4841 = vrot.lane.b32.xlu1 %v4840_v6, %s7998_s2  ;;  %4685 = vmatprep.subr.bf16.mxu0 %v6276_v5  ;;  %v6300_v23 = vsel %vm1340_vm14, %v1359_v17, %v1360_v18  ;;  %v1406_v50 = vrot.slane %v1315_v44, 2  ;;  %v4905_v52 = vpack.i.bf16 %v1358_v48, %v1355_v11  ;;  %v1464_v58 = vrot.slane %v1320_v43, 1 }
 0x1d4   : > { %v4970_v31 = vpack.i.bf16 %v1364_v28, %v6300_v23  ;;  %v1410_v32 = vsel %vm1389_vm15, %v1408_v24, %v1409_v25  ;;  %v1465_v60 = vrot.slane %v1321_v57, 1  ;;  %v4925_v61 = vpack.i.bf16 %v6281_v7, %v6317_v40 }
 0x1d5   : > { %4886 = vrot.lane.b32.xlu0 %v4885_v8, %s8014_s23  ;;  %v4975_v34 = vpack.i.bf16 %v1413_v33, %v1410_v32  ;;  %v1407_v47 = vsel %vm1389_vm15, %v1405_v55, %v1406_v50  ;;  %v1491_v63 = vrot.slane %v1320_v43, 2  ;;  %v1492_v0 = vrot.slane %v1321_v57, 2  ;;  %v5662_v55 = vld [vmem:[%s7979_s15 + $0x18] sm:$0xff]  }
 0x1d6   : > { %4686 = vmatpush3.bf16.msra.mxu0 %v6276_v5  ;;  %v4910_v56 = vpack.i.bf16 %v1407_v47, %v1404_v20  ;;  %v1466_v62 = vsel %vm1340_vm14, %v1464_v58, %v1465_v60  ;;  %v1544_v3 = vrot.slane %v1322_v51, 1  ;;  %v1545_v9 = vrot.slane %v1323_v1, 1  ;;  %v5652_v20 = vld [vmem:[%s7979_s15] sm:$0xff]  }
 0x1d7   : > { %4851 = vrot.lane.b32.xlu1 %v4850_v19, %s8019_s24  ;;  %v1493_v6 = vsel %vm1389_vm15, %v1491_v63, %v1492_v0  ;;  %v4960_v14 = vpack.i.bf16 %v6300_v23, %v1358_v48  ;;  %v1572_v16 = vrot.slane %v1323_v1, 2  ;;  %v4965_v17 = vpack.i.bf16 %v1410_v32, %v1407_v47  ;;  %4687 = vmatprep.mubr.msk.bf16.mxu0 %vm905_vm12, %v5652_v20  ;;  %v5661_v48 = vld [vmem:[%s7979_s15 + $0x10] sm:$0xff]  }
 0x1d8   : > { %v4940_v10 = vpack.i.bf16 %v1493_v6, %v1413_v33  ;;  %v1546_v11 = vsel %vm1340_vm14, %v1544_v3, %v1545_v9 }
 0x1d9   : > { %4931 = vrot.lane.b32.xlu0 %v4930_v22, %s8017_s22  ;;  %v4945_v12 = vpack.i.bf16 %v1546_v11, %v1466_v62  ;;  %v5654_v22 = vld [vmem:[%s7979_s15 + $0x8] sm:$0xff]  }
 0x1da   : > { %4688 = vmatmul.mubr.msk.bf16.vlgmr.msra.gmra.mxu0 %vm905_vm12, %v5654_v22 }
 0x1db   : > { %4856 = vrot.lane.b32.xlu1 %v4855_v27, %s8020_s21  ;;  %4691 = vmatprep.mubr.msk.bf16.mxu0 %vm905_vm12, %v5661_v48 }
 0x1dd   : > { %4971 = vrot.lane.b32.xlu0 %v4970_v31, %s8013_s25 }
 0x1df   : > { %4861 = vrot.lane.b32.xlu1 %v4880_v2, %s8016_s29  ;;  %v4935_v2 = vpack.i.bf16 %v1466_v62, %v1364_v28 }
 0x1e1   : > { %4976 = vrot.lane.b32.xlu0 %v4975_v34, %s8014_s23 }
 0x1e2   : > { %4692 = vmatmul.mubr.msk.bf16.gmra.mxu0 %vm905_vm12, %v5662_v55 }
 0x1e3   : > { %4866 = vrot.lane.b32.xlu1 %v4885_v8, %s8018_s27  ;;  %v1571_v8 = vrot.slane %v1322_v51, 2 }
 0x1e5   : > { %v1573_v18 = vsel %vm1389_vm15, %v1571_v8, %v1572_v16 }
 0x1e6   : > { %v4980_v19 = vpack.i.bf16 %v1573_v18, %v1493_v6 }
 0x1e7   : > { %4871 = vrot.lane.b32.xlu1 %v4870_v37, %s8019_s24 }
 0x1eb   : > { %4876 = vrot.lane.b32.xlu1 %v4875_v38, %s8020_s21 }
 0x1ef   : > { %4891 = vrot.lane.b32.xlu1 %v4890_v41, %s8017_s22 }
 0x1f3   : > { %4896 = vrot.lane.b32.xlu1 %v4895_v46, %s7998_s2 }
 0x1f7   : > { %4901 = vrot.lane.b32.xlu1 %v4900_v54, %s8017_s22 }
 0x1fb   : > { %4906 = vrot.lane.b32.xlu1 %v4905_v52, %s8016_s29 }
 0x1ff   : > { %4911 = vrot.lane.b32.xlu1 %v4910_v56, %s8018_s27 }
 0x203   : > { %4916 = vrot.lane.b32.xlu1 %v4905_v52, %s8013_s25 }
 0x207   : > { %4921 = vrot.lane.b32.xlu1 %v4910_v56, %s8014_s23 }
 0x20b   : > { %4926 = vrot.lane.b32.xlu1 %v4925_v61, %s7998_s2 }
 0x20f   : > { %4936 = vrot.lane.b32.xlu1 %v4935_v2, %s8019_s24 }
 0x213   : > { %4941 = vrot.lane.b32.xlu1 %v4940_v10, %s8020_s21 }
 0x217   : > { %4946 = vrot.lane.b32.xlu1 %v4945_v12, %s8013_s25 }
 0x21b   : > { %4951 = vrot.lane.b32.xlu1 %v4970_v31, %s8016_s29 }
 0x21f   : > { %4956 = vrot.lane.b32.xlu1 %v4975_v34, %s8018_s27 }
 0x223   : > { %4961 = vrot.lane.b32.xlu1 %v4960_v14, %s8019_s24 }
 0x227   : > { %4966 = vrot.lane.b32.xlu1 %v4965_v17, %s8020_s21 }
 0x22b   : > { %4981 = vrot.lane.b32.xlu1 %v4980_v19, %s8014_s23 }
 0x23b   : > { %v6360_v25 = vpop.permute.xlu0 %4826 }
 0x23d   : > { %v4832_v4 = vpop.permute.xlu1 %4831 }
 0x23e   : > { %v4834_v37 = vunpack.i.h.bf16 %v4832_v4  ;;  %v4833_v38 = vunpack.i.l.bf16 %v4832_v4 }
 0x23f   : > { %v4847_v30 = vpop.permute.xlu0 %4846 }
 0x240   : > { %v1599_v50 = vsel %vm871_vm3, %v6220_v26, %v4834_v37  ;;  %v1598_v52 = vsel %vm871_vm3, %v6210_v13, %v4833_v38  ;;  %v4849_v26 = vunpack.i.h.bf16 %v4847_v30  ;;  %v4848_v0 = vunpack.i.l.bf16 %v4847_v30 }
 0x241   : > { %v4837_v21 = vpop.permute.xlu1 %4836 }
 0x242   : > { %v4839_v43 = vunpack.i.h.bf16 %v4837_v21  ;;  %v4838_v44 = vunpack.i.l.bf16 %v4837_v21 }
 0x243   : > { %v4882_v41 = vpop.permute.xlu0 %4881 }
 0x244   : > { %v1606_v47 = vsel %vm687_vm1, %v1598_v52, %v4838_v44  ;;  %v1607_v56 = vsel %vm687_vm1, %v1599_v50, %v4839_v43  ;;  %v4884_v2 = vunpack.i.h.bf16 %v4882_v41  ;;  %v4883_v3 = vunpack.i.l.bf16 %v4882_v41 }
 0x245   : > { %v4842_v23 = vpop.permute.xlu1 %4841  ;;  %v4829_v44 = vunpack.i.h.bf16 %v6360_v25 }
 0x246   : > { %v4844_v51 = vunpack.i.h.bf16 %v4842_v23  ;;  %v4843_v42 = vunpack.i.l.bf16 %v4842_v23 }
 0x247   : > { %v4887_v61 = vpop.permute.xlu0 %4886 }
 0x248   : > { %v1614_v58 = vsel %vm880_vm7, %v1606_v47, %v4843_v42  ;;  %v1615_v60 = vsel %vm880_vm7, %v1607_v56, %v4844_v51  ;;  %v4889_v10 = vunpack.i.h.bf16 %v4887_v61  ;;  %v4888_v11 = vunpack.i.l.bf16 %v4887_v61 }
 0x249   : > { %v6358_v24 = vpop.permute.xlu1 %4851 }
 0x24a   : > { %v4854_v42 = vunpack.i.h.bf16 %v6358_v24 }
 0x24d   : > { %v6362_v27 = vpop.permute.xlu1 %4856 }
 0x24e   : > { %v4859_v52 = vunpack.i.h.bf16 %v6362_v27  ;;  %v4858_v47 = vunpack.i.l.bf16 %v6362_v27  ;;  %v5673_v27 = vld [vmem:[%s7979_s15 + $0x30] sm:$0xff]  }
 0x251   : > { %v4862_v28 = vpop.permute.xlu1 %4861  ;;  %v6364_v29 = vpop.f32.mrf.mxu1 }
 0x252   : > { %v4864_v22 = vunpack.i.h.bf16 %v4862_v28  ;;  %v4863_v23 = vunpack.i.l.bf16 %v4862_v28 }
 0x253   : > { %v4639_v31 = vpop.f32.mrf.mxu1 }
 0x254   : > { %v1601_v37 = vsel %vm871_vm3, %v6226_v35, %v4864_v22  ;;  %v1600_v38 = vsel %vm871_vm3, %v6240_v45, %v4863_v23  ;;  %v5669_v35 = vld [vmem:[%s7979_s15 + $0x20] sm:$0xff]   ;;  %v5670_v45 = vld [vmem:[%s7979_s15 + $0x28] sm:$0xff]  }
 0x255   : > { %v4867_v32 = vpop.permute.xlu1 %4866  ;;  %v6366_v33 = vpop.f32.mrf.mxu1  ;;  %4695 = vmatprep.mubr.msk.bf16.mxu0 %vm905_vm12, %v5669_v35 }
 0x256   : > { %8021 = vst [vmem:[#allocation5_spill] sm:$0xff] %v6366_v33  ;;  %v4869_v30 = vunpack.i.h.bf16 %v4867_v32  ;;  %v4868_v31 = vunpack.i.l.bf16 %v4867_v32  ;;  %4696 = vmatmul.mubr.msk.bf16.gmra.mxu0 %vm905_vm12, %v5670_v45 }
 0x257   : > { %v4640_v34 = vpop.f32.mrf.mxu1  ;;  %4699 = vmatprep.mubr.msk.bf16.mxu0 %vm905_vm12, %v5673_v27 }
 0x258   : > { %v1608_v41 = vsel %vm687_vm1, %v1600_v38, %v4868_v31  ;;  %v1609_v43 = vsel %vm687_vm1, %v1601_v37, %v4869_v30 }
 0x259   : > { %v4872_v46 = vpop.permute.xlu1 %4871  ;;  %v1617_v32 = vsel %vm880_vm7, %v1609_v43, %v4829_v44 }
 0x25a   : > { %v4874_v53 = vunpack.i.h.bf16 %v4872_v46  ;;  %v4873_v54 = vunpack.i.l.bf16 %v4872_v46  ;;  %v4828_v46 = vunpack.i.l.bf16 %v6360_v25  ;;  %v1625_v50 = vsel %vm885_vm8, %v1617_v32, %v4854_v42 }
 0x25c   : > { %v1622_v13 = vsel %vm885_vm8, %v1614_v58, %v4873_v54  ;;  %v1623_v1 = vsel %vm885_vm8, %v1615_v60, %v4874_v53  ;;  %v1616_v28 = vsel %vm880_vm7, %v1608_v41, %v4828_v46  ;;  %v4853_v53 = vunpack.i.l.bf16 %v6358_v24 }
 0x25d   : > { %v4877_v57 = vpop.permute.xlu1 %4876  ;;  %v1633_v24 = vsel %vm890_vm9, %v1625_v50, %v4859_v52 }
 0x25e   : > { %v4879_v62 = vunpack.i.h.bf16 %v4877_v57  ;;  %v4878_v63 = vunpack.i.l.bf16 %v4877_v57  ;;  %v1624_v55 = vsel %vm885_vm8, %v1616_v28, %v4853_v53 }
 0x25f   : > { %v1632_v58 = vsel %vm890_vm9, %v1624_v55, %v4858_v47 }
 0x260   : > { %v1630_v6 = vsel %vm890_vm9, %v1622_v13, %v4878_v63  ;;  %v1631_v9 = vsel %vm890_vm9, %v1623_v1, %v4879_v62  ;;  %v5674_v1 = vld [vmem:[%s7979_s15 + $0x38] sm:$0xff]  }
 0x261   : > { %v1638_v12 = vsel %vm895_vm10, %v1630_v6, %v4848_v0  ;;  %v1639_v14 = vsel %vm895_vm10, %v1631_v9, %v4849_v26  ;;  %v4892_v8 = vpop.permute.xlu1 %4891  ;;  %4700 = vmatmul.mubr.msk.bf16.gmra.mxu0 %vm905_vm12, %v5674_v1 }
 0x262   : > { %v1646_v16 = vsel %vm900_vm11, %v1638_v12, %v4883_v3  ;;  %v1647_v17 = vsel %vm900_vm11, %v1639_v14, %v4884_v2  ;;  %v4894_v25 = vunpack.i.h.bf16 %v4892_v8  ;;  %v4893_v48 = vunpack.i.l.bf16 %v4892_v8  ;;  %v5675_v2 = vld [vmem:[%s7979_s15 + $0x40] sm:$0xff]   ;;  %v5676_v12 = vld [vmem:[%s7979_s15 + $0x48] sm:$0xff]   ;;  %v6458_v8 = vpop.permute.xlu0 %4931 }
 0x263   : > { %v1654_v18 = vsel %vm905_vm12, %v1646_v16, %v4888_v11  ;;  %v1655_v19 = vsel %vm905_vm12, %v1647_v17, %v4889_v10  ;;  %4703 = vmatprep.mubr.msk.bf16.mxu0 %vm905_vm12, %v5675_v2  ;;  %v6467_v16 = vld [vmem:[%s8022_s20] sm:$0x3] }
 0x264   : > { %v1662_v20 = vpack.c.bf16 %v1655_v19, %v1654_v18  ;;  %v1640_v61 = vsel %vm895_vm10, %v1632_v58, %v4893_v48  ;;  %v1641_v62 = vsel %vm895_vm10, %v1633_v24, %v4894_v25  ;;  %v4934_v19 = vunpack.i.h.bf16 %v6458_v8 }
 0x265   : > { %v6394_v4 = vpop.permute.xlu1 %4896 }
 0x266   : > { %4671 = vmatprep.mubr.msk.bf16.mxu1 %vm962_vm13, %v1662_v20  ;;  %v6472_v17 = vpop.permute.xlu0 %4971  ;;  %v4933_v20 = vunpack.i.l.bf16 %v6458_v8  ;;  %v4899_v31 = vunpack.i.h.bf16 %v6394_v4 }
 0x267   : > { %v4974_v22 = vunpack.i.h.bf16 %v6472_v17  ;;  %v4973_v23 = vunpack.i.l.bf16 %v6472_v17 }
 0x269   : > { %v6397_v21 = vpop.permute.xlu1 %4901  ;;  %4704 = vmatmul.mubr.msk.bf16.gmra.mxu0 %vm905_vm12, %v5676_v12 }
 0x26d   : > { %v6399_v34 = vpop.permute.xlu1 %4906 }
 0x26e   : > { %v4909_v41 = vunpack.i.h.bf16 %v6399_v34  ;;  %v4908_v43 = vunpack.i.l.bf16 %v6399_v34 }
 0x270   : > { %v1603_v58 = vsel %vm871_vm3, %v6317_v40, %v4909_v41  ;;  %v1602_v24 = vsel %vm871_vm3, %v6228_v36, %v4908_v43  ;;  %v5645_v41 = vld [vmem:[%s7979_s15 + $0x50] sm:$0xff]   ;;  %v5647_v43 = vld [vmem:[%s7979_s15 + $0x60] sm:$0xff]  }
 0x271   : > { %v6409_v51 = vpop.permute.xlu1 %4911 }
 0x272   : > { %v4913_v42 = vunpack.i.l.bf16 %v6409_v51 }
 0x275   : > { %v4917_v54 = vpop.permute.xlu1 %4916 }
 0x276   : > { %v4919_v56 = vunpack.i.h.bf16 %v4917_v54  ;;  %v4918_v57 = vunpack.i.l.bf16 %v4917_v54 }
 0x278   : > { %v1648_v0 = vsel %vm900_vm11, %v1640_v61, %v4918_v57  ;;  %v1649_v13 = vsel %vm900_vm11, %v1641_v62, %v4919_v56  ;;  %v4977_v56 = vpop.permute.xlu0 %4976  ;;  %v4903_v57 = vunpack.i.l.bf16 %v6397_v21 }
 0x279   : > { %v4922_v60 = vpop.permute.xlu1 %4921  ;;  %v4979_v1 = vunpack.i.h.bf16 %v4977_v56  ;;  %v4978_v40 = vunpack.i.l.bf16 %v4977_v56  ;;  %v2600_v56 = vld [vmem:[#allocation2] sm:$0xff] }
 0x27a   : > { %v4924_v63 = vunpack.i.h.bf16 %v4922_v60  ;;  %v4923_v26 = vunpack.i.l.bf16 %v4922_v60  ;;  %v1610_v60 = vsel %vm687_vm1, %v1602_v24, %v4913_v42  ;;  %v5657_v42 = vld [vmem:[%s5863_s28 + $0x20] sm:$0xff]  }
 0x27c   : > { %v1656_v3 = vsel %vm905_vm12, %v1648_v0, %v4923_v26  ;;  %v1657_v6 = vsel %vm905_vm12, %v1649_v13, %v4924_v63 }
 0x27d   : > { %v1663_v9 = vpack.c.bf16 %v1657_v6, %v1656_v3  ;;  %v6444_v10 = vpop.permute.xlu1 %4926 }
 0x27e   : > { %v4928_v25 = vunpack.i.l.bf16 %v6444_v10 }
 0x27f   : > { %4672 = vmatmul.mubr.msk.bf16.vlgmr.msra.gmra.mxu1 %vm962_vm13, %v1663_v9 }
 0x280   : > { %4799 = vmatpush3.bf16.msra.mxu1 %v6232_v39  ;;  %v1618_v0 = vsel %vm880_vm7, %v1610_v60, %v4928_v25  ;;  %v5664_v25 = vld [vmem:[%s5863_s28 + $0x48] sm:$0xff]  }
 0x281   : > { %4796 = vmatprep.subr.bf16.mxu1 %v6243_v49  ;;  %v4937_v11 = vpop.permute.xlu1 %4936 }
 0x282   : > { %v4939_v28 = vunpack.i.h.bf16 %v4937_v11  ;;  %v4938_v32 = vunpack.i.l.bf16 %v4937_v11 }
 0x284   : > { %4800 = vmatpush3.bf16.msra.mxu1 %v6243_v49 }
 0x285   : > { %4797 = vmatprep.subr.bf16.mxu1 %v6263_v59  ;;  %v4942_v14 = vpop.permute.xlu1 %4941 }
 0x286   : > { %v4944_v55 = vunpack.i.h.bf16 %v4942_v14  ;;  %v4943_v50 = vunpack.i.l.bf16 %v4942_v14 }
 0x288   : > { %4801 = vmatpush3.bf16.msra.mxu1 %v6263_v59 }
 0x289   : > { %4798 = vmatprep.subr.bf16.mxu1 %v6276_v5  ;;  %v6462_v39 = vpop.permute.xlu1 %4946 }
 0x28a   : > { %v4949_v11 = vunpack.i.h.bf16 %v6462_v39  ;;  %v4948_v12 = vunpack.i.l.bf16 %v6462_v39 }
 0x28c   : > { %4802 = vmatpush3.bf16.msra.mxu1 %v6276_v5  ;;  %v4898_v5 = vunpack.i.l.bf16 %v6394_v4  ;;  %v4914_v4 = vunpack.i.h.bf16 %v6409_v51  ;;  %v4904_v51 = vunpack.i.h.bf16 %v6397_v21 }
 0x28d   : > { %v4952_v49 = vpop.permute.xlu1 %4951  ;;  %4805 = vmatprep.subr.msk.bf16.mxu1 %vm2316_vm0, %v6467_v16 }
 0x28e   : > { %v4954_v18 = vunpack.i.h.bf16 %v4952_v49  ;;  %v4953_v59 = vunpack.i.l.bf16 %v4952_v49  ;;  %v1611_v61 = vsel %vm687_vm1, %v1603_v58, %v4914_v4  ;;  %v5656_v4 = vld [vmem:[%s5863_s28 + $0x18] sm:$0xff]   ;;  %v2702_v58 = vrot.slane %v2600_v56, 1 }
 0x290   : > { %v1605_v44 = vsel %vm871_vm3, %v6289_v15, %v4954_v18  ;;  %v1604_v46 = vsel %vm871_vm3, %v6281_v7, %v4953_v59  ;;  %v4929_v15 = vunpack.i.h.bf16 %v6444_v10 }
 0x291   : > { %v4957_v30 = vpop.permute.xlu1 %4956 }
 0x292   : > { %v4959_v37 = vunpack.i.h.bf16 %v4957_v30  ;;  %v4958_v38 = vunpack.i.l.bf16 %v4957_v30  ;;  %v1619_v13 = vsel %vm880_vm7, %v1611_v61, %v4929_v15  ;;  %v5663_v15 = vld [vmem:[%s5863_s28 + $0x40] sm:$0xff]  }
 0x294   : > { %v1612_v35 = vsel %vm687_vm1, %v1604_v46, %v4958_v38  ;;  %v1613_v45 = vsel %vm687_vm1, %v1605_v44, %v4959_v37  ;;  %v2318_v44 = vsel %vm2316_vm0, %v6467_v16, 0  ;;  %v5648_v46 = vld [vmem:[%s7979_s15 + $0x68] sm:$0xff]   ;;  %v5650_v16 = vld [vmem:[%s7979_s15 + $0x78] sm:$0xff]  }
 0x295   : > { %v1620_v53 = vsel %vm880_vm7, %v1612_v35, %v4898_v5  ;;  %v1621_v34 = vsel %vm880_vm7, %v1613_v45, %v4899_v31  ;;  %v4962_v54 = vpop.permute.xlu1 %4961  ;;  %v5653_v35 = vld [vmem:[%s5863_s28 + $0x8] sm:$0xff]   ;;  %v5655_v45 = vld [vmem:[%s5863_s28 + $0x10] sm:$0xff]  }
 0x296   : > { %v1628_v7 = vsel %vm885_vm8, %v1620_v53, %v4938_v32  ;;  %v1629_v48 = vsel %vm885_vm8, %v1621_v34, %v4939_v28  ;;  %v4964_v52 = vunpack.i.h.bf16 %v4962_v54  ;;  %v4963_v47 = vunpack.i.l.bf16 %v4962_v54  ;;  %v5649_v28 = vld [vmem:[%s7979_s15 + $0x70] sm:$0xff]   ;;  %v5651_v32 = vld [vmem:[%s5863_s28] sm:$0xff]   ;;  %v5658_v53 = vld [vmem:[%s5863_s28 + $0x28] sm:$0xff]  }
 0x297   : > { %v1636_v63 = vsel %vm890_vm9, %v1628_v7, %v4943_v50  ;;  %v1637_v26 = vsel %vm890_vm9, %v1629_v48, %v4944_v55  ;;  %v5659_v34 = vld [vmem:[%s5863_s28 + $0x30] sm:$0xff]   ;;  %v5660_v54 = vld [vmem:[%s5863_s28 + $0x38] sm:$0xff]   ;;  %v5667_v55 = vld [vmem:[%s5863_s28 + $0x60] sm:$0xff]  }
 0x298   : > { %v1626_v2 = vsel %vm885_vm8, %v1618_v0, %v4963_v47  ;;  %v1627_v36 = vsel %vm885_vm8, %v1619_v13, %v4964_v52  ;;  %v1644_v9 = vsel %vm895_vm10, %v1636_v63, %v4903_v57  ;;  %v1645_v10 = vsel %vm895_vm10, %v1637_v26, %v4904_v51  ;;  %v5665_v7 = vld [vmem:[%s5863_s28 + $0x50] sm:$0xff]   ;;  %v5666_v48 = vld [vmem:[%s5863_s28 + $0x58] sm:$0xff]   ;;  %v5668_v50 = vld [vmem:[%s5863_s28 + $0x68] sm:$0xff]  }
 0x299   : > { %v4967_v62 = vpop.permute.xlu1 %4966  ;;  %v1652_v31 = vsel %vm900_vm11, %v1644_v9, %v4948_v12  ;;  %v1653_v5 = vsel %vm900_vm11, %v1645_v10, %v4949_v11  ;;  %v5671_v52 = vld [vmem:[%s5863_s28 + $0x70] sm:$0xff]   ;;  %v5672_v47 = vld [vmem:[%s5863_s28 + $0x78] sm:$0xff]   ;;  %v2601_v51 = vld [vmem:[#allocation2 + $0x8] sm:$0xff]  ;;  %v2878_v26 = vrot.slane %v2600_v56, 2 }
 0x29a   : > { %v4969_v21 = vunpack.i.h.bf16 %v4967_v62  ;;  %v4968_v27 = vunpack.i.l.bf16 %v4967_v62  ;;  %v2602_v57 = vld [vmem:[#allocation2 + $0x10] sm:$0x3]  ;;  %v2703_v24 = vrot.slane %v2601_v51, 1  ;;  %v2879_v0 = vrot.slane %v2601_v51, 2 }
 0x29b   : > { %v2705_v60 = vrot.slane %v2602_v57, 1  ;;  %v2881_v13 = vrot.slane %v2602_v57, 2 }
 0x29c   : > { %v1634_v3 = vsel %vm890_vm9, %v1626_v2, %v4968_v27  ;;  %v1635_v6 = vsel %vm890_vm9, %v1627_v36, %v4969_v21  ;;  %v2704_v61 = vsel %vm1340_vm14, %v2702_v58, %v2703_v24  ;;  %v2880_v21 = vsel %vm1389_vm15, %v2878_v26, %v2879_v0  ;;  %v2652_v2 = vld [vmem:[#allocation2 + $0x1a0] sm:$0xff] }
 0x29d   : > { %v1642_v14 = vsel %vm895_vm10, %v1634_v3, %v4933_v20  ;;  %v1643_v8 = vsel %vm895_vm10, %v1635_v6, %v4934_v19  ;;  %v4982_v49 = vpop.permute.xlu1 %4981  ;;  %v2706_v62 = vsel %vm1340_vm14, %v2703_v24, %v2705_v60  ;;  %v2882_v27 = vsel %vm1389_vm15, %v2879_v0, %v2881_v13 }
 0x29e   : > { %v4984_v17 = vunpack.i.h.bf16 %v4982_v49  ;;  %v4983_v18 = vunpack.i.l.bf16 %v4982_v49  ;;  %v1650_v59 = vsel %vm900_vm11, %v1642_v14, %v4973_v23  ;;  %v1651_v30 = vsel %vm900_vm11, %v1643_v8, %v4974_v22  ;;  %v5646_v22 = vld [vmem:[%s7979_s15 + $0x58] sm:$0xff]  }
 0x29f   : > { %v1658_v37 = vsel %vm905_vm12, %v1650_v59, %v4978_v40  ;;  %v1659_v38 = vsel %vm905_vm12, %v1651_v30, %v4979_v1  ;;  %v4985_v63 = vpack.i.bf16 %v2706_v62, %v2704_v61  ;;  %v4990_v1 = vpack.i.bf16 %v2882_v27, %v2880_v21  ;;  %v2651_v40 = vld [vmem:[#allocation2 + $0x198] sm:$0xff] }
 0x2a0   : > { %v1660_v39 = vsel %vm905_vm12, %v1652_v31, %v4983_v18  ;;  %v1661_v20 = vsel %vm905_vm12, %v1653_v5, %v4984_v17  ;;  %v1664_v19 = vpack.c.bf16 %v1659_v38, %v1658_v37  ;;  %v4995_v36 = vpack.i.bf16 %v2652_v2, %v2651_v40  ;;  %v4689_v31 = vpop.f32.mrf.mxu0 }
 0x2a1   : > { %v1665_v23 = vpack.c.bf16 %v1661_v20, %v1660_v39  ;;  %4986 = vrot.lane.b32.xlu1 %v4985_v63, %s8016_s29 }
 0x2a2   : > { %4675 = vmatprep.mubr.msk.bf16.mxu1 %vm962_vm13, %v1664_v19  ;;  %v2020_v38 = vpop.f32.mrf.mxu0 }
 0x2a3   : > { %4676 = vmatmul.mubr.msk.bf16.gmra.mxu1 %vm962_vm13, %v1665_v23 }
 0x2a4   : > { %4707 = vmatprep.mubr.msk.bf16.mxu1 %vm905_vm12, %v5645_v41  ;;  %v4690_v19 = vpop.f32.mrf.mxu0 }
 0x2a5   : > { %4991 = vrot.lane.b32.xlu1 %v4990_v1, %s8018_s27 }
 0x2a9   : > { %4996 = vrot.lane.b32.xlu1 %v4995_v36, %s8017_s22 }
 0x2ab   : > { %4708 = vmatmul.mubr.msk.bf16.vlgmr.msra.gmra.mxu1 %vm905_vm12, %v5646_v22  ;;  %v2023_v22 = vpop.f32.mrf.mxu0 }
 0x2ac   : > { %4720 = vmatpush3.bf16.msra.mxu1 %v2318_v44  ;;  %4711 = vmatprep.mubr.msk.bf16.mxu1 %vm905_vm12, %v5647_v43  ;;  %v6636_v44 = vld [vmem:[%s7968_s4] ss:$0 sm:$0xff] }
 0x2b3   : > { %4712 = vmatmul.mubr.msk.bf16.gmra.mxu1 %vm905_vm12, %v5648_v46  ;;  %v4693_v46 = vpop.f32.mrf.mxu0 }
 0x2b4   : > { %4715 = vmatprep.mubr.msk.bf16.mxu1 %vm905_vm12, %v5649_v28 }
 0x2bb   : > { %4716 = vmatmul.mubr.msk.bf16.gmra.mxu1 %vm905_vm12, %v5650_v16 }
 0x2bc   : > { %4721 = vmatprep.mubr.msk.bf16.mxu1 %vm2267_vm2, %v5651_v32 }
 0x2c3   : > { %4722 = vmatmul.mubr.msk.bf16.vlgmr.msra.gmra.mxu1 %vm2267_vm2, %v5653_v35 }
 0x2c4   : > { %4725 = vmatprep.mubr.msk.bf16.mxu1 %vm2267_vm2, %v5655_v45 }
 0x2cb   : > { %4726 = vmatmul.mubr.msk.bf16.gmra.mxu1 %vm2267_vm2, %v5656_v4  ;;  %v2036_v4 = vpop.f32.mrf.mxu0 }
 0x2cc   : > { %4729 = vmatprep.mubr.msk.bf16.mxu1 %vm2267_vm2, %v5657_v42 }
 0x2d3   : > { %4730 = vmatmul.mubr.msk.bf16.gmra.mxu1 %vm2267_vm2, %v5658_v53 }
 0x2d4   : > { %4733 = vmatprep.mubr.msk.bf16.mxu1 %vm2267_vm2, %v5659_v34 }
 0x2db   : > { %4734 = vmatmul.mubr.msk.bf16.gmra.mxu1 %vm2267_vm2, %v5660_v54 }
 0x2dc   : > { %4737 = vmatprep.mubr.msk.bf16.mxu1 %vm2267_vm2, %v5663_v15 }
 0x2e3   : > { %4738 = vmatmul.mubr.msk.bf16.gmra.mxu1 %vm2267_vm2, %v5664_v25 }
 0x2e4   : > { %4741 = vmatprep.mubr.msk.bf16.mxu1 %vm2267_vm2, %v5665_v7  ;;  %v4694_v7 = vpop.f32.mrf.mxu0 }
 0x2e6   : > { %v2039_v51 = vpop.f32.mrf.mxu0 }
 0x2eb   : > { %4742 = vmatmul.mubr.msk.bf16.gmra.mxu1 %vm2267_vm2, %v5666_v48 }
 0x2ec   : > { %4745 = vmatprep.mubr.msk.bf16.mxu1 %vm2267_vm2, %v5667_v55 }
 0x2f3   : > { %4746 = vmatmul.mubr.msk.bf16.gmra.mxu1 %vm2267_vm2, %v5668_v50 }
 0x2f4   : > { %4749 = vmatprep.mubr.msk.bf16.mxu1 %vm2267_vm2, %v5671_v52 }
 0x2fb   : > { %4750 = vmatmul.mubr.msk.bf16.gmra.mxu1 %vm2267_vm2, %v5672_v47 }
 0x316   : > { %v4697_v60 = vpop.f32.mrf.mxu0 }
 0x318   : > { %v2052_v2 = vpop.f32.mrf.mxu0 }
 0x33f   : > { %v6593_v3 = vpop.f32.mrf.mxu1 }
 0x340   : > { %8023 = vst [vmem:[#allocation6_spill] sm:$0xff] %v6593_v3 }
 0x341   : > { %v6595_v6 = vpop.f32.mrf.mxu1 }
 0x342   : > { %8024 = vst [vmem:[#allocation7_spill] sm:$0xff] %v6595_v6 }
 0x343   : > { %v6597_v9 = vpop.f32.mrf.mxu1 }
 0x344   : > { %8025 = vst [vmem:[#allocation8_spill] sm:$0xff] %v6597_v9 }
 0x345   : > { %v6599_v10 = vpop.f32.mrf.mxu1 }
 0x346   : > { %8026 = vst [vmem:[#allocation9_spill] sm:$0xff] %v6599_v10 }
 0x363   : > { %v6601_v11 = vpop.f32.mrf.mxu1 }
 0x364   : > { %8027 = vst [vmem:[#allocation10_spill] sm:$0xff] %v6601_v11 }
 0x365   : > { %v6603_v12 = vpop.f32.mrf.mxu1 }
 0x366   : > { %8028 = vst [vmem:[#allocation11_spill] sm:$0xff] %v6603_v12 }
 0x367   : > { %v6605_v14 = vpop.f32.mrf.mxu1 }
 0x368   : > { %8029 = vst [vmem:[#allocation12_spill] sm:$0xff] %v6605_v14 }
 0x369   : > { %v6607_v8 = vpop.f32.mrf.mxu1 }
 0x36a   : > { %8030 = vst [vmem:[#allocation13_spill] sm:$0xff] %v6607_v8 }
 0x36b   : > { %v6609_v49 = vpop.f32.mrf.mxu1 }
 0x36d   : > { %v6611_v17 = vpop.f32.mrf.mxu1 }
 0x36f   : > { %v6613_v18 = vpop.f32.mrf.mxu1 }
 0x371   : > { %v6615_v59 = vpop.f32.mrf.mxu1 }
 0x373   : > { %v6617_v30 = vpop.f32.mrf.mxu1 }
 0x375   : > { %v6619_v5 = vpop.f32.mrf.mxu1 }
 0x377   : > { %v6621_v37 = vpop.f32.mrf.mxu1 }
 0x379   : > { %v6623_v39 = vpop.f32.mrf.mxu1 }
 0x37b   : > { %v6625_v20 = vpop.f32.mrf.mxu1 }
 0x37d   : > { %v6627_v41 = vpop.f32.mrf.mxu1 }
 0x37f   : > { %v6629_v23 = vpop.f32.mrf.mxu1 }
 0x381   : > { %v6631_v43 = vpop.f32.mrf.mxu1 }
 0x383   : > { %v4723_v28 = vpop.f32.mrf.mxu1 }
 0x384   : > { %v2363_v16 = vadd.f32 %v4723_v28, %v6636_v44 }
 0x385   : > { %v2354_v32 = vpop.f32.mrf.mxu1 }
 0x386   : > { %v2483_v35 = vadd.f32 %v4689_v31, %v2363_v16  ;;  %v2355_v45 = vadd.f32 %v6636_v44, %v2354_v32 }
 0x387   : > { %v4724_v42 = vpop.f32.mrf.mxu1 }
 0x388   : > { %2570 = vst.msk [vmem:[#allocation2 + $0x31] sm:$0xff] %vm871_vm3, %v2483_v35  ;;  %v2481_v53 = vadd.f32 %v2355_v45, %v2020_v38  ;;  %v2366_v34 = vadd.f32 %v4724_v42, %v6636_v44 }
 0x389   : > { %v2357_v54 = vpop.f32.mrf.mxu1 }
 0x38a   : > { %2568 = vst.msk [vmem:[#allocation2 + $0x19] sm:$0xff] %vm871_vm3, %v2481_v53  ;;  %v2484_v15 = vadd.f32 %v4690_v19, %v2366_v34  ;;  %v2358_v25 = vadd.f32 %v6636_v44, %v2357_v54  ;;  %v4698_v34 = vpop.f32.mrf.mxu0 }
 0x38b   : > { %v4727_v48 = vpop.f32.mrf.mxu1 }
 0x38c   : > { %2571 = vst.msk [vmem:[#allocation2 + $0x39] sm:$0xff] %vm871_vm3, %v2484_v15  ;;  %v2482_v55 = vadd.f32 %v2358_v25, %v2023_v22  ;;  %v2379_v50 = vadd.f32 %v4727_v48, %v6636_v44 }
 0x38d   : > { %v2370_v52 = vpop.f32.mrf.mxu1 }
 0x38e   : > { %2569 = vst.msk [vmem:[#allocation2 + $0x21] sm:$0xff] %vm871_vm3, %v2482_v55  ;;  %v2371_v47 = vadd.f32 %v6636_v44, %v2370_v52  ;;  %v2487_v56 = vadd.f32 %v4693_v46, %v2379_v50  ;;  %v2055_v50 = vpop.f32.mrf.mxu0 }
 0x38f   : > { %v4728_v57 = vpop.f32.mrf.mxu1  ;;  %v2606_v62 = vld [vmem:[#allocation2 + $0x30] sm:$0xff] }
 0x390   : > { %v2382_v58 = vadd.f32 %v4728_v57, %v6636_v44  ;;  %2574 = vst.msk [vmem:[#allocation2 + $0x61] sm:$0xff] %vm871_vm3, %v2487_v56  ;;  %v2485_v24 = vadd.f32 %v2371_v47, %v2036_v4  ;;  %v2712_v1 = vrot.slane %v2606_v62, 1  ;;  %v2888_v4 = vrot.slane %v2606_v62, 2 }
 0x391   : > { %v2373_v61 = vpop.f32.mrf.mxu1  ;;  %v2603_v45 = vld [vmem:[#allocation2 + $0x18] sm:$0xff] }
 0x392   : > { %v2374_v63 = vadd.f32 %v6636_v44, %v2373_v61  ;;  %2572 = vst.msk [vmem:[#allocation2 + $0x49] sm:$0xff] %vm871_vm3, %v2485_v24  ;;  %v2488_v26 = vadd.f32 %v4694_v7, %v2382_v58  ;;  %v4701_v58 = vpop.f32.mrf.mxu0  ;;  %v5689_v6 = vld [vmem:[#allocation2 + $0x18] sm:$0xff] }
 0x393   : > { %v4731_v0 = vpop.f32.mrf.mxu1  ;;  %v2607_v13 = vld [vmem:[#allocation2 + $0x38] sm:$0xff]  ;;  %v2608_v21 = vld [vmem:[#allocation2 + $0x40] sm:$0x3] }
 0x394   : > { %v5005_v27 = vpack.i.bf16 %v2607_v13, %v2606_v62  ;;  %v2713_v40 = vrot.slane %v2607_v13, 1  ;;  %2575 = vst.msk [vmem:[#allocation2 + $0x69] sm:$0xff] %vm871_vm3, %v2488_v26  ;;  %v2715_v31 = vrot.slane %v2608_v21, 1  ;;  %v2889_v19 = vrot.slane %v2607_v13, 2 }
 0x395   : > { %v2386_v36 = vpop.f32.mrf.mxu1  ;;  %v6653_v38 = vld [vmem:[#allocation2 + $0x20] sm:$0xff]  ;;  %v2891_v22 = vrot.slane %v2608_v21, 2  ;;  %v2486_v46 = vadd.f32 %v2374_v63, %v2039_v51  ;;  %v2395_v16 = vadd.f32 %v4731_v0, %v6636_v44  ;;  %v2605_v7 = vld [vmem:[#allocation2 + $0x28] sm:$0x3]  ;;  %v2707_v62 = vrot.slane %v2603_v45, 1  ;;  %v2068_v21 = vpop.f32.mrf.mxu0 }
 0x396   : > { %5006 = vrot.lane.b32.xlu0 %v5005_v27, %s8017_s22  ;;  %5001 = vrot.lane.b32.xlu1 %v5005_v27, %s8031_s7  ;;  %v2714_v28 = vsel %vm1340_vm14, %v2712_v1, %v2713_v40  ;;  %v2716_v35 = vsel %vm1340_vm14, %v2713_v40, %v2715_v31  ;;  %v5010_v53 = vpack.i.bf16 %v6653_v38, %v2603_v45  ;;  %v2708_v51 = vrot.slane %v6653_v38, 1 }
 0x397   : > { %v4732_v32 = vpop.f32.mrf.mxu1  ;;  %2573 = vst.msk [vmem:[#allocation2 + $0x51] sm:$0xff] %vm871_vm3, %v2486_v46  ;;  %v5015_v42 = vpack.i.bf16 %v2716_v35, %v2714_v28  ;;  %v2890_v15 = vsel %vm1389_vm15, %v2888_v4, %v2889_v19  ;;  %v2892_v25 = vsel %vm1389_vm15, %v2889_v19, %v2891_v22  ;;  %v2387_v48 = vadd.f32 %v6636_v44, %v2386_v36 }
 0x398   : > { %v2398_v55 = vadd.f32 %v4732_v32, %v6636_v44  ;;  %v2491_v47 = vadd.f32 %v4697_v60, %v2395_v16  ;;  %v5020_v56 = vpack.i.bf16 %v2892_v25, %v2890_v15  ;;  %v2710_v57 = vrot.slane %v2605_v7, 1  ;;  %v4702_v16 = vpop.f32.mrf.mxu0 }
 0x399   : > { %v2389_v54 = vpop.f32.mrf.mxu1  ;;  %v2489_v63 = vadd.f32 %v2387_v48, %v2052_v2  ;;  %v2709_v60 = vsel %vm1340_vm14, %v2707_v62, %v2708_v51  ;;  %v2884_v40 = vrot.slane %v6653_v38, 2  ;;  %v2886_v36 = vrot.slane %v2605_v7, 2 }
 0x39a   : > { %5016 = vrot.lane.b32.xlu1 %v5015_v42, %s8016_s29  ;;  %5011 = vrot.lane.b32.xlu0 %v5010_v53, %s8031_s7  ;;  %v2390_v24 = vadd.f32 %v6636_v44, %v2389_v54  ;;  %2578 = vst.msk [vmem:[#allocation2 + $0x91] sm:$0xff] %vm871_vm3, %v2491_v47  ;;  %v2492_v26 = vadd.f32 %v4698_v34, %v2398_v55  ;;  %v2883_v46 = vrot.slane %v2603_v45, 2  ;;  %v6689_v34 = vld [vmem:[#allocation2 + $0x60] sm:$0xff]  ;;  %v2071_v25 = vpop.f32.mrf.mxu0 }
 0x39b   : > { %v4735_v52 = vpop.f32.mrf.mxu1  ;;  %v2711_v13 = vsel %vm1340_vm14, %v2708_v51, %v2710_v57  ;;  %2576 = vst.msk [vmem:[#allocation2 + $0x79] sm:$0xff] %vm871_vm3, %v2489_v63  ;;  %v2887_v38 = vsel %vm1389_vm15, %v2884_v40, %v2886_v36  ;;  %v6691_v45 = vld [vmem:[#allocation2 + $0x68] sm:$0xff]  ;;  %v2614_v48 = vld [vmem:[#allocation2 + $0x70] sm:$0x3] }
 0x39c   : > { %2579 = vst.msk [vmem:[#allocation2 + $0x99] sm:$0xff] %vm871_vm3, %v2492_v26  ;;  %v2411_v27 = vadd.f32 %v4735_v52, %v6636_v44  ;;  %v2490_v31 = vadd.f32 %v2390_v24, %v2055_v50  ;;  %v5055_v28 = vpack.i.bf16 %v2711_v13, %v2709_v60  ;;  %v2885_v35 = vsel %vm1389_vm15, %v2883_v46, %v2884_v40  ;;  %v4705_v50 = vpop.f32.mrf.mxu0 }
 0x39d   : > { %v2402_v61 = vpop.f32.mrf.mxu1  ;;  %v5060_v7 = vpack.i.bf16 %v2887_v38, %v2885_v35  ;;  %v5070_v52 = vpack.i.bf16 %v6691_v45, %v6689_v34  ;;  %v2723_v51 = vrot.slane %v6691_v45, 1  ;;  %v2725_v57 = vrot.slane %v2614_v48, 1 }
 0x39e   : > { %5021 = vrot.lane.b32.xlu1 %v5020_v56, %s8018_s27  ;;  %5036 = vrot.lane.b32.xlu0 %v5015_v42, %s8013_s25  ;;  %v2403_v2 = vadd.f32 %v6636_v44, %v2402_v61  ;;  %2577 = vst.msk [vmem:[#allocation2 + $0x81] sm:$0xff] %vm871_vm3, %v2490_v31  ;;  %v2495_v4 = vadd.f32 %v4701_v58, %v2411_v27  ;;  %v6703_v61 = vld [vmem:[#allocation2 + $0x48] sm:$0xff]  ;;  %v6705_v62 = vld [vmem:[#allocation2 + $0x50] sm:$0xff]  ;;  %v2084_v26 = vpop.f32.mrf.mxu0  ;;  %v2899_v46 = vrot.slane %v6691_v45, 2 }
 0x39f   : > { %v4736_v0 = vpop.f32.mrf.mxu1  ;;  %v5075_v27 = vpack.i.bf16 %v6705_v62, %v6703_v61  ;;  %v2726_v40 = vsel %vm1340_vm14, %v2723_v51, %v2725_v57 }
 0x3a0   : > { %v2414_v19 = vadd.f32 %v4736_v0, %v6636_v44  ;;  %2582 = vst.msk [vmem:[#allocation2 + $0xc1] sm:$0xff] %vm871_vm3, %v2495_v4  ;;  %v2493_v54 = vadd.f32 %v2403_v2, %v2068_v21 }
 0x3a1   : > { %v2405_v1 = vpop.f32.mrf.mxu1 }
 0x3a2   : > { %5026 = vrot.lane.b32.xlu1 %v5015_v42, %s8019_s24  ;;  %5041 = vrot.lane.b32.xlu0 %v5020_v56, %s8014_s23  ;;  %v2406_v42 = vadd.f32 %v6636_v44, %v2405_v1  ;;  %v2496_v15 = vadd.f32 %v4702_v16, %v2414_v19  ;;  %2580 = vst.msk [vmem:[#allocation2 + $0xa9] sm:$0xff] %vm871_vm3, %v2493_v54  ;;  %v4706_v16 = vpop.f32.mrf.mxu0 }
 0x3a3   : > { %v4739_v22 = vpop.f32.mrf.mxu1 }
 0x3a4   : > { %2583 = vst.msk [vmem:[#allocation2 + $0xc9] sm:$0xff] %vm871_vm3, %v2496_v15  ;;  %v2494_v58 = vadd.f32 %v2406_v42, %v2071_v25  ;;  %v2427_v13 = vadd.f32 %v4739_v22, %v6636_v44  ;;  %v2898_v22 = vrot.slane %v6689_v34, 2  ;;  %v2087_v25 = vpop.f32.mrf.mxu0 }
 0x3a5   : > { %v2418_v32 = vpop.f32.mrf.mxu1 }
 0x3a6   : > { %5031 = vrot.lane.b32.xlu1 %v5020_v56, %s8020_s21  ;;  %5056 = vrot.lane.b32.xlu0 %v5055_v28, %s8019_s24  ;;  %v2722_v56 = vrot.slane %v6689_v34, 1  ;;  %2581 = vst.msk [vmem:[#allocation2 + $0xb1] sm:$0xff] %vm871_vm3, %v2494_v58  ;;  %v2419_v36 = vadd.f32 %v6636_v44, %v2418_v32  ;;  %v2499_v34 = vadd.f32 %v4705_v50, %v2427_v13 }
 0x3a7   : > { %v4740_v53 = vpop.f32.mrf.mxu1 }
 0x3a8   : > { %v2724_v1 = vsel %vm1340_vm14, %v2722_v56, %v2723_v51  ;;  %v2497_v54 = vadd.f32 %v2419_v36, %v2084_v26  ;;  %2586 = vst.msk [vmem:[#allocation2 + $0xf1] sm:$0xff] %vm871_vm3, %v2499_v34 }
 0x3a9   : > { %v2421_v55 = vpop.f32.mrf.mxu1  ;;  %v6730_v42 = vpack.i.bf16 %v2726_v40, %v2724_v1 }
 0x3aa   : > { %5061 = vrot.lane.b32.xlu0 %v5060_v7, %s8020_s21  ;;  %5046 = vrot.lane.b32.xlu1 %v5055_v28, %s8016_s29  ;;  %v2901_v28 = vrot.slane %v2614_v48, 2  ;;  %v2422_v38 = vadd.f32 %v6636_v44, %v2421_v55  ;;  %v2900_v48 = vsel %vm1389_vm15, %v2898_v22, %v2899_v46  ;;  %2584 = vst.msk [vmem:[#allocation2 + $0xd9] sm:$0xff] %vm871_vm3, %v2497_v54  ;;  %v2619_v22 = vld [vmem:[#allocation2 + $0x98] sm:$0xff] }
 0x3ab   : > { %v4743_v47 = vpop.f32.mrf.mxu1  ;;  %v2733_v34 = vrot.slane %v2619_v22, 1  ;;  %v2909_v54 = vrot.slane %v2619_v22, 2 }
 0x3ac   : > { %v2443_v24 = vadd.f32 %v4743_v47, %v6636_v44  ;;  %v2902_v55 = vsel %vm1389_vm15, %v2899_v46, %v2901_v28  ;;  %v2498_v51 = vadd.f32 %v2422_v38, %v2087_v25 }
 0x3ad   : > { %v2434_v63 = vpop.f32.mrf.mxu1 }
 0x3ae   : > { %v2503_v0 = vadd.f32 %v6609_v49, %v2443_v24  ;;  %v2435_v60 = vadd.f32 %v6636_v44, %v2434_v63  ;;  %5071 = vrot.lane.b32.xlu0 %v5070_v52, %s8017_s22  ;;  %5051 = vrot.lane.b32.xlu1 %v5060_v7, %s8018_s27  ;;  %v2430_v49 = vadd.f32 %v4740_v53, %v6636_v44  ;;  %v2717_v53 = vrot.slane %v6703_v61, 1 }
 0x3af   : > { %v4744_v21 = vpop.f32.mrf.mxu1  ;;  %v2893_v24 = vrot.slane %v6703_v61, 2  ;;  %2585 = vst.msk [vmem:[#allocation2 + $0xe1] sm:$0xff] %vm871_vm3, %v2498_v51 }
 0x3b0   : > { %2590 = vst.msk [vmem:[#allocation2 + $0x121] sm:$0xff] %vm871_vm3, %v2503_v0  ;;  %v2501_v31 = vadd.f32 %v2435_v60, %v6611_v17  ;;  %v2446_v2 = vadd.f32 %v4744_v21, %v6636_v44  ;;  %v2611_v17 = vld [vmem:[#allocation2 + $0x58] sm:$0x3]  ;;  %v2500_v15 = vadd.f32 %v4706_v16, %v2430_v49  ;;  %v2894_v60 = vrot.slane %v6705_v62, 2  ;;  %v6759_v21 = vld [vmem:[%s7969_s5 + $0x20] ss:$0 sps:$4 sm:$0xff]  }
 0x3b1   : > { %v2437_v19 = vpop.f32.mrf.mxu1  ;;  %v2720_v47 = vrot.slane %v2611_v17, 1  ;;  %v2896_v13 = vrot.slane %v2611_v17, 2  ;;  %4806 = vmatprep.subr.msk.bf16.mxu0 %vm966_vm5, %v6759_v21 }
 0x3b2   : > { %2588 = vst.msk [vmem:[#allocation2 + $0x109] sm:$0xff] %vm871_vm3, %v2501_v31  ;;  %v2504_v35 = vadd.f32 %v6613_v18, %v2446_v2  ;;  %v2438_v32 = vadd.f32 %v6636_v44, %v2437_v19  ;;  %5076 = vrot.lane.b32.xlu0 %v5075_v27, %s8031_s7  ;;  %5066 = vrot.lane.b32.xlu1 %v5070_v52, %s8031_s7  ;;  %v2718_v52 = vrot.slane %v6705_v62, 1  ;;  %2587 = vst.msk [vmem:[#allocation2 + $0xf9] sm:$0xff] %vm871_vm3, %v2500_v15  ;;  %v2618_v19 = vld [vmem:[#allocation2 + $0x90] sm:$0xff] }
 0x3b3   : > { %v4747_v4 = vpop.f32.mrf.mxu1  ;;  %v2895_v36 = vsel %vm1389_vm15, %v2893_v24, %v2894_v60  ;;  %v2897_v49 = vsel %vm1389_vm15, %v2894_v60, %v2896_v13  ;;  %v6794_v38 = vpack.i.bf16 %v2619_v22, %v2618_v19  ;;  %v2625_v24 = vld [vmem:[#allocation2 + $0xc8] sm:$0xff] }
 0x3b4   : > { %2591 = vst.msk [vmem:[#allocation2 + $0x129] sm:$0xff] %vm871_vm3, %v2504_v35  ;;  %v2502_v45 = vadd.f32 %v2438_v32, %v6615_v59  ;;  %v2459_v18 = vadd.f32 %v4747_v4, %v6636_v44  ;;  %v2719_v26 = vsel %vm1340_vm14, %v2717_v53, %v2718_v52  ;;  %v2721_v0 = vsel %vm1340_vm14, %v2718_v52, %v2720_v47  ;;  %v2620_v35 = vld [vmem:[#allocation2 + $0xa0] sm:$0x3]  ;;  %v2626_v52 = vld [vmem:[#allocation2 + $0xd0] sm:$0x3] }
 0x3b5   : > { %v2450_v7 = vpop.f32.mrf.mxu1  ;;  %v6772_v40 = vpack.i.bf16 %v2721_v0, %v2719_v26  ;;  %v6785_v16 = vpack.i.bf16 %v2897_v49, %v2895_v36  ;;  %v2616_v4 = vld [vmem:[#allocation2 + $0x80] sm:$0xff]  ;;  %v2732_v53 = vrot.slane %v2618_v19, 1  ;;  %v2911_v15 = vrot.slane %v2620_v35, 2  ;;  %v6832_v36 = vld [vmem:[#allocation2 + $0xb0] sm:$0xff] }
 0x3b6   : > { %2589 = vst.msk [vmem:[#allocation2 + $0x111] sm:$0xff] %vm871_vm3, %v2502_v45  ;;  %v2507_v50 = vadd.f32 %v6617_v30, %v2459_v18  ;;  %v2451_v59 = vadd.f32 %v6636_v44, %v2450_v7  ;;  %5106 = vrot.lane.b32.xlu0 %v6730_v42, %s8013_s25  ;;  %5081 = vrot.lane.b32.xlu1 %v5075_v27, %s8017_s22  ;;  %v2735_v45 = vrot.slane %v2620_v35, 1  ;;  %v2743_v0 = vrot.slane %v2625_v24, 1 }
 0x3b7   : > { %v4748_v56 = vpop.f32.mrf.mxu1  ;;  %v5110_v30 = vpack.i.bf16 %v2902_v55, %v2900_v48  ;;  %v2734_v25 = vsel %vm1340_vm14, %v2732_v53, %v2733_v34  ;;  %v2728_v55 = vrot.slane %v2616_v4, 1  ;;  %v2745_v60 = vrot.slane %v2626_v52, 1 }
 0x3b8   : > { %2594 = vst.msk [vmem:[#allocation2 + $0x151] sm:$0xff] %vm871_vm3, %v2507_v50  ;;  %v2505_v57 = vadd.f32 %v2451_v59, %v6619_v5  ;;  %v2462_v58 = vadd.f32 %v4748_v56, %v6636_v44  ;;  %v2736_v7 = vsel %vm1340_vm14, %v2733_v34, %v2735_v45  ;;  %v2912_v59 = vsel %vm1389_vm15, %v2909_v54, %v2911_v15 }
 0x3b9   : > { %v2453_v63 = vpop.f32.mrf.mxu1  ;;  %v6810_v47 = vpack.i.bf16 %v2736_v7, %v2734_v25  ;;  %v6859_v34 = vld [vmem:[#allocation2 + $0x108] sm:$0xff] }
 0x3ba   : > { %2592 = vst.msk [vmem:[#allocation2 + $0x139] sm:$0xff] %vm871_vm3, %v2505_v57  ;;  %v2508_v5 = vadd.f32 %v6621_v37, %v2462_v58  ;;  %v2454_v61 = vadd.f32 %v6636_v44, %v2453_v63  ;;  %5111 = vrot.lane.b32.xlu0 %v5110_v30, %s8014_s23  ;;  %5086 = vrot.lane.b32.xlu1 %v6730_v42, %s8016_s29  ;;  %v2904_v57 = vrot.slane %v2616_v4, 2 }
 0x3bb   : > { %v4751_v62 = vpop.f32.mrf.mxu1 }
 0x3bc   : > { %2595 = vst.msk [vmem:[#allocation2 + $0x159] sm:$0xff] %vm871_vm3, %v2508_v5  ;;  %v2506_v27 = vadd.f32 %v2454_v61, %v6623_v39  ;;  %v2475_v1 = vadd.f32 %v4751_v62, %v6636_v44  ;;  %v6822_v5 = vld [vmem:[#allocation2 + $0x128] sm:$0xff] }
 0x3bd   : > { %v2466_v37 = vpop.f32.mrf.mxu1  ;;  %v2939_v35 = vrot.slane %v6822_v5, 2 }
 0x3be   : > { %2593 = vst.msk [vmem:[#allocation2 + $0x141] sm:$0xff] %vm871_vm3, %v2506_v27  ;;  %v2511_v31 = vadd.f32 %v6625_v20, %v2475_v1  ;;  %v2467_v2 = vadd.f32 %v6636_v44, %v2466_v37  ;;  %5126 = vrot.lane.b32.xlu0 %v6772_v40, %s8019_s24  ;;  %5091 = vrot.lane.b32.xlu1 %v5110_v30, %s8018_s27  ;;  %v6828_v1 = vld [vmem:[#allocation2 + $0x130] sm:$0x3]  ;;  %v6830_v37 = vld [vmem:[#allocation2 + $0xa8] sm:$0xff] }
 0x3bf   : > { %v4752_v39 = vpop.f32.mrf.mxu1  ;;  %v6872_v25 = vld [vmem:[#allocation2 + $0x150] sm:$0xff] }
 0x3c0   : > { %2598 = vst.msk [vmem:[#allocation2 + $0x181] sm:$0xff] %vm871_vm3, %v2511_v31  ;;  %v2509_v46 = vadd.f32 %v2467_v2, %v6627_v41  ;;  %v2478_v28 = vadd.f32 %v4752_v39, %v6636_v44  ;;  %v2615_v41 = vld [vmem:[#allocation2 + $0x78] sm:$0xff]  ;;  %v2746_v31 = vsel %vm1340_vm14, %v2743_v0, %v2745_v60  ;;  %v2919_v39 = vrot.slane %v2625_v24, 2 }
 0x3c1   : > { %v2469_v20 = vpop.f32.mrf.mxu1  ;;  %v2727_v48 = vrot.slane %v2615_v41, 1  ;;  %v2903_v51 = vrot.slane %v2615_v41, 2 }
 0x3c2   : > { %2596 = vst.msk [vmem:[#allocation2 + $0x169] sm:$0xff] %vm871_vm3, %v2509_v46  ;;  %v2512_v32 = vadd.f32 %v6629_v23, %v2478_v28  ;;  %v2470_v17 = vadd.f32 %v6636_v44, %v2469_v20  ;;  %5141 = vrot.lane.b32.xlu0 %v6785_v16, %s8020_s21  ;;  %5096 = vrot.lane.b32.xlu1 %v6730_v42, %s8019_s24  ;;  %v2617_v23 = vld [vmem:[#allocation2 + $0x88] sm:$0x3]  ;;  %v2908_v42 = vrot.slane %v2618_v19, 2  ;;  %v6836_v19 = vld [vmem:[#allocation2 + $0x120] sm:$0xff]  ;;  %v2921_v46 = vrot.slane %v2626_v52, 2 }
 0x3c3   : > { %v6802_v44 = vpack.i.bf16 %v2616_v4, %v2615_v41  ;;  %v2729_v56 = vsel %vm1340_vm14, %v2727_v48, %v2728_v55  ;;  %v2906_v58 = vrot.slane %v2617_v23, 2  ;;  %v2905_v62 = vsel %vm1389_vm15, %v2903_v51, %v2904_v57  ;;  %v6840_v28 = vld [vmem:[#allocation2 + $0x110] sm:$0xff]  ;;  %v5678_v20 = vld [vmem:[%s7969_s5 + $0x18] sm:$0xff]   ;;  %v2644_v7 = vld [vmem:[#allocation2 + $0x160] sm:$0x3] }
 0x3c4   : > { %2599 = vst.msk [vmem:[#allocation2 + $0x189] sm:$0xff] %vm871_vm3, %v2512_v32  ;;  %v2510_v18 = vadd.f32 %v2470_v17, %v6631_v43  ;;  %v2730_v43 = vrot.slane %v2617_v23, 1  ;;  %v2910_v50 = vsel %vm1389_vm15, %v2908_v42, %v2909_v54  ;;  %v2941_v17 = vrot.slane %v6828_v1, 2  ;;  %v2635_v41 = vld [vmem:[#allocation2 + $0x118] sm:$0x3] }
 0x3c5   : > { %v6820_v13 = vpack.i.bf16 %v2912_v59, %v2910_v50  ;;  %v2907_v27 = vsel %vm1389_vm15, %v2904_v57, %v2906_v58  ;;  %v6855_v4 = vpack.i.bf16 %v6832_v36, %v6830_v37  ;;  %v2938_v45 = vrot.slane %v6836_v19, 2  ;;  %v6879_v52 = vld [vmem:[#allocation2 + $0x140] sm:$0xff]  ;;  %v5679_v50 = vld [vmem:[%s7969_s5 + $0x10] sm:$0xff]   ;;  %v2641_v59 = vld [vmem:[#allocation2 + $0x148] sm:$0x3] }
 0x3c6   : > { %2597 = vst.msk [vmem:[#allocation2 + $0x171] sm:$0xff] %vm871_vm3, %v2510_v18  ;;  %5151 = vrot.lane.b32.xlu0 %v6794_v38, %s8017_s22  ;;  %5101 = vrot.lane.b32.xlu1 %v5110_v30, %s8020_s21  ;;  %v2624_v30 = vld [vmem:[#allocation2 + $0xc0] sm:$0xff]  ;;  %v2731_v63 = vsel %vm1340_vm14, %v2728_v55, %v2730_v43  ;;  %v6850_v32 = vpack.i.bf16 %v2907_v27, %v2905_v62  ;;  %v6862_v18 = vld [vmem:[#allocation2 + $0x158] sm:$0xff]  ;;  %v2758_v15 = vrot.slane %v6840_v28, 1  ;;  %v2760_v43 = vrot.slane %v2635_v41, 1 }
 0x3c7   : > { %v2742_v26 = vrot.slane %v2624_v30, 1  ;;  %v6824_v61 = vpack.i.bf16 %v2731_v63, %v2729_v56  ;;  %v2918_v2 = vrot.slane %v2624_v30, 2  ;;  %v6838_v22 = vpack.i.bf16 %v2625_v24, %v2624_v30  ;;  %v6892_v24 = vld [vmem:[#allocation2 + $0x138] sm:$0xff]  ;;  %v2648_v54 = vld [vmem:[#allocation2 + $0x180] sm:$0xff] }
 0x3c8   : > { %v6875_v48 = vsel %vm1389_vm15, %v2919_v39, %v2921_v46  ;;  %v2940_v55 = vsel %vm1389_vm15, %v2938_v45, %v2939_v35  ;;  %v2942_v56 = vsel %vm1389_vm15, %v2939_v35, %v2941_v17  ;;  %v2757_v51 = vrot.slane %v6859_v34, 1 }
 0x3c9   : > { %v2744_v49 = vsel %vm1340_vm14, %v2742_v26, %v2743_v0  ;;  %v6867_v23 = vsel %vm1389_vm15, %v2918_v2, %v2919_v39  ;;  %v2936_v57 = vrot.slane %v2635_v41, 2  ;;  %v2949_v58 = vrot.slane %v6862_v18, 2  ;;  %v5680_v39 = vld [vmem:[%s7969_s5 + $0x8] sm:$0xff]  }
 0x3ca   : > { %5156 = vrot.lane.b32.xlu0 %v6802_v44, %s8031_s7  ;;  %5116 = vrot.lane.b32.xlu1 %v6772_v40, %s8016_s29  ;;  %v6857_v53 = vpack.i.bf16 %v2746_v31, %v2744_v49  ;;  %v2933_v30 = vrot.slane %v6859_v34, 2  ;;  %v2951_v63 = vrot.slane %v2644_v7, 2  ;;  %v2773_v26 = vrot.slane %v6862_v18, 1 }
 0x3cb   : > { %v2775_v0 = vrot.slane %v2644_v7, 1  ;;  %v2759_v60 = vsel %vm1340_vm14, %v2757_v51, %v2758_v15  ;;  %v2948_v62 = vrot.slane %v6872_v25, 2  ;;  %v2770_v27 = vrot.slane %v2641_v59, 1  ;;  %v2649_v35 = vld [vmem:[#allocation2 + $0x188] sm:$0xff]  ;;  %v2650_v17 = vld [vmem:[#allocation2 + $0x190] sm:$0x3] }
 0x3cc   : > { %v2761_v49 = vsel %vm1340_vm14, %v2758_v15, %v2760_v43  ;;  %v2772_v2 = vrot.slane %v6872_v25, 1  ;;  %v2944_v46 = vrot.slane %v6879_v52, 2  ;;  %v2767_v45 = vrot.slane %v6892_v24, 1 }
 0x3cd   : > { %v2950_v41 = vsel %vm1389_vm15, %v2948_v62, %v2949_v58  ;;  %v6912_v15 = vld [vmem:[#allocation2 + $0x170] sm:$0xff]  ;;  %v2647_v7 = vld [vmem:[#allocation2 + $0x178] sm:$0x3]  ;;  %v2952_v43 = vsel %vm1389_vm15, %v2949_v58, %v2951_v63  ;;  %v2943_v42 = vrot.slane %v6892_v24, 2  ;;  %v3156_v62 = vrot.slane %v2650_v17, 1  ;;  %v5681_v58 = vld [vmem:[%s7969_s5] sm:$0xff]  }
 0x3ce   : > { %5186 = vrot.lane.b32.xlu0 %v6810_v47, %s8013_s25  ;;  %5121 = vrot.lane.b32.xlu1 %v6785_v16, %s8018_s27  ;;  %v2774_v51 = vsel %vm1340_vm14, %v2772_v2, %v2773_v26  ;;  %v2778_v63 = vrot.slane %v6912_v15, 1  ;;  %v2623_v2 = vld [vmem:[#allocation2 + $0xb8] sm:$0x3]  ;;  %v3255_v8 = vrot.slane %v2649_v35, 2  ;;  %v3257_v12 = vrot.slane %v2650_v17, 2 }
 0x3cf   : > { %v2945_v14 = vsel %vm1389_vm15, %v2943_v42, %v2944_v46  ;;  %v6933_v42 = vpack.i.bf16 %v2942_v56, %v2940_v55  ;;  %v3254_v10 = vrot.slane %v2648_v54, 2 }
 0x3d2   : > { %5191 = vrot.lane.b32.xlu0 %v6820_v13, %s8014_s23  ;;  %5131 = vrot.lane.b32.xlu1 %v6772_v40, %s8013_s25  ;;  %v4020_v40 = vsel %vm966_vm5, %v6759_v21, 0  ;;  %v2934_v21 = vrot.slane %v6840_v28, 2 }
 0x3d3   : > { %4754 = vmatpush3.bf16.msra.mxu0 %v4020_v40  ;;  %v2946_v40 = vrot.slane %v2641_v59, 2  ;;  %v3154_v59 = vrot.slane %v2649_v35, 1 }
 0x3d4   : > { %4755 = vmatprep.subr.bf16.mxu0 %v5678_v20  ;;  %v2935_v31 = vsel %vm1389_vm15, %v2933_v30, %v2934_v21  ;;  %v2776_v30 = vsel %vm1340_vm14, %v2773_v26, %v2775_v0  ;;  %v2780_v26 = vrot.slane %v2647_v7, 1  ;;  %v2954_v0 = vrot.slane %v6912_v15, 2 }
 0x3d5   : > { %v3157_v3 = vsel %vm1340_vm14, %v3154_v59, %v3156_v62 }
 0x3d6   : > { %5206 = vrot.lane.b32.xlu0 %v6824_v61, %s8019_s24  ;;  %5136 = vrot.lane.b32.xlu1 %v6785_v16, %s8014_s23  ;;  %v2768_v16 = vrot.slane %v6879_v52, 1  ;;  %v2781_v55 = vsel %vm1340_vm14, %v2778_v63, %v2780_v26 }
 0x3d7   : > { %4756 = vmatpush3.bf16.msra.mxu0 %v5678_v20  ;;  %v2937_v20 = vsel %vm1389_vm15, %v2934_v21, %v2936_v57  ;;  %v6920_v57 = vld [vmem:[#allocation2 + $0x168] sm:$0xff] }
 0x3d8   : > { %4757 = vmatprep.subr.bf16.mxu0 %v5679_v50  ;;  %v2771_v21 = vsel %vm1340_vm14, %v2768_v16, %v2770_v27  ;;  %v2956_v27 = vrot.slane %v2647_v7, 2  ;;  %v2953_v11 = vrot.slane %v6920_v57, 2  ;;  %v6953_v7 = vpack.i.bf16 %v2776_v30, %v2774_v51  ;;  %v2630_v51 = vld [vmem:[#allocation2 + $0xf0] sm:$0xff]  ;;  %v2631_v30 = vld [vmem:[#allocation2 + $0xf8] sm:$0xff] }
 0x3da   : > { %5221 = vrot.lane.b32.xlu0 %v6850_v32, %s8020_s21  ;;  %5146 = vrot.lane.b32.xlu1 %v6794_v38, %s8031_s7  ;;  %v2769_v38 = vsel %vm1340_vm14, %v2767_v45, %v2768_v16  ;;  %v3153_v16 = vrot.slane %v2648_v54, 1  ;;  %v2777_v45 = vrot.slane %v6920_v57, 1  ;;  %v2955_v56 = vsel %vm1389_vm15, %v2953_v11, %v2954_v0 }
 0x3db   : > { %4758 = vmatpush3.bf16.msra.mxu0 %v5679_v50  ;;  %v2947_v50 = vsel %vm1389_vm15, %v2944_v46, %v2946_v40  ;;  %v6944_v40 = vpack.i.bf16 %v2937_v20, %v2935_v31  ;;  %v2957_v17 = vsel %vm1389_vm15, %v2954_v0, %v2956_v27  ;;  %v6957_v11 = vpack.i.bf16 %v2771_v21, %v2769_v38  ;;  %v2632_v38 = vld [vmem:[#allocation2 + $0x100] sm:$0x3]  ;;  %v2627_v21 = vld [vmem:[#allocation2 + $0xd8] sm:$0xff] }
 0x3dc   : > { %4759 = vmatprep.subr.bf16.mxu0 %v5680_v39  ;;  %v3155_v9 = vsel %vm1340_vm14, %v3153_v16, %v3154_v59  ;;  %v2779_v46 = vsel %vm1340_vm14, %v2777_v45, %v2778_v63  ;;  %v6955_v59 = vpack.i.bf16 %v2952_v43, %v2950_v41  ;;  %v6959_v31 = vpack.i.bf16 %v2947_v50, %v2945_v14 }
 0x3dd   : > { %v6961_v20 = vpack.i.bf16 %v2649_v35, %v2648_v54  ;;  %v6963_v62 = vpack.i.bf16 %v3157_v3, %v3155_v9  ;;  %v6967_v26 = vpack.i.bf16 %v2957_v17, %v2955_v56  ;;  %v6978_v14 = vpack.i.bf16 %v2781_v55, %v2779_v46  ;;  %v4987_v56 = vpop.permute.xlu1 %4986 }
 0x3de   : > { %5231 = vrot.lane.b32.xlu0 %v6838_v22, %s8017_s22  ;;  %5161 = vrot.lane.b32.xlu1 %v6802_v44, %s8017_s22  ;;  %v6939_v44 = vpack.i.bf16 %v2761_v49, %v2759_v60  ;;  %v3256_v60 = vsel %vm1389_vm15, %v3254_v10, %v3255_v8  ;;  %v3258_v49 = vsel %vm1389_vm15, %v3255_v8, %v3257_v12  ;;  %v2913_v12 = vrot.slane %v6830_v37, 2 }
 0x3df   : > { %4760 = vmatpush3.bf16.msra.mxu0 %v5680_v39  ;;  %v2740_v39 = vrot.slane %v2623_v2, 1  ;;  %v6965_v63 = vpack.i.bf16 %v3258_v49, %v3256_v60  ;;  %v6975_v10 = vpack.i.bf16 %v6875_v48, %v6867_v23  ;;  %v8032_v3 = vrot.slane %v6832_v36, 1  ;;  %v2629_v49 = vld [vmem:[#allocation2 + $0xe8] sm:$0x3] }
 0x3e0   : > { %4761 = vmatprep.subr.bf16.mxu0 %v5681_v58  ;;  %v8033_v9 = vrot.slane %v6830_v37, 1  ;;  %v2914_v41 = vrot.slane %v6832_v36, 2  ;;  %v2916_v43 = vrot.slane %v2623_v2, 2  ;;  %v2928_v0 = vrot.slane %v2630_v51, 2 }
 0x3e1   : > { %v8034_v54 = vmov %v8032_v3  ;;  %v2929_v50 = vrot.slane %v2631_v30, 2  ;;  %v2931_v16 = vrot.slane %v2632_v38, 2  ;;  %v2752_v27 = vrot.slane %v2630_v51, 1 }
 0x3e2   : > { %5236 = vrot.lane.b32.xlu0 %v6855_v4, %s8031_s7  ;;  %5166 = vrot.lane.b32.xlu1 %v6810_v47, %s8016_s29  ;;  %v2739_v8 = vsel %vm1340_vm14, %v8033_v9, %v8032_v3  ;;  %v2741_v35 = vsel %vm1340_vm14, %v8034_v54, %v2740_v39  ;;  %v2915_v48 = vsel %vm1389_vm15, %v2913_v12, %v2914_v41  ;;  %v2753_v46 = vrot.slane %v2631_v30, 1  ;;  %v4992_v12 = vpop.permute.xlu1 %4991 }
 0x3e3   : > { %4762 = vmatpush3.bf16.msra.mxu0 %v5681_v58  ;;  %v6993_v23 = vpack.i.bf16 %v2741_v35, %v2739_v8  ;;  %v2917_v37 = vsel %vm1389_vm15, %v2914_v41, %v2916_v43  ;;  %v2628_v58 = vld [vmem:[#allocation2 + $0xe0] sm:$0xff]  ;;  %v2930_v2 = vsel %vm1389_vm15, %v2928_v0, %v2929_v50  ;;  %v2932_v45 = vsel %vm1389_vm15, %v2929_v50, %v2931_v16 }
 0x3e4   : > { %v7001_v36 = vpack.i.bf16 %v2917_v37, %v2915_v48  ;;  %v2755_v55 = vrot.slane %v2632_v38, 1  ;;  %v7021_v39 = vpack.i.bf16 %v2932_v45, %v2930_v2  ;;  %v2754_v17 = vsel %vm1340_vm14, %v2752_v27, %v2753_v46 }
 0x3e5   : > { %v2747_v9 = vrot.slane %v2627_v21, 1  ;;  %v2748_v8 = vrot.slane %v2628_v58, 1  ;;  %v2750_v54 = vrot.slane %v2629_v49, 1  ;;  %v2923_v35 = vrot.slane %v2627_v21, 2 }
 0x3e6   : > { %5266 = vrot.lane.b32.xlu0 %v6857_v53, %s8013_s25  ;;  %5171 = vrot.lane.b32.xlu1 %v6820_v13, %s8018_s27  ;;  %v2756_v60 = vsel %vm1340_vm14, %v2753_v46, %v2755_v55  ;;  %v2926_v48 = vrot.slane %v2629_v49, 2  ;;  %v7065_v16 = vpack.i.bf16 %v6822_v5, %v6836_v19  ;;  %v4989_v27 = vunpack.i.h.bf16 %v4987_v56  ;;  %v5683_v49 = vld [vmem:[#allocation2] sm:$0xff] }
 0x3e7   : > { %v7029_v3 = vpack.i.bf16 %v2756_v60, %v2754_v17  ;;  %v2749_v41 = vsel %vm1340_vm14, %v2747_v9, %v2748_v8  ;;  %v2751_v43 = vsel %vm1340_vm14, %v2748_v8, %v2750_v54  ;;  %v4988_v2 = vunpack.i.l.bf16 %v4987_v56 }
 0x3e8   : > { %v7043_v37 = vpack.i.bf16 %v2751_v43, %v2749_v41  ;;  %v7075_v55 = vpack.i.bf16 %v6840_v28, %v6859_v34  ;;  %v2763_v17 = vrot.slane %v6822_v5, 1  ;;  %v2765_v60 = vrot.slane %v6828_v1, 1 }
 0x3e9   : > { %v3656_v9 = vsel %vm871_vm3, %v5683_v49, %v4988_v2  ;;  %v2762_v8 = vrot.slane %v6836_v19, 1  ;;  %v4994_v28 = vunpack.i.h.bf16 %v4992_v12  ;;  %v4993_v34 = vunpack.i.l.bf16 %v4992_v12 }
 0x3ea   : > { %5271 = vrot.lane.b32.xlu0 %v6975_v10, %s8014_s23  ;;  %5176 = vrot.lane.b32.xlu1 %v6810_v47, %s8019_s24  ;;  %v7007_v47 = vpack.i.bf16 %v2631_v30, %v2630_v51  ;;  %v2766_v43 = vsel %vm1340_vm14, %v2763_v17, %v2765_v60 }
 0x3eb   : > { %v2764_v41 = vsel %vm1340_vm14, %v2762_v8, %v2763_v17  ;;  %v3688_v19 = vsel %vm687_vm1, %v3656_v9, %v4993_v34 }
 0x3ee   : > { %5286 = vrot.lane.b32.xlu0 %v6993_v23, %s8019_s24  ;;  %5181 = vrot.lane.b32.xlu1 %v6820_v13, %s8020_s21  ;;  %v7013_v13 = vpack.i.bf16 %v2628_v58, %v2627_v21 }
 0x3f2   : > { %5301 = vrot.lane.b32.xlu0 %v7001_v36, %s8020_s21  ;;  %5196 = vrot.lane.b32.xlu1 %v6824_v61, %s8016_s29 }
 0x3f6   : > { %5311 = vrot.lane.b32.xlu0 %v7007_v47, %s8017_s22  ;;  %5201 = vrot.lane.b32.xlu1 %v6850_v32, %s8018_s27 }
 0x3fa   : > { %5316 = vrot.lane.b32.xlu0 %v7013_v13, %s8031_s7  ;;  %5211 = vrot.lane.b32.xlu1 %v6824_v61, %s8013_s25  ;;  %v7035_v61 = vpop.permute.xlu1 %4996 }
 0x3fb   : > { %8035 = vst [vmem:[#allocation14_spill] sm:$0xff] %v7035_v61 }
 0x3fe   : > { %5331 = vrot.lane.b32.xlu0 %v7021_v39, %s8018_s27  ;;  %5216 = vrot.lane.b32.xlu1 %v6850_v32, %s8014_s23  ;;  %v2924_v32 = vrot.slane %v2628_v58, 2 }
 0x400   : > { %v2925_v51 = vsel %vm1389_vm15, %v2923_v35, %v2924_v32 }
 0x402   : > { %5346 = vrot.lane.b32.xlu0 %v7029_v3, %s8013_s25  ;;  %5226 = vrot.lane.b32.xlu1 %v6838_v22, %s8031_s7  ;;  %v2927_v22 = vsel %vm1389_vm15, %v2924_v32, %v2926_v48 }
 0x403   : > { %v7053_v21 = vpack.i.bf16 %v2927_v22, %v2925_v51  ;;  %v7098_v22 = vpack.i.bf16 %v2766_v43, %v2764_v41 }
 0x406   : > { %5351 = vrot.lane.b32.xlu0 %v7021_v39, %s8014_s23  ;;  %5241 = vrot.lane.b32.xlu1 %v6855_v4, %s8017_s22 }
 0x408   : > { %v5007_v30 = vpop.permute.xlu0 %5006  ;;  %v7047_v38 = vpop.permute.xlu1 %5001 }
 0x409   : > { %v5009_v60 = vunpack.i.h.bf16 %v5007_v30 }
 0x40a   : > { %5366 = vrot.lane.b32.xlu0 %v7043_v37, %s8019_s24  ;;  %5246 = vrot.lane.b32.xlu1 %v6857_v53, %s8016_s29 }
 0x40c   : > { %v7055_v58 = vpop.permute.xlu1 %5016  ;;  %v5012_v4 = vpop.permute.xlu0 %5011 }
 0x40d   : > { %v5014_v1 = vunpack.i.h.bf16 %v5012_v4  ;;  %v5013_v35 = vunpack.i.l.bf16 %v5012_v4 }
 0x40e   : > { %5381 = vrot.lane.b32.xlu0 %v7053_v21, %s8020_s21  ;;  %5251 = vrot.lane.b32.xlu1 %v6975_v10, %s8018_s27 }
 0x410   : > { %v7061_v0 = vpop.permute.xlu1 %5021  ;;  %v5037_v50 = vpop.permute.xlu0 %5036 }
 0x411   : > { %v5038_v34 = vunpack.i.l.bf16 %v5037_v50 }
 0x412   : > { %5391 = vrot.lane.b32.xlu0 %v7065_v16, %s8017_s22  ;;  %5256 = vrot.lane.b32.xlu1 %v6857_v53, %s8019_s24  ;;  %v5682_v53 = vld [vmem:[#allocation2 + $0x8] sm:$0xff] }
 0x413   : > { %v3657_v56 = vsel %vm871_vm3, %v5682_v53, %v4989_v27  ;;  %v3720_v27 = vsel %vm880_vm7, %v3688_v19, %v5013_v35  ;;  %v5008_v53 = vunpack.i.l.bf16 %v5007_v30 }
 0x414   : > { %v7071_v45 = vpop.permute.xlu1 %5026  ;;  %v5042_v46 = vpop.permute.xlu0 %5041  ;;  %v3689_v12 = vsel %vm687_vm1, %v3657_v56, %v4994_v28  ;;  %v5039_v28 = vunpack.i.h.bf16 %v5037_v50 }
 0x415   : > { %v3721_v4 = vsel %vm880_vm7, %v3689_v12, %v5014_v1  ;;  %v5044_v41 = vunpack.i.h.bf16 %v5042_v46  ;;  %v5043_v43 = vunpack.i.l.bf16 %v5042_v46 }
 0x416   : > { %5396 = vrot.lane.b32.xlu0 %v7075_v55, %s8031_s7  ;;  %5261 = vrot.lane.b32.xlu1 %v6975_v10, %s8020_s21 }
 0x418   : > { %v7086_v54 = vpop.permute.xlu1 %5031  ;;  %v5057_v5 = vpop.permute.xlu0 %5056 }
 0x419   : > { %v5059_v10 = vunpack.i.h.bf16 %v5057_v5  ;;  %v5058_v32 = vunpack.i.l.bf16 %v5057_v5 }
 0x41a   : > { %5411 = vrot.lane.b32.xlu0 %v6933_v42, %s8018_s27  ;;  %5276 = vrot.lane.b32.xlu1 %v6993_v23, %s8016_s29 }
 0x41b   : > { %v3753_v49 = vsel %vm885_vm8, %v3721_v4, %v5059_v10  ;;  %v3752_v8 = vsel %vm885_vm8, %v3720_v27, %v5058_v32 }
 0x41c   : > { %v5062_v48 = vpop.permute.xlu0 %5061  ;;  %v7096_v51 = vpop.permute.xlu1 %5046 }
 0x41d   : > { %v5064_v2 = vunpack.i.h.bf16 %v5062_v48  ;;  %v5063_v17 = vunpack.i.l.bf16 %v5062_v48 }
 0x41e   : > { %5426 = vrot.lane.b32.xlu0 %v7098_v22, %s8013_s25  ;;  %5281 = vrot.lane.b32.xlu1 %v7001_v36, %s8018_s27 }
 0x41f   : > { %v3784_v56 = vsel %vm890_vm9, %v3752_v8, %v5063_v17  ;;  %v3785_v9 = vsel %vm890_vm9, %v3753_v49, %v5064_v2  ;;  %v7147_v17 = vpack.i.bf16 %v6862_v18, %v6872_v25 }
 0x420   : > { %v3816_v5 = vsel %vm895_vm10, %v3784_v56, %v5008_v53  ;;  %v3817_v30 = vsel %vm895_vm10, %v3785_v9, %v5009_v60  ;;  %v7112_v1 = vpop.permute.xlu0 %5071  ;;  %v7114_v35 = vpop.permute.xlu1 %5051  ;;  %v5685_v53 = vld [vmem:[#allocation2 + $0x198] sm:$0xff]  ;;  %v7157_v56 = vpack.i.bf16 %v6879_v52, %v6892_v24  ;;  %v5018_v24 = vunpack.i.l.bf16 %v7055_v58 }
 0x421   : > { %v3848_v10 = vsel %vm900_vm11, %v3816_v5, %v5038_v34  ;;  %v3849_v50 = vsel %vm900_vm11, %v3817_v30, %v5039_v28  ;;  %v3454_v49 = vrot.slane %v5685_v53, 1  ;;  %v3555_v34 = vrot.slane %v5685_v53, 2 }
 0x422   : > { %5431 = vrot.lane.b32.xlu0 %v6933_v42, %s8014_s23  ;;  %5291 = vrot.lane.b32.xlu1 %v6993_v23, %s8013_s25  ;;  %v3880_v32 = vsel %vm905_vm12, %v3848_v10, %v5043_v43  ;;  %v3881_v19 = vsel %vm905_vm12, %v3849_v50, %v5044_v41  ;;  %v5019_v5 = vunpack.i.h.bf16 %v7055_v58  ;;  %v5023_v30 = vunpack.i.l.bf16 %v7061_v0 }
 0x423   : > { %v3912_v4 = vpack.c.bf16 %v3881_v19, %v3880_v32  ;;  %v5024_v50 = vunpack.i.h.bf16 %v7061_v0  ;;  %v5049_v32 = vunpack.i.h.bf16 %v7096_v51  ;;  %v5048_v19 = vunpack.i.l.bf16 %v7096_v51 }
 0x424   : > { %v7124_v12 = vpop.permute.xlu0 %5076  ;;  %v7126_v48 = vpop.permute.xlu1 %5066 }
 0x425   : > { %4763 = vmatprep.mubr.msk.bf16.mxu0 %vm962_vm13, %v3912_v4  ;;  %v5054_v4 = vunpack.i.h.bf16 %v7114_v35  ;;  %v5079_v53 = vunpack.i.h.bf16 %v7124_v12  ;;  %v5078_v51 = vunpack.i.l.bf16 %v7124_v12  ;;  %v3658_v12 = vsel %vm871_vm3, %v5689_v6, %v5048_v19 }
 0x426   : > { %5456 = vrot.lane.b32.xlu0 %v6939_v44, %s8019_s24  ;;  %5296 = vrot.lane.b32.xlu1 %v7001_v36, %s8014_s23  ;;  %v5684_v36 = vld [vmem:[#allocation2 + $0x1a0] sm:$0xff] }
 0x427   : > { %v3455_v60 = vrot.slane %v5684_v36, 1  ;;  %v3556_v28 = vrot.slane %v5684_v36, 2 }
 0x428   : > { %v7133_v23 = vpop.permute.xlu0 %5106  ;;  %v7135_v46 = vpop.permute.xlu1 %5081 }
 0x429   : > { %v7166_v9 = vsel %vm1340_vm14, %v3454_v49, %v3455_v60  ;;  %v7192_v36 = vsel %vm1389_vm15, %v3555_v34, %v3556_v28  ;;  %v5687_v49 = vld [vmem:[#allocation2 + $0x38] sm:$0xff] }
 0x42a   : > { %5461 = vrot.lane.b32.xlu0 %v6944_v40, %s8020_s21  ;;  %5306 = vrot.lane.b32.xlu1 %v7007_v47, %s8031_s7  ;;  %8036 = vst [vmem:[#allocation15_spill] sm:$0xff] %v7166_v9 }
 0x42c   : > { %v7141_v27 = vpop.permute.xlu0 %5111  ;;  %v7143_v2 = vpop.permute.xlu1 %5086 }
 0x42e   : > { %5471 = vrot.lane.b32.xlu0 %v7147_v17, %s8017_s22  ;;  %5321 = vrot.lane.b32.xlu1 %v7013_v13, %s8017_s22  ;;  %v2653_v13 = vld [vmem:[#allocation2 + $0x1a8] sm:$0x3] }
 0x42f   : > { %v3457_v52 = vrot.slane %v2653_v13, 1 }
 0x430   : > { %v5127_v8 = vpop.permute.xlu0 %5126  ;;  %v7153_v47 = vpop.permute.xlu1 %5091 }
 0x431   : > { %v7180_v10 = vsel %vm1340_vm14, %v3455_v60, %v3457_v52  ;;  %v5686_v60 = vld [vmem:[#allocation2 + $0x30] sm:$0xff]  ;;  %v3661_v52 = vsel %vm871_vm3, %v5687_v49, %v5019_v5  ;;  %v5129_v58 = vunpack.i.h.bf16 %v5127_v8  ;;  %v5128_v9 = vunpack.i.l.bf16 %v5127_v8 }
 0x432   : > { %5476 = vrot.lane.b32.xlu0 %v7157_v56, %s8031_s7  ;;  %5326 = vrot.lane.b32.xlu1 %v7029_v3, %s8016_s29  ;;  %8037 = vst [vmem:[#allocation16_spill] sm:$0xff] %v7180_v10  ;;  %v3660_v0 = vsel %vm871_vm3, %v5686_v60, %v5018_v24  ;;  %v5688_v24 = vld [vmem:[#allocation2 + $0x20] sm:$0xff]  ;;  %v5073_v49 = vunpack.i.l.bf16 %v7112_v1 }
 0x433   : > { %v3692_v61 = vsel %vm687_vm1, %v3660_v0, %v5023_v30  ;;  %v3659_v60 = vsel %vm871_vm3, %v5688_v24, %v5049_v32  ;;  %v5004_v0 = vunpack.i.h.bf16 %v7047_v38  ;;  %v5003_v32 = vunpack.i.l.bf16 %v7047_v38 }
 0x434   : > { %v5142_v18 = vpop.permute.xlu0 %5141  ;;  %v7163_v25 = vpop.permute.xlu1 %5096  ;;  %v3691_v30 = vsel %vm687_vm1, %v3659_v60, %v5054_v4 }
 0x435   : > { %v5144_v33 = vunpack.i.h.bf16 %v5142_v18 }
 0x436   : > { %5491 = vrot.lane.b32.xlu0 %v6955_v59, %s8018_s27  ;;  %5336 = vrot.lane.b32.xlu1 %v7029_v3, %s8019_s24  ;;  %v5053_v3 = vunpack.i.l.bf16 %v7114_v35  ;;  %v3558_v35 = vrot.slane %v2653_v13, 2  ;;  %v3693_v13 = vsel %vm687_vm1, %v3661_v52, %v5024_v50 }
 0x437   : > { %v3725_v6 = vsel %vm880_vm7, %v3693_v13, %v5079_v53  ;;  %v3723_v53 = vsel %vm880_vm7, %v3691_v30, %v5004_v0  ;;  %v5084_v13 = vunpack.i.h.bf16 %v7135_v46  ;;  %v5034_v30 = vunpack.i.h.bf16 %v7086_v54 }
 0x438   : > { %v7175_v41 = vpop.permute.xlu0 %5151  ;;  %v7177_v43 = vpop.permute.xlu1 %5101  ;;  %v3690_v5 = vsel %vm687_vm1, %v3658_v12, %v5053_v3  ;;  %v7213_v8 = vsel %vm1389_vm15, %v3556_v28, %v3558_v35  ;;  %v3757_v19 = vsel %vm885_vm8, %v3725_v6, %v5129_v58  ;;  %v5029_v35 = vunpack.i.h.bf16 %v7071_v45 }
 0x439   : > { %v5620_v28 = vpack.i.bf16 %v7213_v8, %v7192_v36  ;;  %v3722_v38 = vsel %vm880_vm7, %v3690_v5, %v5003_v32  ;;  %v5074_v58 = vunpack.i.h.bf16 %v7112_v1  ;;  %v5108_v1 = vunpack.i.l.bf16 %v7133_v23 }
 0x43a   : > { %5506 = vrot.lane.b32.xlu0 %v6953_v7, %s8013_s25  ;;  %5341 = vrot.lane.b32.xlu1 %v7021_v39, %s8020_s21  ;;  %v5143_v39 = vunpack.i.l.bf16 %v5142_v18  ;;  %v3724_v18 = vsel %vm880_vm7, %v3692_v61, %v5078_v51  ;;  %v3789_v51 = vsel %vm890_vm9, %v3757_v19, %v5144_v33  ;;  %v3755_v24 = vsel %vm885_vm8, %v3723_v53, %v5029_v35 }
 0x43b   : > { %v3756_v50 = vsel %vm885_vm8, %v3724_v18, %v5128_v9  ;;  %v5028_v9 = vunpack.i.l.bf16 %v7071_v45  ;;  %v3821_v60 = vsel %vm895_vm10, %v3789_v51, %v5074_v58  ;;  %v5083_v5 = vunpack.i.l.bf16 %v7135_v46 }
 0x43c   : > { %v7201_v34 = vpop.permute.xlu0 %5156  ;;  %v7203_v10 = vpop.permute.xlu1 %5116  ;;  %v3788_v61 = vsel %vm890_vm9, %v3756_v50, %v5143_v39  ;;  %v5109_v39 = vunpack.i.h.bf16 %v7133_v23  ;;  %v5033_v0 = vunpack.i.l.bf16 %v7086_v54  ;;  %v3787_v46 = vsel %vm890_vm9, %v3755_v24, %v5034_v30 }
 0x43d   : > { %v3754_v52 = vsel %vm885_vm8, %v3722_v38, %v5028_v9  ;;  %v3820_v33 = vsel %vm895_vm10, %v3788_v61, %v5073_v49  ;;  %v5114_v19 = vunpack.i.h.bf16 %v7141_v27  ;;  %v5113_v54 = vunpack.i.l.bf16 %v7141_v27 }
 0x43e   : > { %5511 = vrot.lane.b32.xlu0 %v6955_v59, %s8014_s23  ;;  %5356 = vrot.lane.b32.xlu1 %v7043_v37, %s8016_s29  ;;  %v3852_v18 = vsel %vm900_vm11, %v3820_v33, %v5108_v1  ;;  %v3853_v23 = vsel %vm900_vm11, %v3821_v60, %v5109_v39  ;;  %v3786_v50 = vsel %vm890_vm9, %v3754_v52, %v5033_v0  ;;  %v5089_v0 = vunpack.i.h.bf16 %v7143_v2 }
 0x43f   : > { %v3818_v61 = vsel %vm895_vm10, %v3786_v50, %v5083_v5  ;;  %v3819_v51 = vsel %vm895_vm10, %v3787_v46, %v5084_v13  ;;  %v3884_v49 = vsel %vm905_vm12, %v3852_v18, %v5113_v54  ;;  %v3885_v27 = vsel %vm905_vm12, %v3853_v23, %v5114_v19 }
 0x440   : > { %v7223_v4 = vpop.permute.xlu0 %5186  ;;  %v7225_v3 = vpop.permute.xlu1 %5121  ;;  %v5555_v39 = vpack.i.bf16 %v6912_v15, %v6920_v57  ;;  %v3914_v1 = vpack.c.bf16 %v3885_v27, %v3884_v49  ;;  %v5119_v18 = vunpack.i.h.bf16 %v7203_v10  ;;  %v5118_v23 = vunpack.i.l.bf16 %v7203_v10  ;;  %v5693_v49 = vld [vmem:[#allocation2 + $0x48] sm:$0xff] }
 0x441   : > { %v5159_v50 = vunpack.i.h.bf16 %v7201_v34  ;;  %v5124_v46 = vunpack.i.h.bf16 %v7225_v3  ;;  %v5123_v19 = vunpack.i.l.bf16 %v7225_v3 }
 0x442   : > { %5536 = vrot.lane.b32.xlu0 %v6957_v11, %s8019_s24  ;;  %5361 = vrot.lane.b32.xlu1 %v7053_v21, %s8018_s27  ;;  %v3662_v27 = vsel %vm871_vm3, %v5693_v49, %v5118_v23  ;;  %v5154_v23 = vunpack.i.h.bf16 %v7175_v41 }
 0x444   : > { %v7245_v12 = vpop.permute.xlu0 %5191  ;;  %v5132_v45 = vpop.permute.xlu1 %5131 }
 0x445   : > { %v5134_v32 = vunpack.i.h.bf16 %v5132_v45  ;;  %v5133_v6 = vunpack.i.l.bf16 %v5132_v45  ;;  %v5194_v49 = vunpack.i.h.bf16 %v7245_v12 }
 0x446   : > { %5541 = vrot.lane.b32.xlu0 %v6959_v31, %s8020_s21  ;;  %5371 = vrot.lane.b32.xlu1 %v7043_v37, %s8013_s25 }
 0x447   : > { %v3850_v9 = vsel %vm900_vm11, %v3818_v61, %v5133_v6  ;;  %v3851_v58 = vsel %vm900_vm11, %v3819_v51, %v5134_v32  ;;  %v5088_v32 = vunpack.i.l.bf16 %v7143_v2  ;;  %v5094_v6 = vunpack.i.h.bf16 %v7153_v47  ;;  %v5691_v51 = vld [vmem:[#allocation2 + $0x60] sm:$0xff] }
 0x448   : > { %v7263_v38 = vpop.permute.xlu0 %5206  ;;  %v5137_v53 = vpop.permute.xlu1 %5136 }
 0x449   : > { %v5139_v37 = vunpack.i.h.bf16 %v5137_v53  ;;  %v5138_v35 = vunpack.i.l.bf16 %v5137_v53  ;;  %v5209_v2 = vunpack.i.h.bf16 %v7263_v38  ;;  %v5690_v53 = vld [vmem:[#allocation2 + $0x68] sm:$0xff] }
 0x44a   : > { %5551 = vrot.lane.b32.xlu0 %v6961_v20, %s8017_s22  ;;  %5376 = vrot.lane.b32.xlu1 %v7053_v21, %s8014_s23  ;;  %v3665_v61 = vsel %vm871_vm3, %v5690_v53, %v5089_v0  ;;  %v5188_v53 = vunpack.i.l.bf16 %v7223_v4 }
 0x44b   : > { %v3882_v52 = vsel %vm905_vm12, %v3850_v9, %v5138_v35  ;;  %v3883_v24 = vsel %vm905_vm12, %v3851_v58, %v5139_v37  ;;  %v3697_v9 = vsel %vm687_vm1, %v3665_v61, %v5094_v6  ;;  %v5692_v58 = vld [vmem:[#allocation2 + $0x50] sm:$0xff] }
 0x44c   : > { %v3913_v33 = vpack.c.bf16 %v3883_v24, %v3882_v52  ;;  %v7277_v60 = vpop.permute.xlu0 %5221  ;;  %v7279_v45 = vpop.permute.xlu1 %5146  ;;  %v3729_v24 = vsel %vm880_vm7, %v3697_v9, %v5159_v50  ;;  %v5153_v50 = vunpack.i.l.bf16 %v7175_v41 }
 0x44d   : > { %v5224_v37 = vunpack.i.h.bf16 %v7277_v60  ;;  %v5223_v3 = vunpack.i.l.bf16 %v7277_v60  ;;  %v5069_v60 = vunpack.i.h.bf16 %v7126_v48 }
 0x44e   : > { %5556 = vrot.lane.b32.xlu0 %v5555_v39, %s8031_s7  ;;  %4764 = vmatmul.mubr.msk.bf16.vlgmr.msra.gmra.mxu0 %vm962_vm13, %v3913_v33  ;;  %v3694_v33 = vsel %vm687_vm1, %v3662_v27, %v5123_v19 }
 0x44f   : > { %5386 = vrot.lane.b32.xlu1 %v7065_v16, %s8031_s7  ;;  %4767 = vmatprep.mubr.msk.bf16.mxu0 %vm962_vm13, %v3914_v1  ;;  %v5068_v1 = vunpack.i.l.bf16 %v7126_v48  ;;  %v5099_v48 = vunpack.i.h.bf16 %v7163_v25 }
 0x450   : > { %v7288_v13 = vpop.permute.xlu1 %5161  ;;  %v7290_v21 = vpop.permute.xlu0 %5231 }
 0x452   : > { %5576 = vrot.lane.b32.xlu0 %v6963_v62, %s8013_s25 }
 0x453   : > { %5401 = vrot.lane.b32.xlu1 %v7075_v55, %s8017_s22 }
 0x454   : > { %v7296_v15 = vpop.permute.xlu1 %5166  ;;  %v7302_v57 = vpop.permute.xlu0 %5236 }
 0x456   : > { %5581 = vrot.lane.b32.xlu0 %v6978_v14, %s8016_s29 }
 0x457   : > { %5406 = vrot.lane.b32.xlu1 %v7098_v22, %s8016_s29 }
 0x458   : > { %v7304_v16 = vpop.permute.xlu1 %5171  ;;  %v7312_v55 = vpop.permute.xlu0 %5266 }
 0x45a   : > { %5606 = vrot.lane.b32.xlu0 %v6978_v14, %s8019_s24 }
 0x45b   : > { %5416 = vrot.lane.b32.xlu1 %v7098_v22, %s8019_s24  ;;  %v5093_v22 = vunpack.i.l.bf16 %v7153_v47  ;;  %v5208_v47 = vunpack.i.l.bf16 %v7263_v38  ;;  %v3663_v38 = vsel %vm871_vm3, %v5692_v58, %v5119_v18 }
 0x45c   : > { %v7310_v5 = vpop.permute.xlu1 %5176  ;;  %v7336_v54 = vpop.permute.xlu0 %5271  ;;  %v3695_v39 = vsel %vm687_vm1, %v3663_v38, %v5124_v46 }
 0x45d   : > { %v3727_v46 = vsel %vm880_vm7, %v3695_v39, %v5069_v60 }
 0x45e   : > { %5611 = vrot.lane.b32.xlu0 %v6967_v26, %s8020_s21 }
 0x45f   : > { %5421 = vrot.lane.b32.xlu1 %v6933_v42, %s8020_s21  ;;  %v5158_v42 = vunpack.i.l.bf16 %v7201_v34  ;;  %v3664_v34 = vsel %vm871_vm3, %v5691_v51, %v5088_v32  ;;  %v3761_v32 = vsel %vm885_vm8, %v3729_v24, %v5209_v2  ;;  %v5098_v2 = vunpack.i.l.bf16 %v7163_v25 }
 0x460   : > { %v7318_v30 = vpop.permute.xlu1 %5181  ;;  %v3696_v35 = vsel %vm687_vm1, %v3664_v34, %v5093_v22  ;;  %v3793_v18 = vsel %vm890_vm9, %v3761_v32, %v5224_v37  ;;  %v7366_v19 = vpop.permute.xlu0 %5286  ;;  %v5164_v34 = vunpack.i.h.bf16 %v7288_v13  ;;  %v5163_v37 = vunpack.i.l.bf16 %v7288_v13 }
 0x461   : > { %v3728_v52 = vsel %vm880_vm7, %v3696_v35, %v5158_v42  ;;  %v3726_v42 = vsel %vm880_vm7, %v3694_v33, %v5068_v1  ;;  %v3825_v41 = vsel %vm895_vm10, %v3793_v18, %v5154_v23  ;;  %v3759_v25 = vsel %vm885_vm8, %v3727_v46, %v5099_v48 }
 0x462   : > { %5616 = vrot.lane.b32.xlu0 %v6965_v63, %s8014_s23  ;;  %v3760_v0 = vsel %vm885_vm8, %v3728_v52, %v5208_v47  ;;  %v5189_v47 = vunpack.i.h.bf16 %v7223_v4  ;;  %v5104_v35 = vunpack.i.h.bf16 %v7177_v43  ;;  %v5193_v13 = vunpack.i.l.bf16 %v7245_v12 }
 0x463   : > { %5436 = vrot.lane.b32.xlu1 %v6939_v44, %s8016_s29  ;;  %v3792_v22 = vsel %vm890_vm9, %v3760_v0, %v5223_v3  ;;  %v3758_v3 = vsel %vm885_vm8, %v3726_v42, %v5098_v2  ;;  %v4409_v2 = vld [vmem:[%s7978_s14] ss:$0 sm:$0xff] }
 0x464   : > { %v7338_v10 = vpop.permute.xlu1 %5196  ;;  %v3824_v61 = vsel %vm895_vm10, %v3792_v22, %v5153_v50  ;;  %v3857_v38 = vsel %vm900_vm11, %v3825_v41, %v5189_v47  ;;  %v3791_v52 = vsel %vm890_vm9, %v3759_v25, %v5104_v35  ;;  %v7390_v24 = vpop.permute.xlu0 %5301  ;;  %v5168_v25 = vunpack.i.l.bf16 %v7296_v15 }
 0x465   : > { %v3856_v4 = vsel %vm900_vm11, %v3824_v61, %v5188_v53  ;;  %v3823_v39 = vsel %vm895_vm10, %v3791_v52, %v5164_v34  ;;  %v3889_v12 = vsel %vm905_vm12, %v3857_v38, %v5194_v49  ;;  %v1005_v53 = vadd.f32 %v4409_v2, %v6364_v29  ;;  %v8038_v61 = vld [vmem:[#allocation5_spill] sm:$0xff] }
 0x466   : > { %v3888_v32 = vsel %vm905_vm12, %v3856_v4, %v5193_v13  ;;  %v1008_v41 = vadd.f32 %v4409_v2, %v8038_v61  ;;  %v7436_v29 = vld [vmem:[%s7974_s10] ss:$0 sm:$0xff]  ;;  %v5239_v38 = vunpack.i.h.bf16 %v7302_v57  ;;  %v5238_v49 = vunpack.i.l.bf16 %v7302_v57 }
 0x467   : > { %5441 = vrot.lane.b32.xlu1 %v6944_v40, %s8018_s27  ;;  %v3916_v42 = vpack.c.bf16 %v3889_v12, %v3888_v32  ;;  %v5199_v13 = vunpack.i.h.bf16 %v7338_v10  ;;  %v5304_v12 = vunpack.i.h.bf16 %v7390_v24 }
 0x468   : > { %v7358_v6 = vpop.permute.xlu1 %5201  ;;  %v7404_v46 = vpop.permute.xlu0 %5311 }
 0x46b   : > { %5446 = vrot.lane.b32.xlu1 %v6939_v44, %s8013_s25  ;;  %v5103_v44 = vunpack.i.l.bf16 %v7177_v43 }
 0x46c   : > { %v5212_v51 = vpop.permute.xlu1 %5211 }
 0x46d   : > { %v5214_v9 = vunpack.i.h.bf16 %v5212_v51  ;;  %v5213_v58 = vunpack.i.l.bf16 %v5212_v51  ;;  %v3790_v27 = vsel %vm890_vm9, %v3758_v3, %v5103_v44  ;;  %v5169_v3 = vunpack.i.h.bf16 %v7296_v15 }
 0x46e   : > { %v3822_v33 = vsel %vm895_vm10, %v3790_v27, %v5163_v37  ;;  %v8039_v37 = vld [vmem:[#allocation7_spill] sm:$0xff]  ;;  %v5174_v44 = vunpack.i.h.bf16 %v7304_v16  ;;  %v5198_v15 = vunpack.i.l.bf16 %v7338_v10  ;;  %v5694_v27 = vld [vmem:[#allocation2 + $0x98] sm:$0xff] }
 0x46f   : > { %5451 = vrot.lane.b32.xlu1 %v6944_v40, %s8014_s23  ;;  %v3854_v1 = vsel %vm900_vm11, %v3822_v33, %v5213_v58  ;;  %v3855_v0 = vsel %vm900_vm11, %v3823_v39, %v5214_v9  ;;  %v5173_v9 = vunpack.i.l.bf16 %v7304_v16  ;;  %v8040_v58 = vld [vmem:[#allocation9_spill] sm:$0xff]  ;;  %v3669_v52 = vsel %vm871_vm3, %v5694_v27, %v5169_v3 }
 0x470   : > { %v5217_v43 = vpop.permute.xlu1 %5216  ;;  %v1762_v4 = vadd.f32 %v7436_v29, %v8040_v58  ;;  %v5204_v33 = vunpack.i.h.bf16 %v7358_v6  ;;  %v5203_v39 = vunpack.i.l.bf16 %v7358_v6  ;;  %v3701_v10 = vsel %vm687_vm1, %v3669_v52, %v5174_v44 }
 0x471   : > { %v5219_v40 = vunpack.i.h.bf16 %v5217_v43  ;;  %v5218_v60 = vunpack.i.l.bf16 %v5217_v43  ;;  %v5695_v43 = vld [vmem:[#allocation2 + $0x90] sm:$0xff]  ;;  %v5149_v6 = vunpack.i.h.bf16 %v7279_v45  ;;  %v5233_v3 = vunpack.i.l.bf16 %v7290_v21 }
 0x472   : > { %v3668_v16 = vsel %vm871_vm3, %v5695_v43, %v5168_v25  ;;  %v5268_v27 = vunpack.i.l.bf16 %v7312_v55  ;;  %v5179_v52 = vunpack.i.h.bf16 %v7310_v5  ;;  %v5178_v43 = vunpack.i.l.bf16 %v7310_v5 }
 0x473   : > { %v3886_v22 = vsel %vm905_vm12, %v3854_v1, %v5218_v60  ;;  %v3887_v18 = vsel %vm905_vm12, %v3855_v0, %v5219_v40  ;;  %5466 = vrot.lane.b32.xlu1 %v7147_v17, %s8031_s7  ;;  %v7417_v17 = vpop.permute.xlu0 %5316  ;;  %v3700_v57 = vsel %vm687_vm1, %v3668_v16, %v5173_v9  ;;  %v5289_v60 = vunpack.i.h.bf16 %v7366_v19  ;;  %v8041_v0 = vld [vmem:[#allocation6_spill] sm:$0xff] }
 0x474   : > { %v3915_v23 = vpack.c.bf16 %v3887_v18, %v3886_v22  ;;  %v7402_v50 = vpop.permute.xlu1 %5226  ;;  %v5288_v1 = vunpack.i.l.bf16 %v7366_v19  ;;  %v1767_v32 = vadd.f32 %v8041_v0, %v7436_v29  ;;  %v5303_v22 = vunpack.i.l.bf16 %v7390_v24 }
 0x475   : > { %v3732_v19 = vsel %vm880_vm7, %v3700_v57, %v5238_v49  ;;  %v5273_v57 = vunpack.i.l.bf16 %v7336_v54  ;;  %v5184_v0 = vunpack.i.h.bf16 %v7318_v30 }
 0x476   : > { %4768 = vmatmul.mubr.msk.bf16.gmra.mxu0 %vm962_vm13, %v3915_v23  ;;  %v5148_v23 = vunpack.i.l.bf16 %v7279_v45  ;;  %v5234_v45 = vunpack.i.h.bf16 %v7290_v21  ;;  %v3764_v25 = vsel %vm885_vm8, %v3732_v19, %v5288_v1  ;;  %v5269_v21 = vunpack.i.h.bf16 %v7312_v55 }
 0x477   : > { %5481 = vrot.lane.b32.xlu1 %v7157_v56, %s8017_s22  ;;  %4771 = vmatprep.mubr.msk.bf16.mxu0 %vm962_vm13, %v3916_v42  ;;  %v7427_v51 = vpop.permute.xlu0 %5331  ;;  %v5696_v42 = vld [vmem:[#allocation2 + $0x80] sm:$0xff]  ;;  %v3796_v58 = vsel %vm890_vm9, %v3764_v25, %v5303_v22 }
 0x478   : > { %v7410_v48 = vpop.permute.xlu1 %5241  ;;  %v3667_v2 = vsel %vm871_vm3, %v5696_v42, %v5199_v13 }
 0x479   : > { %v5243_v55 = vunpack.i.l.bf16 %v7410_v48 }
 0x47b   : > { %5486 = vrot.lane.b32.xlu1 %v6953_v7, %s8016_s29  ;;  %v7444_v35 = vpop.permute.xlu0 %5346 }
 0x47c   : > { %v7419_v47 = vpop.permute.xlu1 %5246 }
 0x47f   : > { %5496 = vrot.lane.b32.xlu1 %v6953_v7, %s8019_s24  ;;  %v1759_v7 = vadd.f32 %v7436_v29, %v8039_v37  ;;  %v7472_v18 = vpop.permute.xlu0 %5351  ;;  %v3699_v37 = vsel %vm687_vm1, %v3667_v2, %v5204_v33 }
 0x480   : > { %1011 = vxpose.xlu0.b32.start [1/2] (short) (narrow) %v1005_v53, 8  ;;  %v7424_v56 = vpop.permute.xlu1 %5251  ;;  %v5697_v53 = vld [vmem:[#allocation2 + $0x78] sm:$0xff] }
 0x481   : > { %v3666_v61 = vsel %vm871_vm3, %v5697_v53, %v5198_v15  ;;  %v3731_v15 = vsel %vm880_vm7, %v3699_v37, %v5149_v6 }
 0x482   : > { %v3698_v24 = vsel %vm687_vm1, %v3666_v61, %v5203_v39  ;;  %v5274_v39 = vunpack.i.h.bf16 %v7336_v54  ;;  %v3763_v5 = vsel %vm885_vm8, %v3731_v15, %v5179_v52  ;;  %v7524_v61 = vld [vmem:[#allocation2 + $0x170] sm:$0xff]  ;;  %v8046_v52 = vld [vmem:[#allocation12_spill] sm:$0xff] }
 0x483   : > { %5501 = vrot.lane.b32.xlu1 %v6955_v59, %s8020_s21  ;;  %v3730_v13 = vsel %vm880_vm7, %v3698_v24, %v5148_v23  ;;  %v7504_v16 = vpop.permute.xlu0 %5366  ;;  %v8044_v23 = vld [vmem:[#allocation13_spill] sm:$0xff]  ;;  %v3795_v2 = vsel %vm890_vm9, %v3763_v5, %v5184_v0 }
 0x484   : > { %1012 = vxpose.xlu0.b32.end [2/2] (short) (narrow) %v1008_v41, 8  ;;  %v7431_v34 = vpop.permute.xlu1 %5256  ;;  %v3733_v41 = vsel %vm880_vm7, %v3701_v10, %v5239_v38  ;;  %v8043_v38 = vld [vmem:[#allocation11_spill] sm:$0xff]  ;;  %v3828_v10 = vsel %vm895_vm10, %v3796_v58, %v5233_v3  ;;  %v3762_v1 = vsel %vm885_vm8, %v3730_v13, %v5178_v43  ;;  %v1786_v43 = vadd.f32 %v8046_v52, %v7436_v29  ;;  %v5701_v5 = vld [vmem:[#allocation2 + $0xc0] sm:$0xff] }
 0x485   : > { %v3765_v44 = vsel %vm885_vm8, %v3733_v41, %v5289_v60  ;;  %v1775_v49 = vadd.f32 %v7436_v29, %v8043_v38  ;;  %v5244_v60 = vunpack.i.h.bf16 %v7410_v48  ;;  %v3860_v54 = vsel %vm900_vm11, %v3828_v10, %v5268_v27 }
 0x486   : > { %v1778_v48 = vadd.f32 %v7436_v29, %v8044_v23  ;;  %v5254_v10 = vunpack.i.h.bf16 %v7424_v56 }
 0x487   : > { %5516 = vrot.lane.b32.xlu1 %v6957_v11, %s8016_s29  ;;  %v3827_v41 = vsel %vm895_vm10, %v3795_v2, %v5244_v60  ;;  %v7532_v24 = vpop.permute.xlu0 %5381  ;;  %v5318_v60 = vunpack.i.l.bf16 %v7417_v17 }
 0x488   : > { %1789 = vxpose.xlu0.b32.start [1/8] (short) (narrow) %v1759_v7, 8  ;;  %v7446_v59 = vpop.permute.xlu1 %5261 }
 0x48b   : > { %5521 = vrot.lane.b32.xlu1 %v6959_v31, %s8018_s27 }
 0x48c   : > { %1790 = vxpose.xlu0.b32.cont [2/8] (short) (narrow) %v1762_v4, 8  ;;  %v7462_v40 = vpop.permute.xlu1 %5276  ;;  %v3797_v4 = vsel %vm890_vm9, %v3765_v44, %v5304_v12  ;;  %v3892_v44 = vsel %vm905_vm12, %v3860_v54, %v5273_v57  ;;  %v5248_v57 = vunpack.i.l.bf16 %v7419_v47 }
 0x48d   : > { %v5278_v54 = vunpack.i.l.bf16 %v7462_v40 }
 0x48e   : > { %v3672_v0 = vsel %vm871_vm3, %v5701_v5, %v5248_v57  ;;  %v5258_v57 = vunpack.i.l.bf16 %v7431_v34  ;;  %v5263_v5 = vunpack.i.l.bf16 %v7446_v59 }
 0x48f   : > { %5526 = vrot.lane.b32.xlu1 %v6957_v11, %s8013_s25  ;;  %v8042_v11 = vld [vmem:[#allocation8_spill] sm:$0xff] }
 0x490   : > { %1791 = vxpose.xlu0.b32.cont [3/8] (short) (narrow) %v1767_v32, 8  ;;  %v7484_v7 = vpop.permute.xlu1 %5281  ;;  %v1770_v9 = vadd.f32 %v8042_v11, %v7436_v29  ;;  %v5183_v32 = vunpack.i.l.bf16 %v7318_v30  ;;  %v7526_v30 = vld [vmem:[#allocation2 + $0x168] sm:$0xff] }
 0x492   : > { %v3794_v42 = vsel %vm890_vm9, %v3762_v1, %v5183_v32 }
 0x493   : > { %5531 = vrot.lane.b32.xlu1 %v6959_v31, %s8014_s23  ;;  %v3829_v31 = vsel %vm895_vm10, %v3797_v4, %v5234_v45  ;;  %v3826_v19 = vsel %vm895_vm10, %v3794_v42, %v5243_v55  ;;  %v5700_v55 = vld [vmem:[#allocation2 + $0xc8] sm:$0xff]  ;;  %v5283_v42 = vunpack.i.l.bf16 %v7484_v7 }
 0x494   : > { %1792 = vxpose.xlu0.b32.cont [4/8] (short) (narrow) %v1770_v9, 8  ;;  %v5292_v33 = vpop.permute.xlu1 %5291  ;;  %v3861_v6 = vsel %vm900_vm11, %v3829_v31, %v5269_v21  ;;  %v7548_v21 = vpop.permute.xlu0 %5391  ;;  %v5253_v31 = vunpack.i.l.bf16 %v7424_v56 }
 0x495   : > { %v5294_v12 = vunpack.i.h.bf16 %v5292_v33  ;;  %v5293_v22 = vunpack.i.l.bf16 %v5292_v33  ;;  %v3893_v11 = vsel %vm905_vm12, %v3861_v6, %v5274_v39 }
 0x496   : > { %v3918_v15 = vpack.c.bf16 %v3893_v11, %v3892_v44  ;;  %v3704_v32 = vsel %vm687_vm1, %v3672_v0, %v5253_v31  ;;  %v5314_v11 = vunpack.i.h.bf16 %v7404_v46  ;;  %v5354_v31 = vunpack.i.h.bf16 %v7472_v18 }
 0x497   : > { %5546 = vrot.lane.b32.xlu1 %v6961_v20, %s8031_s7  ;;  %v5560_v20 = vpack.i.bf16 %v7524_v61, %v7526_v30  ;;  %v3858_v3 = vsel %vm900_vm11, %v3826_v19, %v5293_v22  ;;  %v3859_v25 = vsel %vm900_vm11, %v3827_v41, %v5294_v12  ;;  %v5368_v22 = vunpack.i.l.bf16 %v7504_v16  ;;  %v5702_v19 = vld [vmem:[#allocation2 + $0xb0] sm:$0xff]  ;;  %s659_s7 = scalar_lea.vmem %s7982_s18, %s5852_s1 }
 0x498   : > { %1793 = vxpose.xlu0.b32.cont [5/8] (short) (narrow) %v1775_v49, 8  ;;  %v5297_v53 = vpop.permute.xlu1 %5296  ;;  %v8045_v49 = vld [vmem:[#allocation10_spill] sm:$0xff]  ;;  %v7559_v39 = vpop.permute.xlu0 %5396  ;;  %v3736_v6 = vsel %vm880_vm7, %v3704_v32, %v5318_v60 }
 0x499   : > { %v5299_v37 = vunpack.i.h.bf16 %v5297_v53  ;;  %v5298_v45 = vunpack.i.l.bf16 %v5297_v53  ;;  %v1783_v13 = vadd.f32 %v8045_v49, %v7436_v29  ;;  %v5384_v53 = vunpack.i.h.bf16 %v7532_v24 }
 0x49b   : > { %5561 = vrot.lane.b32.xlu1 %v5560_v20, %s8017_s22  ;;  %v3890_v9 = vsel %vm905_vm12, %v3858_v3, %v5298_v45  ;;  %v3891_v58 = vsel %vm905_vm12, %v3859_v25, %v5299_v37  ;;  %v5703_v37 = vld [vmem:[#allocation2 + $0xa8] sm:$0xff]  ;;  %v8048_v3 = vld [vmem:[#allocation15_spill] sm:$0xff] }
 0x49c   : > { %1794 = vxpose.xlu0.b32.cont [6/8] (short) (narrow) %v1778_v48, 8  ;;  %v3917_v4 = vpack.c.bf16 %v3891_v58, %v3890_v9  ;;  %v7541_v38 = vpop.permute.xlu1 %5306  ;;  %v5284_v48 = vunpack.i.h.bf16 %v7484_v7  ;;  %v3670_v45 = vsel %vm871_vm3, %v5703_v37, %v5278_v54  ;;  %v8047_v7 = vld [vmem:[#allocation16_spill] sm:$0xff]  ;;  %v5313_v9 = vunpack.i.l.bf16 %v7404_v46 }
 0x49d   : > { %v8049_v25 = vpack.i.bf16 %v8047_v7, %v8048_v3  ;;  %v3702_v44 = vsel %vm687_vm1, %v3670_v45, %v5283_v42  ;;  %v5229_v58 = vunpack.i.h.bf16 %v7402_v50  ;;  %v5349_v46 = vunpack.i.h.bf16 %v7444_v35 }
 0x49e   : > { %4772 = vmatmul.mubr.msk.bf16.gmra.mxu0 %vm962_vm13, %v3917_v4  ;;  %v5228_v4 = vunpack.i.l.bf16 %v7402_v50  ;;  %v5259_v50 = vunpack.i.h.bf16 %v7431_v34  ;;  %v5264_v34 = vunpack.i.h.bf16 %v7446_v59 }
 0x49f   : > { %5566 = vrot.lane.b32.xlu1 %v6963_v62, %s8019_s24  ;;  %4775 = vmatprep.mubr.msk.bf16.mxu0 %vm962_vm13, %v3918_v15  ;;  %v5249_v62 = vunpack.i.h.bf16 %v7419_v47  ;;  %v7575_v47 = vpop.permute.xlu0 %5411 }
 0x4a0   : > { %1795 = vxpose.xlu0.b32.cont [7/8] (short) (narrow) %v1783_v13, 8  ;;  %v7551_v27 = vpop.permute.xlu1 %5321  ;;  %v3734_v52 = vsel %vm880_vm7, %v3702_v44, %v5228_v4  ;;  %v5705_v4 = vld [vmem:[#allocation2 + $0xf0] sm:$0xff] }
 0x4a1   : > { %v3673_v1 = vsel %vm871_vm3, %v5700_v55, %v5249_v62  ;;  %v5348_v62 = vunpack.i.l.bf16 %v7444_v35  ;;  %v5324_v8 = vunpack.i.h.bf16 %v7551_v27  ;;  %v3766_v35 = vsel %vm885_vm8, %v3734_v52, %v5258_v57 }
 0x4a2   : > { %v3705_v56 = vsel %vm687_vm1, %v3673_v1, %v5254_v10  ;;  %v5333_v52 = vunpack.i.l.bf16 %v7427_v51  ;;  %v5398_v57 = vunpack.i.l.bf16 %v7559_v39 }
 0x4a3   : > { %5571 = vrot.lane.b32.xlu1 %v6965_v63, %s8020_s21  ;;  %v5319_v63 = vunpack.i.h.bf16 %v7417_v17  ;;  %v5279_v17 = vunpack.i.h.bf16 %v7462_v40  ;;  %v7595_v20 = vpop.permute.xlu0 %5426  ;;  %v3768_v40 = vsel %vm885_vm8, %v3736_v6, %v5368_v22 }
 0x4a4   : > { %1796 = vxpose.xlu0.b32.end [8/8] (short) (narrow) %v1786_v43, 8  ;;  %v7557_v33 = vpop.permute.xlu1 %5326 }
 0x4a5   : > { %v3737_v23 = vsel %vm880_vm7, %v3705_v56, %v5319_v63  ;;  %v3671_v41 = vsel %vm871_vm3, %v5702_v19, %v5279_v17  ;;  %v5353_v63 = vunpack.i.l.bf16 %v7472_v18  ;;  %v5329_v44 = vunpack.i.h.bf16 %v7557_v33 }
 0x4a7   : > { %5586 = vrot.lane.b32.xlu1 %v6967_v26, %s8018_s27  ;;  %v7625_v10 = vpop.permute.xlu0 %5431  ;;  %s663_s27 = scalar_lea.vmem %s7983_s19, %s5852_s1  ;;  %s4535_s1 = sshll.u32 %s8052_s30, 4 }
 0x4a8   : > { %v7567_v29 = vpop.permute.xlu1 %5336  ;;  %s7947_s28 = scalar_lea.vmem %s7981_s17, %s4535_s1 }
 0x4ab   : > { %5591 = vrot.lane.b32.xlu1 %v6978_v14, %s8013_s25  ;;  %v5369_v14 = vunpack.i.h.bf16 %v7504_v16  ;;  %v5383_v16 = vunpack.i.l.bf16 %v7532_v24  ;;  %v3703_v24 = vsel %vm687_vm1, %v3671_v41, %v5284_v48 }
 0x4ac   : > { %v7579_v12 = vpop.permute.xlu1 %5341  ;;  %v3735_v43 = vsel %vm880_vm7, %v3703_v24, %v5229_v58  ;;  %v5328_v24 = vunpack.i.l.bf16 %v7557_v33  ;;  %v5399_v33 = vunpack.i.h.bf16 %v7559_v39 }
 0x4ad   : > { %v3800_v13 = vsel %vm890_vm9, %v3768_v40, %v5383_v16  ;;  %v3767_v1 = vsel %vm885_vm8, %v3735_v43, %v5259_v50 }
 0x4ae   : > { %v3832_v55 = vsel %vm895_vm10, %v3800_v13, %v5313_v9  ;;  %v3799_v22 = vsel %vm890_vm9, %v3767_v1, %v5264_v34  ;;  %v5704_v9 = vld [vmem:[#allocation2 + $0xf8] sm:$0xff]  ;;  %v3676_v13 = vsel %vm871_vm3, %v5705_v4, %v5328_v24 }
 0x4af   : > { %5596 = vrot.lane.b32.xlu1 %v6967_v26, %s8014_s23  ;;  %v3769_v26 = vsel %vm885_vm8, %v3737_v23, %v5369_v14  ;;  %v3864_v18 = vsel %vm900_vm11, %v3832_v55, %v5348_v62  ;;  %v3798_v14 = vsel %vm890_vm9, %v3766_v35, %v5263_v5  ;;  %v3831_v6 = vsel %vm895_vm10, %v3799_v22, %v5324_v8  ;;  %v5706_v5 = vld [vmem:[#allocation2 + $0xe0] sm:$0xff] }
 0x4b0   : > { %v7591_v2 = vpop.permute.xlu1 %5356  ;;  %v3801_v15 = vsel %vm890_vm9, %v3769_v26, %v5384_v53  ;;  %v3896_v53 = vsel %vm905_vm12, %v3864_v18, %v5353_v63  ;;  %v3677_v58 = vsel %vm871_vm3, %v5704_v9, %v5329_v44  ;;  %v3708_v62 = vsel %vm687_vm1, %v3676_v13, %v5333_v52 }
 0x4b1   : > { %v3833_v36 = vsel %vm895_vm10, %v3801_v15, %v5314_v11  ;;  %v5334_v15 = vunpack.i.h.bf16 %v7427_v51  ;;  %v5358_v63 = vunpack.i.l.bf16 %v7591_v2  ;;  %v3740_v51 = vsel %vm880_vm7, %v3708_v62, %v5398_v57 }
 0x4b2   : > { %v3865_v56 = vsel %vm900_vm11, %v3833_v36, %v5349_v46  ;;  %v5309_v22 = vunpack.i.h.bf16 %v7541_v38  ;;  %v5434_v52 = vunpack.i.h.bf16 %v7625_v10 }
 0x4b3   : > { %5601 = vrot.lane.b32.xlu1 %v8049_v25, %s8013_s25  ;;  %v3897_v16 = vsel %vm905_vm12, %v3865_v56, %v5354_v31  ;;  %v3709_v46 = vsel %vm687_vm1, %v3677_v58, %v5334_v15  ;;  %v5359_v31 = vunpack.i.h.bf16 %v7591_v2  ;;  %v5343_v58 = vunpack.i.l.bf16 %v7579_v12 }
 0x4b4   : > { %v7611_v49 = vpop.permute.xlu1 %5361  ;;  %v3920_v37 = vpack.c.bf16 %v3897_v16, %v3896_v53  ;;  %v5339_v53 = vunpack.i.h.bf16 %v7567_v29  ;;  %v5338_v16 = vunpack.i.l.bf16 %v7567_v29  ;;  %v5344_v29 = vunpack.i.h.bf16 %v7579_v12 }
 0x4b5   : > { %v5364_v55 = vunpack.i.h.bf16 %v7611_v49  ;;  %v5363_v36 = vunpack.i.l.bf16 %v7611_v49  ;;  %v3675_v2 = vsel %vm871_vm3, %v5706_v5, %v5359_v31 }
 0x4b7   : > { %5621 = vrot.lane.b32.xlu1 %v5620_v28, %s8014_s23  ;;  %v5323_v28 = vunpack.i.l.bf16 %v7551_v27  ;;  %v5457_v27 = vpop.permute.xlu0 %5456 }
 0x4b8   : > { %v5372_v60 = vpop.permute.xlu1 %5371  ;;  %v5459_v8 = vunpack.i.h.bf16 %v5457_v27 }
 0x4b9   : > { %v5374_v0 = vunpack.i.h.bf16 %v5372_v60  ;;  %v5373_v32 = vunpack.i.l.bf16 %v5372_v60  ;;  %v3830_v54 = vsel %vm895_vm10, %v3798_v14, %v5323_v28  ;;  %v3741_v60 = vsel %vm880_vm7, %v3709_v46, %v5399_v33 }
 0x4ba   : > { %v5458_v28 = vunpack.i.l.bf16 %v5457_v27  ;;  %v3773_v39 = vsel %vm885_vm8, %v3741_v60, %v5459_v8  ;;  %v3707_v14 = vsel %vm687_vm1, %v3675_v2, %v5364_v55  ;;  %v5433_v46 = vunpack.i.l.bf16 %v7625_v10 }
 0x4bb   : > { %v3862_v59 = vsel %vm900_vm11, %v3830_v54, %v5373_v32  ;;  %v3863_v42 = vsel %vm900_vm11, %v3831_v6, %v5374_v0  ;;  %v5462_v45 = vpop.permute.xlu0 %5461  ;;  %v5707_v0 = vld [vmem:[#allocation2 + $0xd8] sm:$0xff] }
 0x4bc   : > { %v5377_v17 = vpop.permute.xlu1 %5376  ;;  %v3772_v34 = vsel %vm885_vm8, %v3740_v51, %v5458_v28  ;;  %v3674_v32 = vsel %vm871_vm3, %v5707_v0, %v5358_v63  ;;  %v5464_v18 = vunpack.i.h.bf16 %v5462_v45  ;;  %v5463_v56 = vunpack.i.l.bf16 %v5462_v45 }
 0x4bd   : > { %v5379_v23 = vunpack.i.h.bf16 %v5377_v17  ;;  %v5378_v48 = vunpack.i.l.bf16 %v5377_v17  ;;  %v3706_v49 = vsel %vm687_vm1, %v3674_v32, %v5363_v36  ;;  %v5308_v17 = vunpack.i.l.bf16 %v7541_v38 }
 0x4be   : > { %v3804_v54 = vsel %vm890_vm9, %v3772_v34, %v5463_v56  ;;  %v3805_v6 = vsel %vm890_vm9, %v3773_v39, %v5464_v18  ;;  %v5429_v38 = vunpack.i.h.bf16 %v7595_v20 }
 0x4bf   : > { %v3894_v40 = vsel %vm905_vm12, %v3862_v59, %v5378_v48  ;;  %v3895_v26 = vsel %vm905_vm12, %v3863_v42, %v5379_v23  ;;  %v7657_v25 = vpop.permute.xlu0 %5471  ;;  %v5394_v23 = vunpack.i.h.bf16 %v7548_v21  ;;  %v5393_v48 = vunpack.i.l.bf16 %v7548_v21 }
 0x4c0   : > { %v3919_v19 = vpack.c.bf16 %v3895_v26, %v3894_v40  ;;  %v3738_v59 = vsel %vm880_vm7, %v3706_v49, %v5308_v17  ;;  %v3739_v42 = vsel %vm880_vm7, %v3707_v14, %v5309_v22  ;;  %v5428_v26 = vunpack.i.l.bf16 %v7595_v20  ;;  %v5708_v22 = vld [vmem:[#allocation2 + $0x128] sm:$0xff] }
 0x4c1   : > { %v7649_v41 = vpop.permute.xlu1 %5386  ;;  %v3837_v45 = vsel %vm895_vm10, %v3805_v6, %v5394_v23  ;;  %v3770_v24 = vsel %vm885_vm8, %v3738_v59, %v5338_v16  ;;  %v3771_v9 = vsel %vm885_vm8, %v3739_v42, %v5339_v53  ;;  %v5414_v23 = vunpack.i.h.bf16 %v7575_v47 }
 0x4c2   : > { %4776 = vmatmul.mubr.msk.bf16.gmra.mxu0 %vm962_vm13, %v3919_v19  ;;  %v3869_v15 = vsel %vm900_vm11, %v3837_v45, %v5429_v38  ;;  %v3803_v62 = vsel %vm890_vm9, %v3771_v9, %v5344_v29 }
 0x4c3   : > { %4779 = vmatprep.mubr.msk.bf16.mxu0 %vm962_vm13, %v3920_v37  ;;  %v7667_v43 = vpop.permute.xlu0 %5476  ;;  %v3836_v37 = vsel %vm895_vm10, %v3804_v54, %v5393_v48  ;;  %v3901_v10 = vsel %vm905_vm12, %v3869_v15, %v5434_v52  ;;  %v5709_v54 = vld [vmem:[#allocation2 + $0x120] sm:$0xff]  ;;  %v5413_v48 = vunpack.i.l.bf16 %v7575_v47 }
 0x4c4   : > { %v3868_v20 = vsel %vm900_vm11, %v3836_v37, %v5428_v26  ;;  %v5478_v38 = vunpack.i.l.bf16 %v7667_v43 }
 0x4c5   : > { %v7653_v7 = vpop.permute.xlu1 %5401  ;;  %v3900_v36 = vsel %vm905_vm12, %v3868_v20, %v5433_v46 }
 0x4c6   : > { %v5404_v21 = vunpack.i.h.bf16 %v7653_v7  ;;  %v5403_v44 = vunpack.i.l.bf16 %v7653_v7  ;;  %v3802_v7 = vsel %vm890_vm9, %v3770_v24, %v5343_v58  ;;  %v3922_v5 = vpack.c.bf16 %v3901_v10, %v3900_v36 }
 0x4c7   : > { %v7683_v1 = vpop.permute.xlu0 %5491 }
 0x4c8   : > { %v3834_v31 = vsel %vm895_vm10, %v3802_v7, %v5403_v44  ;;  %v3835_v12 = vsel %vm895_vm10, %v3803_v62, %v5404_v21  ;;  %v5389_v7 = vunpack.i.h.bf16 %v7649_v41  ;;  %v5388_v62 = vunpack.i.l.bf16 %v7649_v41 }
 0x4c9   : > { %v7655_v3 = vpop.permute.xlu1 %5406 }
 0x4ca   : > { %v5409_v56 = vunpack.i.h.bf16 %v7655_v3  ;;  %v5408_v49 = vunpack.i.l.bf16 %v7655_v3  ;;  %v5479_v3 = vunpack.i.h.bf16 %v7667_v43 }
 0x4cb   : > { %v7703_v40 = vpop.permute.xlu0 %5506 }
 0x4cc   : > { %v3681_v17 = vsel %vm871_vm3, %v5708_v22, %v5409_v56  ;;  %v3680_v6 = vsel %vm871_vm3, %v5709_v54, %v5408_v49 }
 0x4cd   : > { %v7661_v11 = vpop.permute.xlu1 %5416  ;;  %v3713_v42 = vsel %vm687_vm1, %v3681_v17, %v5414_v23  ;;  %v3712_v53 = vsel %vm687_vm1, %v3680_v6, %v5413_v48 }
 0x4ce   : > { %v3745_v37 = vsel %vm880_vm7, %v3713_v42, %v5479_v3  ;;  %v3744_v47 = vsel %vm880_vm7, %v3712_v53, %v5478_v38  ;;  %v5419_v10 = vunpack.i.h.bf16 %v7661_v11  ;;  %v5418_v41 = vunpack.i.l.bf16 %v7661_v11 }
 0x4cf   : > { %v7721_v57 = vpop.permute.xlu0 %5511 }
 0x4d0   : > { %v5514_v23 = vunpack.i.h.bf16 %v7721_v57  ;;  %v5513_v48 = vunpack.i.l.bf16 %v7721_v57 }
 0x4d1   : > { %v7671_v50 = vpop.permute.xlu1 %5421 }
 0x4d2   : > { %v5424_v22 = vunpack.i.h.bf16 %v7671_v50  ;;  %v5423_v11 = vunpack.i.l.bf16 %v7671_v50 }
 0x4d3   : > { %v5537_v2 = vpop.permute.xlu0 %5536 }
 0x4d4   : > { %v5539_v44 = vunpack.i.h.bf16 %v5537_v2  ;;  %v5538_v24 = vunpack.i.l.bf16 %v5537_v2 }
 0x4d5   : > { %v7681_v35 = vpop.permute.xlu1 %5436 }
 0x4d6   : > { %v5439_v26 = vunpack.i.h.bf16 %v7681_v35  ;;  %v3777_v43 = vsel %vm885_vm8, %v3745_v37, %v5539_v44  ;;  %v3776_v58 = vsel %vm885_vm8, %v3744_v47, %v5538_v24 }
 0x4d7   : > { %v5542_v18 = vpop.permute.xlu0 %5541 }
 0x4d8   : > { %v5544_v15 = vunpack.i.h.bf16 %v5542_v18  ;;  %v5543_v52 = vunpack.i.l.bf16 %v5542_v18 }
 0x4d9   : > { %v7693_v27 = vpop.permute.xlu1 %5441 }
 0x4da   : > { %v5444_v45 = vunpack.i.h.bf16 %v7693_v27  ;;  %v5443_v21 = vunpack.i.l.bf16 %v7693_v27 }
 0x4db   : > { %v7747_v59 = vpop.permute.xlu0 %5551 }
 0x4dd   : > { %v5447_v19 = vpop.permute.xlu1 %5446 }
 0x4de   : > { %v5449_v4 = vunpack.i.h.bf16 %v5447_v19  ;;  %v5448_v13 = vunpack.i.l.bf16 %v5447_v19  ;;  %v5438_v19 = vunpack.i.l.bf16 %v7681_v35 }
 0x4df   : > { %v7763_v29 = vpop.permute.xlu0 %5556 }
 0x4e0   : > { %v3866_v51 = vsel %vm900_vm11, %v3834_v31, %v5448_v13  ;;  %v3867_v55 = vsel %vm900_vm11, %v3835_v12, %v5449_v4  ;;  %v5710_v4 = vld [vmem:[#allocation2 + $0x110] sm:$0xff]  ;;  %v5711_v13 = vld [vmem:[#allocation2 + $0x108] sm:$0xff]  ;;  %v3808_v31 = vsel %vm890_vm9, %v3776_v58, %v5543_v52  ;;  %v3809_v12 = vsel %vm890_vm9, %v3777_v43, %v5544_v15 }
 0x4e1   : > { %v5452_v33 = vpop.permute.xlu1 %5451  ;;  %v3679_v35 = vsel %vm871_vm3, %v5710_v4, %v5439_v26  ;;  %v3678_v20 = vsel %vm871_vm3, %v5711_v13, %v5438_v19  ;;  %v5713_v52 = vld [vmem:[#allocation2 + $0x150] sm:$0xff] }
 0x4e2   : > { %v5454_v63 = vunpack.i.h.bf16 %v5452_v33  ;;  %v5453_v60 = vunpack.i.l.bf16 %v5452_v33  ;;  %v3710_v27 = vsel %vm687_vm1, %v3678_v20, %v5443_v21  ;;  %v3711_v46 = vsel %vm687_vm1, %v3679_v35, %v5444_v45  ;;  %v5712_v20 = vld [vmem:[#allocation2 + $0x158] sm:$0xff] }
 0x4e3   : > { %v7781_v36 = vpop.permute.xlu0 %5576 }
 0x4e4   : > { %v3898_v8 = vsel %vm905_vm12, %v3866_v51, %v5453_v60  ;;  %v3899_v28 = vsel %vm905_vm12, %v3867_v55, %v5454_v63  ;;  %v5474_v63 = vunpack.i.h.bf16 %v7657_v25  ;;  %v5473_v60 = vunpack.i.l.bf16 %v7657_v25 }
 0x4e5   : > { %v3921_v39 = vpack.c.bf16 %v3899_v28, %v3898_v8  ;;  %v7731_v34 = vpop.permute.xlu1 %5466  ;;  %v3742_v51 = vsel %vm880_vm7, %v3710_v27, %v5388_v62  ;;  %v3743_v55 = vsel %vm880_vm7, %v3711_v46, %v5389_v7  ;;  %v5509_v8 = vunpack.i.h.bf16 %v7703_v40 }
 0x4e6   : > { %v5508_v28 = vunpack.i.l.bf16 %v7703_v40  ;;  %v3841_v2 = vsel %vm895_vm10, %v3809_v12, %v5474_v63  ;;  %v3774_v56 = vsel %vm885_vm8, %v3742_v51, %v5418_v41  ;;  %v3775_v49 = vsel %vm885_vm8, %v3743_v55, %v5419_v10  ;;  %v7828_v63 = vld [vmem:[%s7970_s6] ss:$0 sm:$0xff] }
 0x4e7   : > { %4780 = vmatmul.mubr.msk.bf16.gmra.mxu0 %vm962_vm13, %v3921_v39  ;;  %v3873_v6 = vsel %vm900_vm11, %v3841_v2, %v5509_v8  ;;  %v3807_v42 = vsel %vm890_vm9, %v3775_v49, %v5424_v22  ;;  %v7801_v3 = vpop.permute.xlu0 %5581  ;;  %v5494_v7 = vunpack.i.h.bf16 %v7683_v1  ;;  %v5559_v51 = vunpack.i.h.bf16 %v7763_v29 }
 0x4e8   : > { %4783 = vmatprep.mubr.msk.bf16.mxu0 %vm962_vm13, %v3922_v5  ;;  %v3840_v5 = vsel %vm895_vm10, %v3808_v31, %v5473_v60  ;;  %v3905_v57 = vsel %vm905_vm12, %v3873_v6, %v5514_v23  ;;  %v5558_v55 = vunpack.i.l.bf16 %v7763_v29  ;;  %v5554_v29 = vunpack.i.h.bf16 %v7747_v59 }
 0x4e9   : > { %v7735_v0 = vpop.permute.xlu1 %5481  ;;  %v3872_v40 = vsel %vm900_vm11, %v3840_v5, %v5508_v28 }
 0x4ea   : > { %v5484_v25 = vunpack.i.h.bf16 %v7735_v0  ;;  %v5483_v18 = vunpack.i.l.bf16 %v7735_v0  ;;  %v3806_v0 = vsel %vm890_vm9, %v3774_v56, %v5423_v11  ;;  %v3904_v45 = vsel %vm905_vm12, %v3872_v40, %v5513_v48  ;;  %v5715_v48 = vld [vmem:[#allocation2 + $0x140] sm:$0xff] }
 0x4eb   : > { %v3924_v35 = vpack.c.bf16 %v3905_v57, %v3904_v45  ;;  %v5607_v13 = vpop.permute.xlu0 %5606  ;;  %v5584_v11 = vunpack.i.h.bf16 %v7801_v3  ;;  %v5469_v45 = vunpack.i.h.bf16 %v7731_v34 }
 0x4ec   : > { %v3838_v38 = vsel %vm895_vm10, %v3806_v0, %v5483_v18  ;;  %v3839_v50 = vsel %vm895_vm10, %v3807_v42, %v5484_v25  ;;  %v5609_v56 = vunpack.i.h.bf16 %v5607_v13  ;;  %v5608_v49 = vunpack.i.l.bf16 %v5607_v13 }
 0x4ed   : > { %v7737_v32 = vpop.permute.xlu1 %5486 }
 0x4ee   : > { %v5489_v24 = vunpack.i.h.bf16 %v7737_v32  ;;  %v5488_v43 = vunpack.i.l.bf16 %v7737_v32  ;;  %v5493_v32 = vunpack.i.l.bf16 %v7683_v1 }
 0x4ef   : > { %v5612_v8 = vpop.permute.xlu0 %5611 }
 0x4f0   : > { %v3685_v15 = vsel %vm871_vm3, %v5712_v20, %v5489_v24  ;;  %v3684_v27 = vsel %vm871_vm3, %v5713_v52, %v5488_v43 }
 0x4f1   : > { %v7741_v14 = vpop.permute.xlu1 %5496  ;;  %v3717_v31 = vsel %vm687_vm1, %v3685_v15, %v5494_v7  ;;  %v3716_v12 = vsel %vm687_vm1, %v3684_v27, %v5493_v32 }
 0x4f2   : > { %v3749_v2 = vsel %vm880_vm7, %v3717_v31, %v5559_v51  ;;  %v3748_v25 = vsel %vm880_vm7, %v3716_v12, %v5558_v55  ;;  %v5499_v15 = vunpack.i.h.bf16 %v7741_v14 }
 0x4f3   : > { %v3781_v23 = vsel %vm885_vm8, %v3749_v2, %v5609_v56 }
 0x4f5   : > { %v7751_v16 = vpop.permute.xlu1 %5501 }
 0x4f9   : > { %v7761_v9 = vpop.permute.xlu1 %5516 }
 0x4fa   : > { %v5518_v10 = vunpack.i.l.bf16 %v7761_v9  ;;  %v5519_v28 = vunpack.i.h.bf16 %v7761_v9  ;;  %v5714_v9 = vld [vmem:[#allocation2 + $0x138] sm:$0xff] }
 0x4fc   : > { %v3683_v0 = vsel %vm871_vm3, %v5715_v48, %v5519_v28 }
 0x4fd   : > { %v7773_v33 = vpop.permute.xlu1 %5521 }
 0x4fe   : > { %v5524_v18 = vunpack.i.h.bf16 %v7773_v33 }
 0x501   : > { %v5527_v39 = vpop.permute.xlu1 %5526 }
 0x502   : > { %v5529_v17 = vunpack.i.h.bf16 %v5527_v39  ;;  %v5528_v54 = vunpack.i.l.bf16 %v5527_v39  ;;  %v5523_v39 = vunpack.i.l.bf16 %v7773_v33  ;;  %v3780_v33 = vsel %vm885_vm8, %v3748_v25, %v5608_v49 }
 0x504   : > { %v3870_v37 = vsel %vm900_vm11, %v3838_v38, %v5528_v54  ;;  %v3871_v47 = vsel %vm900_vm11, %v3839_v50, %v5529_v17  ;;  %v5583_v17 = vunpack.i.l.bf16 %v7801_v3  ;;  %v3682_v54 = vsel %vm871_vm3, %v5714_v9, %v5518_v10 }
 0x505   : > { %v5532_v53 = vpop.permute.xlu1 %5531  ;;  %v3714_v42 = vsel %vm687_vm1, %v3682_v54, %v5523_v39  ;;  %v5613_v38 = vunpack.i.l.bf16 %v5612_v8  ;;  %v5468_v3 = vunpack.i.l.bf16 %v7731_v34  ;;  %v3715_v50 = vsel %vm687_vm1, %v3683_v0, %v5524_v18 }
 0x506   : > { %v5534_v26 = vunpack.i.h.bf16 %v5532_v53  ;;  %v5533_v19 = vunpack.i.l.bf16 %v5532_v53  ;;  %v5614_v53 = vunpack.i.h.bf16 %v5612_v8  ;;  %v3686_v34 = vsel %vm871_vm3, %v7526_v30, %v5583_v17 }
 0x507   : > { %v3746_v57 = vsel %vm880_vm7, %v3714_v42, %v5468_v3  ;;  %v3812_v24 = vsel %vm890_vm9, %v3780_v33, %v5613_v38 }
 0x508   : > { %v3902_v21 = vsel %vm905_vm12, %v3870_v37, %v5533_v19  ;;  %v3903_v44 = vsel %vm905_vm12, %v3871_v47, %v5534_v26  ;;  %v5553_v26 = vunpack.i.l.bf16 %v7747_v59  ;;  %v5579_v19 = vunpack.i.h.bf16 %v7781_v36  ;;  %v5617_v47 = vpop.permute.xlu0 %5616 }
 0x509   : > { %v3923_v58 = vpack.c.bf16 %v3903_v44, %v3902_v21  ;;  %v7813_v4 = vpop.permute.xlu1 %5546  ;;  %v5578_v37 = vunpack.i.l.bf16 %v7781_v36  ;;  %v3813_v43 = vsel %vm890_vm9, %v3781_v23, %v5614_v53  ;;  %v3747_v59 = vsel %vm880_vm7, %v3715_v50, %v5469_v45 }
 0x50a   : > { %v3687_v36 = vsel %vm871_vm3, %v7524_v61, %v5584_v11  ;;  %v5619_v20 = vunpack.i.h.bf16 %v5617_v47  ;;  %v5618_v52 = vunpack.i.l.bf16 %v5617_v47  ;;  %v3844_v7 = vsel %vm895_vm10, %v3812_v24, %v5553_v26  ;;  %v8050_v47 = vld [vmem:[#allocation14_spill] sm:$0xff] }
 0x50b   : > { %4784 = vmatmul.mubr.msk.bf16.gmra.mxu0 %vm962_vm13, %v3923_v58  ;;  %v5498_v58 = vunpack.i.l.bf16 %v7741_v14  ;;  %v3845_v32 = vsel %vm895_vm10, %v3813_v43, %v5554_v29  ;;  %v3779_v61 = vsel %vm885_vm8, %v3747_v59, %v5499_v15  ;;  %v5503_v14 = vunpack.i.l.bf16 %v7751_v16 }
 0x50c   : > { %4787 = vmatprep.mubr.msk.bf16.mxu0 %vm962_vm13, %v3924_v35  ;;  %v5549_v10 = vunpack.i.h.bf16 %v7813_v4  ;;  %v3877_v2 = vsel %vm900_vm11, %v3845_v32, %v5579_v19  ;;  %v4999_v45 = vunpack.i.h.bf16 %v8050_v47 }
 0x50d   : > { %v7819_v46 = vpop.permute.xlu1 %5561  ;;  %v3778_v27 = vsel %vm885_vm8, %v3746_v57, %v5498_v58  ;;  %v4998_v57 = vunpack.i.l.bf16 %v8050_v47 }
 0x50e   : > { %v4765_v62 = vpop.f32.mrf.mxu0  ;;  %v5563_v31 = vunpack.i.l.bf16 %v7819_v46 }
 0x50f   : > { %v4065_v21 = vadd.f32 %v4765_v62, %v7828_v63  ;;  %v5564_v62 = vunpack.i.h.bf16 %v7819_v46  ;;  %v3810_v46 = vsel %vm890_vm9, %v3778_v27, %v5503_v14 }
 0x510   : > { %v4056_v60 = vpop.f32.mrf.mxu0 }
 0x511   : > { %v7833_v41 = vpop.permute.xlu1 %5566  ;;  %v4057_v1 = vadd.f32 %v7828_v63, %v4056_v60  ;;  %v5504_v60 = vunpack.i.h.bf16 %v7751_v16  ;;  %v3842_v16 = vsel %vm895_vm10, %v3810_v46, %v5563_v31  ;;  %v1027_v46 = vpop.trf.xlu0 }
 0x512   : > { %v4766_v5 = vpop.f32.mrf.mxu0  ;;  %v5569_v56 = vunpack.i.h.bf16 %v7833_v41  ;;  %v5568_v49 = vunpack.i.l.bf16 %v7833_v41  ;;  %1043 = vst.msk [vmem:[%s663_s27] sm:$0xff] %vm687_vm1, %v1027_v46 }
 0x513   : > { %4183 = vxpose.xlu0.b32.start [1/16] (narrow) %v4057_v1, 8  ;;  %v4068_v12 = vadd.f32 %v4766_v5, %v7828_v63  ;;  %v5548_v1 = vunpack.i.l.bf16 %v7813_v4  ;;  %v3811_v39 = vsel %vm890_vm9, %v3779_v61, %v5504_v60  ;;  %v3876_v5 = vsel %vm900_vm11, %v3844_v7, %v5578_v37 }
 0x514   : > { %v4059_v22 = vpop.f32.mrf.mxu0  ;;  %v3843_v25 = vsel %vm895_vm10, %v3811_v39, %v5564_v62  ;;  %v3908_v54 = vsel %vm905_vm12, %v3876_v5, %v5618_v52 }
 0x515   : > { %v7845_v40 = vpop.permute.xlu1 %5571  ;;  %v4060_v6 = vadd.f32 %v7828_v63, %v4059_v22 }
 0x516   : > { %v5574_v41 = vunpack.i.h.bf16 %v7845_v40  ;;  %v5573_v42 = vunpack.i.l.bf16 %v7845_v40 }
 0x517   : > { %4184 = vxpose.xlu0.b32.cont [2/16] (narrow) %v4060_v6, 8  ;;  %v3909_v6 = vsel %vm905_vm12, %v3877_v2, %v5619_v20  ;;  %v1805_v2 = vpop.trf.xlu0 }
 0x518   : > { %v3926_v3 = vpack.c.bf16 %v3909_v6, %v3908_v54  ;;  %1821 = vst.msk [vmem:[%s659_s7] sm:$0xff] %vm905_vm12, %v1805_v2 }
 0x519   : > { %v5587_v44 = vpop.permute.xlu1 %5586 }
 0x51a   : > { %v5589_v35 = vunpack.i.h.bf16 %v5587_v44  ;;  %v5588_v13 = vunpack.i.l.bf16 %v5587_v44 }
 0x51b   : > { %4185 = vxpose.xlu0.b32.cont [3/16] (narrow) %v4065_v21, 8 }
 0x51c   : > { %v3719_v51 = vsel %vm687_vm1, %v3687_v36, %v5589_v35  ;;  %v3718_v55 = vsel %vm687_vm1, %v3686_v34, %v5588_v13 }
 0x51d   : > { %v5592_v30 = vpop.permute.xlu1 %5591  ;;  %v3750_v18 = vsel %vm880_vm7, %v3718_v55, %v5548_v1  ;;  %v3751_v29 = vsel %vm880_vm7, %v3719_v51, %v5549_v10 }
 0x51e   : > { %v5594_v8 = vunpack.i.h.bf16 %v5592_v30  ;;  %v5593_v28 = vunpack.i.l.bf16 %v5592_v30  ;;  %v3782_v23 = vsel %vm885_vm8, %v3750_v18, %v5568_v49  ;;  %v3783_v33 = vsel %vm885_vm8, %v3751_v29, %v5569_v56 }
 0x51f   : > { %4186 = vxpose.xlu0.b32.cont [4/16] (narrow) %v4068_v12, 8  ;;  %v3814_v19 = vsel %vm890_vm9, %v3782_v23, %v5573_v42  ;;  %v3815_v37 = vsel %vm890_vm9, %v3783_v33, %v5574_v41 }
 0x520   : > { %v3874_v17 = vsel %vm900_vm11, %v3842_v16, %v5593_v28  ;;  %v3875_v9 = vsel %vm900_vm11, %v3843_v25, %v5594_v8  ;;  %v3846_v40 = vsel %vm895_vm10, %v3814_v19, %v4998_v57  ;;  %v3847_v44 = vsel %vm895_vm10, %v3815_v37, %v4999_v45 }
 0x521   : > { %v5597_v4 = vpop.permute.xlu1 %5596 }
 0x522   : > { %v5599_v22 = vunpack.i.h.bf16 %v5597_v4  ;;  %v5598_v11 = vunpack.i.l.bf16 %v5597_v4 }
 0x524   : > { %v3906_v48 = vsel %vm905_vm12, %v3874_v17, %v5598_v11  ;;  %v3907_v0 = vsel %vm905_vm12, %v3875_v9, %v5599_v22 }
 0x525   : > { %v3925_v53 = vpack.c.bf16 %v3907_v0, %v3906_v48  ;;  %v5602_v38 = vpop.permute.xlu1 %5601 }
 0x526   : > { %v5604_v50 = vunpack.i.h.bf16 %v5602_v38  ;;  %v5603_v26 = vunpack.i.l.bf16 %v5602_v38 }
 0x527   : > { %4788 = vmatmul.mubr.msk.bf16.gmra.mxu0 %vm962_vm13, %v3925_v53 }
 0x528   : > { %4791 = vmatprep.mubr.msk.bf16.mxu0 %vm962_vm13, %v3926_v3  ;;  %v3878_v58 = vsel %vm900_vm11, %v3846_v40, %v5603_v26  ;;  %v3879_v59 = vsel %vm900_vm11, %v3847_v44, %v5604_v50 }
 0x529   : > { %v5622_v21 = vpop.permute.xlu1 %5621 }
 0x52a   : > { %v5624_v24 = vunpack.i.h.bf16 %v5622_v21  ;;  %v5623_v43 = vunpack.i.l.bf16 %v5622_v21 }
 0x52c   : > { %v3910_v35 = vsel %vm905_vm12, %v3878_v58, %v5623_v43  ;;  %v3911_v13 = vsel %vm905_vm12, %v3879_v59, %v5624_v24 }
 0x52d   : > { %v3927_v36 = vpack.c.bf16 %v3911_v13, %v3910_v35 }
 0x52f   : > { %4792 = vmatmul.mubr.msk.bf16.gmra.mxu0 %vm962_vm13, %v3927_v36 }
 0x536   : > { %v4769_v34 = vpop.f32.mrf.mxu0 }
 0x537   : > { %v4081_v32 = vadd.f32 %v4769_v34, %v7828_v63 }
 0x538   : > { %v4072_v20 = vpop.f32.mrf.mxu0 }
 0x539   : > { %v4073_v15 = vadd.f32 %v7828_v63, %v4072_v20 }
 0x53a   : > { %v4770_v52 = vpop.f32.mrf.mxu0 }
 0x53b   : > { %4187 = vxpose.xlu0.b32.cont [5/16] (narrow) %v4073_v15, 8  ;;  %v4084_v62 = vadd.f32 %v4770_v52, %v7828_v63 }
 0x53c   : > { %v4075_v27 = vpop.f32.mrf.mxu0 }
 0x53d   : > { %v4076_v7 = vadd.f32 %v7828_v63, %v4075_v27 }
 0x53f   : > { %4188 = vxpose.xlu0.b32.cont [6/16] (narrow) %v4076_v7, 8 }
 0x543   : > { %4189 = vxpose.xlu0.b32.cont [7/16] (narrow) %v4081_v32, 8 }
 0x547   : > { %4190 = vxpose.xlu0.b32.cont [8/16] (narrow) %v4084_v62, 8 }
 0x55e   : > { %v4773_v31 = vpop.f32.mrf.mxu0 }
 0x55f   : > { %v4097_v51 = vadd.f32 %v4773_v31, %v7828_v63 }
 0x560   : > { %v4088_v61 = vpop.f32.mrf.mxu0 }
 0x561   : > { %v4089_v12 = vadd.f32 %v7828_v63, %v4088_v61 }
 0x562   : > { %v4774_v30 = vpop.f32.mrf.mxu0 }
 0x563   : > { %4191 = vxpose.xlu0.b32.cont [9/16] (narrow) %v4089_v12, 8  ;;  %v4100_v55 = vadd.f32 %v4774_v30, %v7828_v63 }
 0x564   : > { %v4091_v60 = vpop.f32.mrf.mxu0 }
 0x565   : > { %v4092_v14 = vadd.f32 %v7828_v63, %v4091_v60 }
 0x567   : > { %4192 = vxpose.xlu0.b32.cont [10/16] (narrow) %v4092_v14, 8 }
 0x56b   : > { %4193 = vxpose.xlu0.b32.cont [11/16] (narrow) %v4097_v51, 8 }
 0x56f   : > { %4194 = vxpose.xlu0.b32.cont [12/16] (narrow) %v4100_v55, 8 }
 0x582   : > { %v4777_v10 = vpop.f32.mrf.mxu0 }
 0x583   : > { %v4113_v16 = vadd.f32 %v4777_v10, %v7828_v63 }
 0x584   : > { %v4104_v1 = vpop.f32.mrf.mxu0 }
 0x585   : > { %v4105_v8 = vadd.f32 %v7828_v63, %v4104_v1 }
 0x586   : > { %v4778_v28 = vpop.f32.mrf.mxu0 }
 0x587   : > { %4195 = vxpose.xlu0.b32.cont [13/16] (narrow) %v4105_v8, 8  ;;  %v4116_v25 = vadd.f32 %v4778_v28, %v7828_v63 }
 0x588   : > { %v4107_v39 = vpop.f32.mrf.mxu0 }
 0x589   : > { %v4108_v5 = vadd.f32 %v7828_v63, %v4107_v39 }
 0x58b   : > { %4196 = vxpose.xlu0.b32.cont [14/16] (narrow) %v4108_v5, 8 }
 0x58f   : > { %4197 = vxpose.xlu0.b32.cont [15/16] (narrow) %v4113_v16, 8 }
 0x593   : > { %4198 = vxpose.xlu0.b32.end [16/16] (narrow) %v4116_v25, 8 }
 0x5a7   : > { %v4781_v18 = vpop.f32.mrf.mxu0 }
 0x5a8   : > { %v4129_v11 = vadd.f32 %v4781_v18, %v7828_v63 }
 0x5a9   : > { %v4120_v29 = vpop.f32.mrf.mxu0 }
 0x5aa   : > { %v4121_v4 = vadd.f32 %v7828_v63, %v4120_v29 }
 0x5ab   : > { %v4782_v56 = vpop.f32.mrf.mxu0 }
 0x5ac   : > { %4215 = vxpose.xlu1.b32.start [1/16] (narrow) %v4121_v4, 8  ;;  %v4132_v17 = vadd.f32 %v4782_v56, %v7828_v63 }
 0x5ad   : > { %v4123_v49 = vpop.f32.mrf.mxu0 }
 0x5ae   : > { %v4124_v22 = vadd.f32 %v7828_v63, %v4123_v49 }
 0x5b0   : > { %4216 = vxpose.xlu1.b32.cont [2/16] (narrow) %v4124_v22, 8 }
 0x5b4   : > { %4217 = vxpose.xlu1.b32.cont [3/16] (narrow) %v4129_v11, 8 }
 0x5b8   : > { %4218 = vxpose.xlu1.b32.cont [4/16] (narrow) %v4132_v17, 8 }
 0x5cb   : > { %v4785_v9 = vpop.f32.mrf.mxu0 }
 0x5cc   : > { %v4145_v41 = vadd.f32 %v4785_v9, %v7828_v63 }
 0x5cd   : > { %v4136_v54 = vpop.f32.mrf.mxu0 }
 0x5ce   : > { %v4137_v6 = vadd.f32 %v7828_v63, %v4136_v54 }
 0x5cf   : > { %v4786_v23 = vpop.f32.mrf.mxu0 }
 0x5d0   : > { %4219 = vxpose.xlu1.b32.cont [5/16] (narrow) %v4137_v6, 8  ;;  %v4148_v42 = vadd.f32 %v4786_v23, %v7828_v63 }
 0x5d1   : > { %v4139_v33 = vpop.f32.mrf.mxu0 }
 0x5d2   : > { %v4140_v48 = vadd.f32 %v7828_v63, %v4139_v33 }
 0x5d3   : > { %v4199_v0 = vpop.trf.xlu0 }
 0x5d4   : > { %4220 = vxpose.xlu1.b32.cont [6/16] (narrow) %v4140_v48, 8  ;;  %4247 = vst [vmem:[%s7947_s28] sm:$0xff] %v4199_v0 }
 0x5d8   : > { %4221 = vxpose.xlu1.b32.cont [7/16] (narrow) %v4145_v41, 8 }
 0x5dc   : > { %4222 = vxpose.xlu1.b32.cont [8/16] (narrow) %v4148_v42, 8 }
 0x5e7   : > { %v4789_v53 = vpop.f32.mrf.mxu0 }
 0x5e8   : > { %v4161_v47 = vadd.f32 %v4789_v53, %v7828_v63 }
 0x5e9   : > { %v4152_v38 = vpop.f32.mrf.mxu0 }
 0x5ea   : > { %v4153_v3 = vadd.f32 %v7828_v63, %v4152_v38 }
 0x5eb   : > { %v4790_v50 = vpop.f32.mrf.mxu0 }
 0x5ec   : > { %4223 = vxpose.xlu1.b32.cont [9/16] (narrow) %v4153_v3, 8  ;;  %v4164_v57 = vadd.f32 %v4790_v50, %v7828_v63 }
 0x5ed   : > { %v4155_v26 = vpop.f32.mrf.mxu0 }
 0x5ee   : > { %v4156_v19 = vadd.f32 %v7828_v63, %v4155_v26 }
 0x5ef   : > { %v4793_v37 = vpop.f32.mrf.mxu0 }
 0x5f0   : > { %4224 = vxpose.xlu1.b32.cont [10/16] (narrow) %v4156_v19, 8  ;;  %v4177_v43 = vadd.f32 %v4793_v37, %v7828_v63 }
 0x5f1   : > { %v4168_v45 = vpop.f32.mrf.mxu0 }
 0x5f2   : > { %v4169_v40 = vadd.f32 %v7828_v63, %v4168_v45 }
 0x5f3   : > { %v4794_v21 = vpop.f32.mrf.mxu0 }
 0x5f4   : > { %4225 = vxpose.xlu1.b32.cont [11/16] (narrow) %v4161_v47, 8  ;;  %v4180_v58 = vadd.f32 %v4794_v21, %v7828_v63 }
 0x5f5   : > { %v4171_v44 = vpop.f32.mrf.mxu0 }
 0x5f6   : > { %v4172_v24 = vadd.f32 %v7828_v63, %v4171_v44 }
 0x5f8   : > { %4226 = vxpose.xlu1.b32.cont [12/16] (narrow) %v4164_v57, 8 }
 0x5fc   : > { %4227 = vxpose.xlu1.b32.cont [13/16] (narrow) %v4169_v40, 8 }
 0x600   : > { %4228 = vxpose.xlu1.b32.cont [14/16] (narrow) %v4172_v24, 8 }
 0x604   : > { %4229 = vxpose.xlu1.b32.cont [15/16] (narrow) %v4177_v43, 8 }
 0x608   : > { %4230 = vxpose.xlu1.b32.end [16/16] (narrow) %v4180_v58, 8 }
 0x648   : > { %v4231_v59 = vpop.trf.xlu1 }
 0x649   : > { %4248 = vst [vmem:[%s7947_s28 + $0x8] sm:$0xff] %v4231_v59 }
 0x64a PF: > { %s30_s0 = sadd.s32 1, %s5722_s0  }
 0x64b   : > { %p27_p4 = scmp.ge.s32.totalorder %s30_s0, 4  }
 0x64d   :  { %29 = sbr.rel (!%p27_p4) target bundleno = 7 (0x7), region = 151 }

</bundles_post_ra>
